<compile_context>
chip_gen: v7x
topology: tpu7x:2x2x1
jax: 0.10.0
libtpu: 0.0.40
codegen_flags: <defaults>
</compile_context>

<pallas_src>
import functools
import numpy as np

import jax
import jax.numpy as jnp
from jax.experimental import pallas as pl
from jax.experimental.pallas import tpu as pltpu

V_THRESHOLD = 1.0               # spikingjelly IFNode default threshold
SPIKE_DTYPE = jnp.bfloat16      # spikes are exactly 0/1 -> bf16 is lossless
WEIGHT_DTYPE = jnp.bfloat16     # bf16 x bf16 -> f32 native MXU path
PAD_ROWS = 2                    # zero image-rows added above & below (conv halo)
VMEM_LIMIT = 32 * 1024 * 1024

CFG = [8, 'M', 16, 'M', 32]     # small VGG-style cfg (batch_norm=False)
HIDDEN = 128                    # stands in for 4096
NUM_CLASSES = 10
CIN_PAD = 16                    # first conv K: 3 -> 16 (sublane align), NOT 128


def _ceil_to(x, m):
    return ((x + m - 1) // m) * m


# ----------------------------------------------------------------------------
# In-kernel helpers
# ----------------------------------------------------------------------------
def _pool2x2(y):
    """2x2 / stride-2 max pool of an (H, W, C) tile using static slices only."""
    H, W, C = y.shape
    y4 = y.reshape(H // 2, 2, W, C)
    a = jnp.maximum(y4[:, 0], y4[:, 1])                     # (H/2, W, C)
    a4 = a.reshape(H // 2, W // 2, 2, C)
    return jnp.maximum(a4[:, :, 0, :], a4[:, :, 1, :])      # (H/2, W/2, C)


# ----------------------------------------------------------------------------
# Pallas kernels
# ----------------------------------------------------------------------------
def _conv3x3_if_kernel(x_ref, w_ref, b_ref, ml_ref, mr_ref, o_ref, *,
                       H, W, pool, pad_out, v_th):
    """Fused Conv2d(3x3, pad=1) + bias + IFNode spike (+ optional fused 2x2
    max-pool).  One image per grid step.

    x_ref : (1, (H+4)*W, Cin) bf16 -- flattened image with 2 zero rows of halo
            at top and bottom (no column halo; horizontal wrap is corrected by
            the ml/mr masks).
    The 9 kernel taps are contiguous row-offset windows at static offsets:
    window(ky,kx) starts at (ky+1)*W + kx - 1 (always >= 0).
    """
    cout = w_ref.shape[-1]
    HW = H * W
    # 9 shifted matmul-accumulations, grouped by kx so the horizontal-wrap
    # correction is two cheap masked adds on the f32 accumulators.
    groups = []
    for kx in range(3):
        acc = jnp.zeros((HW, cout), jnp.float32)
        for ky in range(3):
            d = (ky + 1) * W + (kx - 1)                     # static offset >= 0
            win = x_ref[0, d:d + HW, :]                     # (HW, Cin) bf16
            acc = acc + jnp.dot(win, w_ref[ky * 3 + kx],
                                preferred_element_type=jnp.float32)
        groups.append(acc)
    pre = (groups[1]
           + ml_ref[...] * groups[0]                        # zero where ox == 0
           + mr_ref[...] * groups[2]                        # zero where ox == W-1
           + b_ref[...])
    # IFNode single-step from v=0 with hard reset: spike = heaviside(v - v_th).
    spk = (pre >= v_th).astype(jnp.float32)                 # f32 epilogue (v5e)
    if pool:
        y3 = _pool2x2(spk.reshape(H, W, cout))              # fused MaxPool2d(2,2)
        Ho, Wo = H // 2, W // 2
    else:
        y3 = None
        Ho, Wo = H, W
    if pad_out:
        # Emit the next conv layer's zero halo rows directly (no HBM pad pass).
        if y3 is None:
            y3 = spk.reshape(H, W, cout)
        z = jnp.zeros((PAD_ROWS, Wo, cout), o_ref.dtype)
        o_ref[0] = jnp.concatenate([z, y3.astype(o_ref.dtype), z], axis=0)
    else:
        flat = spk if y3 is None else y3.reshape(Ho * Wo, cout)
        o_ref[0] = flat.astype(o_ref.dtype)


def _classifier_kernel(x_ref, w1_ref, b1_ref, w2_ref, b2_ref, w3_ref, b3_ref,
                       o_ref, *, v_th):
    """Linear -> IF -> (Dropout=id) -> Linear -> IF -> (Dropout=id) -> Linear,
    fused; intermediates never leave VMEM.  AdaptiveAvgPool + flatten are
    pre-folded into w1 host-side, so x is the last conv's raw bf16 spikes."""
    h = jnp.dot(x_ref[...], w1_ref[...],
                preferred_element_type=jnp.float32) + b1_ref[...]
    h = (h >= v_th).astype(w2_ref.dtype)                    # bf16 spikes (exact)
    h = jnp.dot(h, w2_ref[...],
                preferred_element_type=jnp.float32) + b2_ref[...]
    h = (h >= v_th).astype(w3_ref.dtype)
    y = jnp.dot(h, w3_ref[...],
                preferred_element_type=jnp.float32) + b3_ref[...]
    o_ref[...] = y.astype(o_ref.dtype)


# ----------------------------------------------------------------------------
# Wrappers
# ----------------------------------------------------------------------------
def conv3x3_if(x_flat, w, b, *, H, W, pool, pad_out):
    """x_flat: (N, (H+4)*W, Cin) bf16 row-padded flat image.
    Returns (spikes, Ho, Wo); spikes are (N, (Ho+4)*Wo, Cout) bf16 row-padded
    flat when pad_out=True, else (N, Ho*Wo, Cout) bf16."""
    N = x_flat.shape[0]
    cin = x_flat.shape[-1]
    cout = w.shape[-1]
    HW = H * W
    if pool:
        assert H % 2 == 0 and W % 2 == 0
    Ho, Wo = (H // 2, W // 2) if pool else (H, W)

    # Host-built constant masks: zero the horizontal-wrap garbage rows for the
    # kx=0 (output col 0) and kx=2 (output col W-1) tap groups.
    r = np.arange(HW)
    mask_l = jnp.asarray(((r % W) != 0).astype(np.float32).reshape(HW, 1))
    mask_r = jnp.asarray(((r % W) != (W - 1)).astype(np.float32).reshape(HW, 1))

    if pad_out:
        out_shape = jax.ShapeDtypeStruct((N, Ho + 2 * PAD_ROWS, Wo, cout),
                                         SPIKE_DTYPE)
        out_spec = pl.BlockSpec((1, Ho + 2 * PAD_ROWS, Wo, cout),
                                lambda n: (n, 0, 0, 0))
        out_bytes = N * (Ho + 2 * PAD_ROWS) * Wo * cout * 2
    else:
        out_shape = jax.ShapeDtypeStruct((N, Ho * Wo, cout), SPIKE_DTYPE)
        out_spec = pl.BlockSpec((1, Ho * Wo, cout), lambda n: (n, 0, 0))
        out_bytes = N * Ho * Wo * cout * 2

    kern = functools.partial(_conv3x3_if_kernel, H=H, W=W, pool=pool,
                             pad_out=pad_out, v_th=V_THRESHOLD)
    cost = pl.CostEstimate(
        flops=2 * N * HW * 9 * cin * cout,
        transcendentals=0,
        bytes_accessed=int(x_flat.size * 2 + w.size * 2 + b.size * 4
                           + 2 * HW * 4 + out_bytes))

    y = pl.pallas_call(
        kern,
        out_shape=out_shape,
        grid=(N,),
        in_specs=[pl.BlockSpec((1, (H + 2 * PAD_ROWS) * W, cin),
                               lambda n: (n, 0, 0)),
                  # NOTE: weights/bias/masks are grid-constant; on v7x at real
                  # weight sizes add pipeline_mode=pl.Buffered(1) to halve
                  # their resident VMEM.
                  pl.BlockSpec((9, cin, cout), lambda n: (0, 0, 0)),
                  pl.BlockSpec((1, cout), lambda n: (0, 0)),
                  pl.BlockSpec((HW, 1), lambda n: (0, 0)),
                  pl.BlockSpec((HW, 1), lambda n: (0, 0))],
        out_specs=out_spec,
        compiler_params=pltpu.CompilerParams(
            dimension_semantics=("parallel",),
            vmem_limit_bytes=VMEM_LIMIT),
        cost_estimate=cost,
    )(x_flat, w, b, mask_l, mask_r)

    if pad_out:
        # Free row-major metadata reshape back to the flat layout the next
        # conv kernel consumes.
        y = y.reshape(N, (Ho + 2 * PAD_ROWS) * Wo, cout)
    return y, Ho, Wo


def classifier(x, p1, p2, p3):
    """Fused Linear->IF->Linear->IF->Linear.  x: (N, F) bf16 spikes.
    TODO(synk): at real sizes (25088x4096) K/N-tile with a VMEM accumulator
    and grid over batch blocks instead of whole-weight blocks."""
    N, F = x.shape
    (w1, b1), (w2, b2), (w3, b3) = p1, p2, p3
    H1, H2, D = w1.shape[1], w2.shape[1], w3.shape[1]
    cost = pl.CostEstimate(
        flops=2 * N * (F * H1 + H1 * H2 + H2 * D),
        transcendentals=0,
        bytes_accessed=int(x.size * 2 + (w1.size + w2.size + w3.size) * 2
                           + (b1.size + b2.size + b3.size) * 4 + N * D * 4))
    kern = functools.partial(_classifier_kernel, v_th=V_THRESHOLD)
    return pl.pallas_call(
        kern,
        out_shape=jax.ShapeDtypeStruct((N, D), jnp.float32),
        grid=(1,),
        in_specs=[pl.BlockSpec((N, F), lambda i: (0, 0)),
                  pl.BlockSpec((F, H1), lambda i: (0, 0)),
                  pl.BlockSpec((1, H1), lambda i: (0, 0)),
                  pl.BlockSpec((H1, H2), lambda i: (0, 0)),
                  pl.BlockSpec((1, H2), lambda i: (0, 0)),
                  pl.BlockSpec((H2, D), lambda i: (0, 0)),
                  pl.BlockSpec((1, D), lambda i: (0, 0))],
        out_specs=pl.BlockSpec((N, D), lambda i: (0, 0)),
        compiler_params=pltpu.CompilerParams(
            dimension_semantics=("arbitrary",),
            vmem_limit_bytes=VMEM_LIMIT),
        cost_estimate=cost,
    )(x, w1, b1, w2, b2, w3, b3)


# ----------------------------------------------------------------------------
# Parameter creation / PyTorch-layout conversion
# ----------------------------------------------------------------------------
def _adaptive_pool_matrix(in_size, out_size):
    """Row-stochastic pooling matrix matching torch AdaptiveAvgPool windowing."""
    M = np.zeros((out_size, in_size), np.float32)
    for i in range(out_size):
        s = (i * in_size) // out_size
        e = -(-((i + 1) * in_size) // out_size)             # ceil
        M[i, s:e] = 1.0 / (e - s)
    return M


def init_params(key, cfg, num_classes, hidden, img_hw):
    """Create PyTorch-initialized weights and convert to the kernel layouts."""
    H, W = img_hw
    params = {"convs": [], "fcs": [], "cin_pad": CIN_PAD}
    in_c = 3
    last_c = 3
    n_pool = 0
    conv_idx = 0
    for v in cfg:
        if v == 'M':
            n_pool += 1
            continue
        key, kw = jax.random.split(key)
        fan_out = v * 9
        std = float(np.sqrt(2.0 / fan_out))                 # kaiming_normal_(fan_out, relu)
        w_oihw = jax.random.normal(kw, (v, in_c, 3, 3), jnp.float32) * std
        b = jnp.zeros((1, v), jnp.float32)                  # constant_(bias, 0)
        cin_p = CIN_PAD if conv_idx == 0 else in_c          # only pad the 3-ch input K
        w = jnp.transpose(w_oihw, (2, 3, 1, 0))             # (3, 3, cin, cout)
        w = jnp.pad(w, ((0, 0), (0, 0), (0, cin_p - in_c), (0, 0)))
        w = w.reshape(9, cin_p, v).astype(WEIGHT_DTYPE)
        params["convs"].append((w, b))
        in_c = last_c = v
        conv_idx += 1

    Hf, Wf = H // (2 ** n_pool), W // (2 ** n_pool)
    S = Hf * Wf

    key, k1, k2, k3 = jax.random.split(key, 4)
    # torch-layout classifier weights: normal_(0, 0.01), biases zero.
    w1 = jax.random.normal(k1, (hidden, last_c * 49), jnp.float32) * 0.01
    w2 = jax.random.normal(k2, (hidden, hidden), jnp.float32) * 0.01
    w3 = jax.random.normal(k3, (num_classes, hidden), jnp.float32) * 0.01

    # Fold AdaptiveAvgPool2d((7,7)) + channel-major torch.flatten into w1:
    # h1[d] = sum_{p,c} x[p,c] * W1'[p*C+c, d],
    # W1'[p*C+c, d] = sum_s kron(Ph,Pw)[s,p] * w1[d, c*49+s].
    Mh = _adaptive_pool_matrix(Hf, 7)
    Mw = _adaptive_pool_matrix(Wf, 7)
    M = jnp.asarray(np.kron(Mh, Mw))                        # (49, S)
    w1r = w1.reshape(hidden, last_c, 49)                    # [d, c, s]
    w1f = jnp.einsum('sp,dcs->pcd', M, w1r).reshape(S * last_c, hidden)

    d_pad = _ceil_to(num_classes, 128)                      # lane-dense final matmul
    w3p = jnp.pad(jnp.transpose(w3), ((0, 0), (0, d_pad - num_classes)))

    params["fcs"] = [
        (w1f.astype(WEIGHT_DTYPE), jnp.zeros((1, hidden), jnp.float32)),
        (jnp.transpose(w2).astype(WEIGHT_DTYPE), jnp.zeros((1, hidden), jnp.float32)),
        (w3p.astype(WEIGHT_DTYPE), jnp.zeros((1, d_pad), jnp.float32)),
    ]
    return params


# ----------------------------------------------------------------------------
# SpikingVGG forward
# ----------------------------------------------------------------------------
def spiking_vgg_forward(params, x_nchw, cfg, num_classes):
    """x_nchw: (N, 3, H, W) PyTorch layout.  Returns logits (N, num_classes)."""
    N, C, H, W = x_nchw.shape
    cin_pad = params["cin_pad"]
    # One-time input prep: NHWC, pad channels 3->16 (K align), add the 2-row
    # halo and flatten (all subsequent halos are produced inside the conv
    # kernels, so there are no per-layer HBM pad passes).
    x = jnp.transpose(x_nchw, (0, 2, 3, 1))
    x = jnp.pad(x, ((0, 0), (PAD_ROWS, PAD_ROWS), (0, 0), (0, cin_pad - C)))
    x = x.reshape(N, (H + 2 * PAD_ROWS) * W, cin_pad).astype(SPIKE_DTYPE)

    n_conv = sum(1 for v in cfg if v != 'M')
    ci = 0
    i = 0
    while i < len(cfg):
        v = cfg[i]
        # TODO(synk): standalone MaxPool (not directly after a conv) is not
        # supported in this fused pipeline; standard VGG cfgs never need it.
        assert v != 'M', "MaxPool must follow a conv layer"
        pool = (i + 1 < len(cfg)) and (cfg[i + 1] == 'M')
        pad_out = (ci + 1) < n_conv                          # another conv follows
        w, b = params["convs"][ci]
        x, H, W = conv3x3_if(x, w, b, H=H, W=W, pool=pool, pad_out=pad_out)
        ci += 1
        i += 2 if pool else 1

    # avgpool(7,7) + torch.flatten(x, 1) are folded into the first FC weight;
    # the last conv's bf16 spikes feed the classifier directly.
    x = x.reshape(N, -1)                                     # (N, Hf*Wf*C) bf16
    logits = classifier(x, *params["fcs"])                   # (N, D_pad) f32
    return logits[:, :num_classes]


if __name__ == "__main__":
    key = jax.random.PRNGKey(0)
    k_x, k_p = jax.random.split(key)

    N, C, H, W = 2, 3, 16, 16
    x_nchw = jax.random.normal(k_x, (N, C, H, W), jnp.float32)   # PyTorch NCHW input

    params = init_params(k_p, CFG, NUM_CLASSES, HIDDEN, img_hw=(H, W))
    logits = spiking_vgg_forward(params, x_nchw, CFG, NUM_CLASSES)
    jax.block_until_ready(logits)

    assert logits.shape == (N, NUM_CLASSES)
    assert bool(jnp.all(jnp.isfinite(logits)))
    print("KERNEL_OK")
</pallas_src>

<mosaic_0001>
module attributes {stable_mosaic.version = 11 : i64} {
  func.func @_conv3x3_if_kernel(%arg0: i32, %arg1: memref<1x320x16xbf16, #tpu.memory_space<vmem>>, %arg2: memref<9x16x8xbf16, #tpu.memory_space<vmem>>, %arg3: memref<1x8xf32, #tpu.memory_space<vmem>>, %arg4: memref<256x1xf32, #tpu.memory_space<vmem>>, %arg5: memref<256x1xf32, #tpu.memory_space<vmem>>, %arg6: memref<1x12x8x8xbf16, #tpu.memory_space<vmem>>) attributes {dimension_semantics = [#tpu.dimension_semantics<parallel>], iteration_bounds = array<i64: 2>, scalar_prefetch = 0 : i64, scratch_operands = 0 : i64, tpu.core_type = #tpu.core_type<tc>, window_params = [{transform_indices = @transform_0, window_bounds = array<i64: 1, 320, 16>}, {pipeline_mode = #tpu.pipeline_mode<synchronous>, transform_indices = @transform_1, window_bounds = array<i64: 9, 16, 8>}, {pipeline_mode = #tpu.pipeline_mode<synchronous>, transform_indices = @transform_2, window_bounds = array<i64: 1, 8>}, {pipeline_mode = #tpu.pipeline_mode<synchronous>, transform_indices = @transform_3, window_bounds = array<i64: 256, 1>}, {pipeline_mode = #tpu.pipeline_mode<synchronous>, transform_indices = @transform_4, window_bounds = array<i64: 256, 1>}, {transform_indices = @transform_5, window_bounds = array<i64: 1, 12, 8, 8>}]} {
    %cst = arith.constant 0.000000e+00 : f32
    %0 = vector.broadcast %cst : f32 to vector<256x8xf32>
    %c0 = arith.constant 0 : index
    %c15 = arith.constant 15 : index
    %c0_0 = arith.constant 0 : index
    %1 = vector.load %arg1[%c0, %c15, %c0_0] : memref<1x320x16xbf16, #tpu.memory_space<vmem>>, vector<1x256x16xbf16>
    %2 = vector.shape_cast %1 : vector<1x256x16xbf16> to vector<256x16xbf16>
    %c0_1 = arith.constant 0 : index
    %c0_2 = arith.constant 0 : index
    %c0_3 = arith.constant 0 : index
    %3 = vector.load %arg2[%c0_1, %c0_2, %c0_3] : memref<9x16x8xbf16, #tpu.memory_space<vmem>>, vector<1x16x8xbf16>
    %4 = vector.shape_cast %3 : vector<1x16x8xbf16> to vector<16x8xbf16>
    %cst_4 = arith.constant dense<0.000000e+00> : vector<256x8xf32>
    %5 = tpu.matmul %2, %4, %cst_4 {dimension_numbers = #tpu.dot_dimension_numbers<[1], [0], [0], [1], [0, 0, 1, 1], [], []>} : vector<256x16xbf16>, vector<16x8xbf16>, vector<256x8xf32> -> vector<256x8xf32>
    %6 = arith.addf %0, %5 : vector<256x8xf32>
    %c0_5 = arith.constant 0 : index
    %c31 = arith.constant 31 : index
    %c0_6 = arith.constant 0 : index
    %7 = vector.load %arg1[%c0_5, %c31, %c0_6] : memref<1x320x16xbf16, #tpu.memory_space<vmem>>, vector<1x256x16xbf16>
    %8 = vector.shape_cast %7 : vector<1x256x16xbf16> to vector<256x16xbf16>
    %c3 = arith.constant 3 : index
    %c0_7 = arith.constant 0 : index
    %c0_8 = arith.constant 0 : index
    %9 = vector.load %arg2[%c3, %c0_7, %c0_8] : memref<9x16x8xbf16, #tpu.memory_space<vmem>>, vector<1x16x8xbf16>
    %10 = vector.shape_cast %9 : vector<1x16x8xbf16> to vector<16x8xbf16>
    %cst_9 = arith.constant dense<0.000000e+00> : vector<256x8xf32>
    %11 = tpu.matmul %8, %10, %cst_9 {dimension_numbers = #tpu.dot_dimension_numbers<[1], [0], [0], [1], [0, 0, 1, 1], [], []>} : vector<256x16xbf16>, vector<16x8xbf16>, vector<256x8xf32> -> vector<256x8xf32>
    %12 = arith.addf %6, %11 : vector<256x8xf32>
    %c0_10 = arith.constant 0 : index
    %c47 = arith.constant 47 : index
    %c0_11 = arith.constant 0 : index
    %13 = vector.load %arg1[%c0_10, %c47, %c0_11] : memref<1x320x16xbf16, #tpu.memory_space<vmem>>, vector<1x256x16xbf16>
    %14 = vector.shape_cast %13 : vector<1x256x16xbf16> to vector<256x16xbf16>
    %c6 = arith.constant 6 : index
    %c0_12 = arith.constant 0 : index
    %c0_13 = arith.constant 0 : index
    %15 = vector.load %arg2[%c6, %c0_12, %c0_13] : memref<9x16x8xbf16, #tpu.memory_space<vmem>>, vector<1x16x8xbf16>
    %16 = vector.shape_cast %15 : vector<1x16x8xbf16> to vector<16x8xbf16>
    %cst_14 = arith.constant dense<0.000000e+00> : vector<256x8xf32>
    %17 = tpu.matmul %14, %16, %cst_14 {dimension_numbers = #tpu.dot_dimension_numbers<[1], [0], [0], [1], [0, 0, 1, 1], [], []>} : vector<256x16xbf16>, vector<16x8xbf16>, vector<256x8xf32> -> vector<256x8xf32>
    %18 = arith.addf %12, %17 : vector<256x8xf32>
    %cst_15 = arith.constant 0.000000e+00 : f32
    %19 = vector.broadcast %cst_15 : f32 to vector<256x8xf32>
    %c0_16 = arith.constant 0 : index
    %c16 = arith.constant 16 : index
    %c0_17 = arith.constant 0 : index
    %20 = vector.load %arg1[%c0_16, %c16, %c0_17] : memref<1x320x16xbf16, #tpu.memory_space<vmem>>, vector<1x256x16xbf16>
    %21 = vector.shape_cast %20 : vector<1x256x16xbf16> to vector<256x16xbf16>
    %c1 = arith.constant 1 : index
    %c0_18 = arith.constant 0 : index
    %c0_19 = arith.constant 0 : index
    %22 = vector.load %arg2[%c1, %c0_18, %c0_19] : memref<9x16x8xbf16, #tpu.memory_space<vmem>>, vector<1x16x8xbf16>
    %23 = vector.shape_cast %22 : vector<1x16x8xbf16> to vector<16x8xbf16>
    %cst_20 = arith.constant dense<0.000000e+00> : vector<256x8xf32>
    %24 = tpu.matmul %21, %23, %cst_20 {dimension_numbers = #tpu.dot_dimension_numbers<[1], [0], [0], [1], [0, 0, 1, 1], [], []>} : vector<256x16xbf16>, vector<16x8xbf16>, vector<256x8xf32> -> vector<256x8xf32>
    %25 = arith.addf %19, %24 : vector<256x8xf32>
    %c0_21 = arith.constant 0 : index
    %c32 = arith.constant 32 : index
    %c0_22 = arith.constant 0 : index
    %26 = vector.load %arg1[%c0_21, %c32, %c0_22] : memref<1x320x16xbf16, #tpu.memory_space<vmem>>, vector<1x256x16xbf16>
    %27 = vector.shape_cast %26 : vector<1x256x16xbf16> to vector<256x16xbf16>
    %c4 = arith.constant 4 : index
    %c0_23 = arith.constant 0 : index
    %c0_24 = arith.constant 0 : index
    %28 = vector.load %arg2[%c4, %c0_23, %c0_24] : memref<9x16x8xbf16, #tpu.memory_space<vmem>>, vector<1x16x8xbf16>
    %29 = vector.shape_cast %28 : vector<1x16x8xbf16> to vector<16x8xbf16>
    %cst_25 = arith.constant dense<0.000000e+00> : vector<256x8xf32>
    %30 = tpu.matmul %27, %29, %cst_25 {dimension_numbers = #tpu.dot_dimension_numbers<[1], [0], [0], [1], [0, 0, 1, 1], [], []>} : vector<256x16xbf16>, vector<16x8xbf16>, vector<256x8xf32> -> vector<256x8xf32>
    %31 = arith.addf %25, %30 : vector<256x8xf32>
    %c0_26 = arith.constant 0 : index
    %c48 = arith.constant 48 : index
    %c0_27 = arith.constant 0 : index
    %32 = vector.load %arg1[%c0_26, %c48, %c0_27] : memref<1x320x16xbf16, #tpu.memory_space<vmem>>, vector<1x256x16xbf16>
    %33 = vector.shape_cast %32 : vector<1x256x16xbf16> to vector<256x16xbf16>
    %c7 = arith.constant 7 : index
    %c0_28 = arith.constant 0 : index
    %c0_29 = arith.constant 0 : index
    %34 = vector.load %arg2[%c7, %c0_28, %c0_29] : memref<9x16x8xbf16, #tpu.memory_space<vmem>>, vector<1x16x8xbf16>
    %35 = vector.shape_cast %34 : vector<1x16x8xbf16> to vector<16x8xbf16>
    %cst_30 = arith.constant dense<0.000000e+00> : vector<256x8xf32>
    %36 = tpu.matmul %33, %35, %cst_30 {dimension_numbers = #tpu.dot_dimension_numbers<[1], [0], [0], [1], [0, 0, 1, 1], [], []>} : vector<256x16xbf16>, vector<16x8xbf16>, vector<256x8xf32> -> vector<256x8xf32>
    %37 = arith.addf %31, %36 : vector<256x8xf32>
    %cst_31 = arith.constant 0.000000e+00 : f32
    %38 = vector.broadcast %cst_31 : f32 to vector<256x8xf32>
    %c0_32 = arith.constant 0 : index
    %c17 = arith.constant 17 : index
    %c0_33 = arith.constant 0 : index
    %39 = vector.load %arg1[%c0_32, %c17, %c0_33] : memref<1x320x16xbf16, #tpu.memory_space<vmem>>, vector<1x256x16xbf16>
    %40 = vector.shape_cast %39 : vector<1x256x16xbf16> to vector<256x16xbf16>
    %c2 = arith.constant 2 : index
    %c0_34 = arith.constant 0 : index
    %c0_35 = arith.constant 0 : index
    %41 = vector.load %arg2[%c2, %c0_34, %c0_35] : memref<9x16x8xbf16, #tpu.memory_space<vmem>>, vector<1x16x8xbf16>
    %42 = vector.shape_cast %41 : vector<1x16x8xbf16> to vector<16x8xbf16>
    %cst_36 = arith.constant dense<0.000000e+00> : vector<256x8xf32>
    %43 = tpu.matmul %40, %42, %cst_36 {dimension_numbers = #tpu.dot_dimension_numbers<[1], [0], [0], [1], [0, 0, 1, 1], [], []>} : vector<256x16xbf16>, vector<16x8xbf16>, vector<256x8xf32> -> vector<256x8xf32>
    %44 = arith.addf %38, %43 : vector<256x8xf32>
    %c0_37 = arith.constant 0 : index
    %c33 = arith.constant 33 : index
    %c0_38 = arith.constant 0 : index
    %45 = vector.load %arg1[%c0_37, %c33, %c0_38] : memref<1x320x16xbf16, #tpu.memory_space<vmem>>, vector<1x256x16xbf16>
    %46 = vector.shape_cast %45 : vector<1x256x16xbf16> to vector<256x16xbf16>
    %c5 = arith.constant 5 : index
    %c0_39 = arith.constant 0 : index
    %c0_40 = arith.constant 0 : index
    %47 = vector.load %arg2[%c5, %c0_39, %c0_40] : memref<9x16x8xbf16, #tpu.memory_space<vmem>>, vector<1x16x8xbf16>
    %48 = vector.shape_cast %47 : vector<1x16x8xbf16> to vector<16x8xbf16>
    %cst_41 = arith.constant dense<0.000000e+00> : vector<256x8xf32>
    %49 = tpu.matmul %46, %48, %cst_41 {dimension_numbers = #tpu.dot_dimension_numbers<[1], [0], [0], [1], [0, 0, 1, 1], [], []>} : vector<256x16xbf16>, vector<16x8xbf16>, vector<256x8xf32> -> vector<256x8xf32>
    %50 = arith.addf %44, %49 : vector<256x8xf32>
    %c0_42 = arith.constant 0 : index
    %c49 = arith.constant 49 : index
    %c0_43 = arith.constant 0 : index
    %51 = vector.load %arg1[%c0_42, %c49, %c0_43] : memref<1x320x16xbf16, #tpu.memory_space<vmem>>, vector<1x256x16xbf16>
    %52 = vector.shape_cast %51 : vector<1x256x16xbf16> to vector<256x16xbf16>
    %c8 = arith.constant 8 : index
    %c0_44 = arith.constant 0 : index
    %c0_45 = arith.constant 0 : index
    %53 = vector.load %arg2[%c8, %c0_44, %c0_45] : memref<9x16x8xbf16, #tpu.memory_space<vmem>>, vector<1x16x8xbf16>
    %54 = vector.shape_cast %53 : vector<1x16x8xbf16> to vector<16x8xbf16>
    %cst_46 = arith.constant dense<0.000000e+00> : vector<256x8xf32>
    %55 = tpu.matmul %52, %54, %cst_46 {dimension_numbers = #tpu.dot_dimension_numbers<[1], [0], [0], [1], [0, 0, 1, 1], [], []>} : vector<256x16xbf16>, vector<16x8xbf16>, vector<256x8xf32> -> vector<256x8xf32>
    %56 = arith.addf %50, %55 : vector<256x8xf32>
    %c0_47 = arith.constant 0 : index
    %c0_48 = arith.constant 0 : index
    %57 = vector.load %arg4[%c0_47, %c0_48] : memref<256x1xf32, #tpu.memory_space<vmem>>, vector<256x1xf32>
    %58 = vector.broadcast %57 : vector<256x1xf32> to vector<256x8xf32>
    %59 = arith.mulf %58, %18 : vector<256x8xf32>
    %60 = arith.addf %37, %59 : vector<256x8xf32>
    %c0_49 = arith.constant 0 : index
    %c0_50 = arith.constant 0 : index
    %61 = vector.load %arg5[%c0_49, %c0_50] : memref<256x1xf32, #tpu.memory_space<vmem>>, vector<256x1xf32>
    %62 = vector.broadcast %61 : vector<256x1xf32> to vector<256x8xf32>
    %63 = arith.mulf %62, %56 : vector<256x8xf32>
    %64 = arith.addf %60, %63 : vector<256x8xf32>
    %c0_51 = arith.constant 0 : index
    %c0_52 = arith.constant 0 : index
    %65 = vector.load %arg3[%c0_51, %c0_52] : memref<1x8xf32, #tpu.memory_space<vmem>>, vector<1x8xf32>
    %66 = vector.broadcast %65 : vector<1x8xf32> to vector<256x8xf32>
    %67 = arith.addf %64, %66 : vector<256x8xf32>
    %cst_53 = arith.constant 1.000000e+00 : f32
    %68 = vector.broadcast %cst_53 : f32 to vector<256x8xf32>
    %69 = arith.cmpf oge, %67, %68 : vector<256x8xf32>
    %70 = arith.extui %69 : vector<256x8xi1> to vector<256x8xi32>
    %71 = arith.sitofp %70 : vector<256x8xi32> to vector<256x8xf32>
    %72 = vector.shape_cast %71 : vector<256x8xf32> to vector<16x16x8xf32>
    %73 = vector.shape_cast %72 : vector<16x16x8xf32> to vector<8x2x16x8xf32>
    %74 = vector.extract_strided_slice %73 {offsets = [0, 0, 0, 0], sizes = [8, 1, 16, 8], strides = [1, 1, 1, 1]} : vector<8x2x16x8xf32> to vector<8x1x16x8xf32>
    %75 = vector.shape_cast %74 : vector<8x1x16x8xf32> to vector<8x16x8xf32>
    %76 = vector.extract_strided_slice %73 {offsets = [0, 1, 0, 0], sizes = [8, 1, 16, 8], strides = [1, 1, 1, 1]} : vector<8x2x16x8xf32> to vector<8x1x16x8xf32>
    %77 = vector.shape_cast %76 : vector<8x1x16x8xf32> to vector<8x16x8xf32>
    %78 = arith.maximumf %75, %77 : vector<8x16x8xf32>
    %79 = vector.shape_cast %78 : vector<8x16x8xf32> to vector<8x8x2x8xf32>
    %80 = vector.extract_strided_slice %79 {offsets = [0, 0, 0, 0], sizes = [8, 8, 1, 8], strides = [1, 1, 1, 1]} : vector<8x8x2x8xf32> to vector<8x8x1x8xf32>
    %81 = vector.shape_cast %80 : vector<8x8x1x8xf32> to vector<8x8x8xf32>
    %82 = vector.extract_strided_slice %79 {offsets = [0, 0, 1, 0], sizes = [8, 8, 1, 8], strides = [1, 1, 1, 1]} : vector<8x8x2x8xf32> to vector<8x8x1x8xf32>
    %83 = vector.shape_cast %82 : vector<8x8x1x8xf32> to vector<8x8x8xf32>
    %84 = arith.maximumf %81, %83 : vector<8x8x8xf32>
    %cst_54 = arith.constant 0.000000e+00 : bf16
    %85 = vector.broadcast %cst_54 : bf16 to vector<2x8x8xbf16>
    %86 = arith.truncf %84 : vector<8x8x8xf32> to vector<8x8x8xbf16>
    %87 = tpu.concatenate %85, %86, %85 in 0 : vector<2x8x8xbf16>, vector<8x8x8xbf16>, vector<2x8x8xbf16> -> vector<12x8x8xbf16>
    %c0_55 = arith.constant 0 : index
    %c0_56 = arith.constant 0 : index
    %c0_57 = arith.constant 0 : index
    %c0_58 = arith.constant 0 : index
    %88 = vector.load %arg6[%c0_55, %c0_56, %c0_57, %c0_58] : memref<1x12x8x8xbf16, #tpu.memory_space<vmem>>, vector<1x12x8x8xbf16>
    %89 = vector.shape_cast %88 : vector<1x12x8x8xbf16> to vector<12x8x8xbf16>
    %90 = vector.shape_cast %87 : vector<12x8x8xbf16> to vector<1x12x8x8xbf16>
    tpu.vector_store %arg6[%c0_55, %c0_56, %c0_57, %c0_58], %90 {strides = array<i32>} : memref<1x12x8x8xbf16, #tpu.memory_space<vmem>>, vector<1x12x8x8xbf16>,
    return
  }
  func.func @transform_0(%arg0: i32) -> (i32, i32, i32) {
    %c0_i32 = arith.constant 0 : i32
    %c0_i32_0 = arith.constant 0 : i32
    %c0_i32_1 = arith.constant 0 : i32
    return %arg0, %c0_i32, %c0_i32_0 : i32, i32, i32
  }
  func.func @transform_1(%arg0: i32) -> (i32, i32, i32) {
    %c0_i32 = arith.constant 0 : i32
    %c0_i32_0 = arith.constant 0 : i32
    %c0_i32_1 = arith.constant 0 : i32
    %c0_i32_2 = arith.constant 0 : i32
    return %c0_i32, %c0_i32_0, %c0_i32_1 : i32, i32, i32
  }
  func.func @transform_2(%arg0: i32) -> (i32, i32) {
    %c0_i32 = arith.constant 0 : i32
    %c0_i32_0 = arith.constant 0 : i32
    %c0_i32_1 = arith.constant 0 : i32
    return %c0_i32, %c0_i32_0 : i32, i32
  }
  func.func @transform_3(%arg0: i32) -> (i32, i32) {
    %c0_i32 = arith.constant 0 : i32
    %c0_i32_0 = arith.constant 0 : i32
    %c0_i32_1 = arith.constant 0 : i32
    return %c0_i32, %c0_i32_0 : i32, i32
  }
  func.func @transform_4(%arg0: i32) -> (i32, i32) {
    %c0_i32 = arith.constant 0 : i32
    %c0_i32_0 = arith.constant 0 : i32
    %c0_i32_1 = arith.constant 0 : i32
    return %c0_i32, %c0_i32_0 : i32, i32
  }
  func.func @transform_5(%arg0: i32) -> (i32, i32, i32, i32) {
    %c0_i32 = arith.constant 0 : i32
    %c0_i32_0 = arith.constant 0 : i32
    %c0_i32_1 = arith.constant 0 : i32
    %c0_i32_2 = arith.constant 0 : i32
    return %arg0, %c0_i32, %c0_i32_0, %c0_i32_1 : i32, i32, i32, i32
  }
}

</mosaic_0001>

<bundles_post_ra>
// kernel: tpu_custom_call.1
= control target key start
LH: loop header
LB: loop body
LE: loop exit
PB: predicated region body
PF: predicated region fallthrough
CT: control target
= control target key end

     0   :  { %s6168_s18 = smov 0   ;;  %s7693_s0 = inlined_call_operand.vmem [shape: bf16[2,320,16], index: 0, kind: input, shape index: {}]   ;;  %s7694_s1 = inlined_call_operand.vmem [shape: bf16[9,16,8], index: 1, kind: input, shape index: {}]   ;;  %s7695_s2 = inlined_call_operand.vmem [shape: f32[1,8], index: 2, kind: input, shape index: {}]   ;;  %s7696_s3 = inlined_call_operand.vmem [shape: f32[256,1], index: 3, kind: input, shape index: {}]   ;;  %s7697_s4 = inlined_call_operand.vmem [shape: f32[256,1], index: 4, kind: input, shape index: {}]   ;;  %s7698_s5 = inlined_call_operand.vmem [shape: bf16[2,12,8,8], index: 5, kind: output, shape index: {}]  }
   0x1 LB: > { %s4954_s19 = sadd.s32 4294967295, %s6133_s18   ;;  %p4958_p0 = scmp.ge.s32.totalorder %s6133_s18, 1  ;;  %s6133_s18 = sphi %s6168_s18, %s15_s18  }
   0x2   : > { %p187_p1 = scmp.lt.s32.totalorder %s6133_s18, 3 }
   0x4   : > { %p188_p2 = pnand %p4958_p0, %p187_p1 }
   0x6   : > { %191 = sbr.rel (%p188_p2) target bundleno = 654 (0x28e), region = 40 }
   0xd   : > { %v6003_v0 = vld [vmem:[%s7694_s1 + $0x18] sm:$0xff]   ;;  %p215_p3 = scmp.lt.s32.totalorder %s4954_s19, 1  ;;  %v6182_v1 = vld [vmem:[%s7694_s1] sm:$0xff]   ;;  %v6189_v2 = vld [vmem:[%s7694_s1 + $0x30] sm:$0xff]   ;;  %vm350_vm0 = vsmask.f32 4352 }
   0xe   : > { %5488 = vmatprep.subr.bf16.mxu1 %v6003_v0  ;;  %5522 = vmatprep.subr.bf16.mxu0 %v6182_v1  ;;  %vm509_vm1 = vcmask 130048   ;;  %vm4886_vm2 = vcmask 60416   ;;  %vm2248_vm3 = vsmask.f32 7424  ;;  %vm4752_vm8 = vcmask 1041409  }
   0xf   : > { %s7767_s19 = smov (!%p215_p3, %s4954_s19), 1  ;;  %5489 = vmatpush3.bf16.msra.mxu1 %v6003_v0  ;;  %5523 = vmatpush3.bf16.msra.mxu0 %v6182_v1  ;;  %vm4755_vm10 = vcmask 1042434   ;;  %vm4758_vm11 = vcmask 1043459   ;;  %vm4761_vm12 = vcmask 1044484   ;;  %vm4764_vm13 = vcmask 1045509  }
  0x10   : > { %s5988_s26 = smul.u32 160, %s7767_s19  ;;  %5794 = vmatprep.subr.bf16.mxu1 %v6182_v1  ;;  %5556 = vmatprep.subr.bf16.mxu0 %v6189_v2  ;;  %vm4767_vm14 = vcmask 1046534   ;;  %vm4770_vm15 = vcmask 1047559  }
  0x11   : > { %s5989_s11 = smul.u32 48, %s7767_s19 }
  0x12   : > { %s6199_s29 = scalar_lea.vmem %s7693_s0, %s5988_s26 }
  0x13   : > { %v229_v3 = vld [vmem:[%s6199_s29 + $0x10] sm:$0xf]  ;;  %v230_v4 = vld [vmem:[%s6199_s29 + $0x14] sm:$0xf]  ;;  %v231_v5 = vld [vmem:[%s6199_s29 + $0x18] sm:$0xf]  ;;  %s6491_s19 = scalar_lea.vmem %s7698_s5, %s5989_s11 }
  0x14   : > { %v232_v6 = vld [vmem:[%s6199_s29 + $0x1c] sm:$0xf]  ;;  %v261_v7 = vld [vmem:[%s6199_s29 + $0xc] sm:$0x8]  ;;  %v4964_v8 = vcombine.low %v230_v4, %v231_v5  ;;  %v226_v9 = vld [vmem:[%s6199_s29 + $0x4] sm:$0x8]  ;;  %v6207_v10 = vcombine.low %v229_v3, %v230_v4 }
  0x15   : > { %v4963_v11 = vcombine.low %v261_v7, %v229_v3  ;;  %v6209_v12 = vcombine.low %v231_v5, %v232_v6  ;;  %v227_v13 = vld [vmem:[%s6199_s29 + $0x8] sm:$0xf]  ;;  %v228_v14 = vld [vmem:[%s6199_s29 + $0xc] sm:$0xf]  ;;  %v6214_v15 = vld [vmem:[%s6199_s29 + $0x20] sm:$0xf] }
  0x16   : > { %7706 = vst [vmem:[#allocation2_spill] sm:$0xff] %v6207_v10  ;;  %v360_v16 = vshrl.u32 %v4964_v8, 16  ;;  %v363_v17 = vshll.u32 %v4964_v8, 16  ;;  %v4997_v18 = vcombine.low %v226_v9, %v227_v13  ;;  %v4998_v19 = vcombine.low %v228_v14, %v229_v3  ;;  %v6217_v20 = vld [vmem:[%s6199_s29 + $0x24] sm:$0xf]  ;;  %v6260_v9 = vld [vmem:[%s7694_s1 + $0x28] sm:$0xff]  }
  0x17   : > { %7707 = vst [vmem:[#allocation3_spill] sm:$0xff] %v6209_v12  ;;  %v235_v21 = vld [vmem:[%s6199_s29 + $0x28] sm:$0xf]  ;;  %v352_v22 = vshrl.u32 %v4963_v11, 16  ;;  %v355_v23 = vshll.u32 %v4963_v11, 16  ;;  %v4965_v24 = vcombine.low %v232_v6, %v6214_v15 }
  0x18   : > { %v4966_v25 = vcombine.low %v6217_v20, %v235_v21  ;;  %v362_v26 = vrot.slane %v360_v16, 3  ;;  %v365_v27 = vrot.slane %v363_v17, 4  ;;  %v729_v28 = vshrl.u32 %v4997_v18, 16  ;;  %v236_v30 = vld [vmem:[%s6199_s29 + $0x2c] sm:$0xf] }
  0x19   : > { %v732_v29 = vshll.u32 %v4997_v18, 16  ;;  %v6224_v31 = vld [vmem:[%s6199_s29 + $0x30] sm:$0xf]  ;;  %v354_v32 = vrot.slane %v352_v22, 3  ;;  %v357_v33 = vrot.slane %v355_v23, 4  ;;  %v737_v34 = vshrl.u32 %v4998_v19, 16 }
  0x1a   : > { %v740_v35 = vshll.u32 %v4998_v19, 16  ;;  %v6227_v36 = vld [vmem:[%s6199_s29 + $0x34] sm:$0xf]  ;;  %v6230_v37 = vld [vmem:[%s6199_s29 + $0x38] sm:$0xf]  ;;  %v366_v38 = vor.u32 %v365_v27, %v362_v26  ;;  %v731_v39 = vrot.slane %v729_v28, 3  ;;  %v4967_v55 = vcombine.low %v236_v30, %v6224_v31 }
  0x1b   : > { %v734_v40 = vrot.slane %v732_v29, 4  ;;  %v369_v41 = vshrl.u32 %v4965_v24, 16  ;;  %v6233_v42 = vld [vmem:[%s6199_s29 + $0x3c] sm:$0xf]  ;;  %v358_v43 = vor.u32 %v357_v33, %v354_v32  ;;  %v739_v44 = vrot.slane %v737_v34, 3  ;;  %v6270_v18 = vld [vmem:[%s7694_s1 + $0x20] sm:$0xff]  }
  0x1c   : > { %v742_v45 = vrot.slane %v740_v35, 4  ;;  %v372_v46 = vshll.u32 %v4965_v24, 16  ;;  %v6236_v47 = vld [vmem:[%s6199_s29 + $0x40] sm:$0xf]  ;;  %v378_v50 = vshrl.u32 %v4966_v25, 16  ;;  %v381_v51 = vshll.u32 %v4966_v25, 16 }
  0x1d   : > { %v735_v48 = vor.u32 %v734_v40, %v731_v39  ;;  %v371_v49 = vrot.slane %v369_v41, 3  ;;  %v367_v52 = vsel %vm350_vm0, %v358_v43, %v366_v38  ;;  %v4968_v58 = vcombine.low %v6227_v36, %v6230_v37  ;;  %v6248_v0 = vld [vmem:[%s6199_s29 + $0x44] sm:$0xf]  ;;  %v6251_v3 = vld [vmem:[%s6199_s29 + $0x48] sm:$0xf] }
  0x1e   : > { %v743_v53 = vor.u32 %v742_v45, %v739_v44  ;;  %v374_v54 = vrot.slane %v372_v46, 4  ;;  %5490 = vmatprep.mubr.msk.bf16.mxu1 %vm509_vm1, %v367_v52  ;;  %v380_v56 = vrot.slane %v378_v50, 3  ;;  %v383_v57 = vrot.slane %v381_v51, 4  ;;  %v6255_v8 = vld [vmem:[%s6199_s29 + $0x4c] sm:$0xf] }
  0x1f   : > { %v4969_v59 = vcombine.low %v6233_v42, %v6236_v47  ;;  %v387_v63 = vshrl.u32 %v4967_v55, 16  ;;  %v390_v5 = vshll.u32 %v4967_v55, 16  ;;  %v396_v6 = vshrl.u32 %v4968_v58, 16  ;;  %v6265_v17 = vld [vmem:[%s6199_s29 + $0x50] sm:$0xf] }
  0x20   : > { %v744_v60 = vsel %vm350_vm0, %v735_v48, %v743_v53  ;;  %v375_v61 = vor.u32 %v374_v54, %v371_v49  ;;  %v745_v62 = vsel %vm350_vm0, %v743_v53, %v366_v38  ;;  %v384_v4 = vor.u32 %v383_v57, %v380_v56  ;;  %v6276_v24 = vld [vmem:[%s6199_s29 + $0x54] sm:$0xf]  ;;  %v6283_v26 = vld [vmem:[%s6199_s29 + $0x58] sm:$0xf]  ;;  %v933_v32 = vld [vmem:[%s6199_s29 + $0x1c] sm:$0xf] }
  0x21   : > { %5524 = vmatprep.mubr.msk.bf16.mxu0 %vm509_vm1, %v744_v60  ;;  %v399_v7 = vshll.u32 %v4968_v58, 16  ;;  %v389_v13 = vrot.slane %v387_v63, 3  ;;  %v405_v14 = vshrl.u32 %v4969_v59, 16  ;;  %v408_v16 = vshll.u32 %v4969_v59, 16  ;;  %v931_v27 = vld [vmem:[%s6199_s29 + $0x14] sm:$0x8] }
  0x22   : > { %v376_v11 = vsel %vm350_vm0, %v366_v38, %v375_v61  ;;  %5525 = vmatmul.mubr.msk.bf16.vlgmr.msra.gmra.mrb[0].mxu0 %vm509_vm1, %v745_v62  ;;  %v385_v19 = vsel %vm350_vm0, %v375_v61, %v384_v4  ;;  %v392_v21 = vrot.slane %v390_v5, 4  ;;  %v398_v22 = vrot.slane %v396_v6, 3  ;;  %v6292_v38 = vld [vmem:[%s6199_s29 + $0x20] sm:$0xf]  ;;  %v6303_v51 = vld [vmem:[%s6199_s29 + $0x24] sm:$0xf] }
  0x23   : > { %5491 = vmatmul.mubr.msk.bf16.vlgmr.msra.gmra.mrb[0].mxu1 %vm509_vm1, %v376_v11  ;;  %5557 = vmatpush3.bf16.msra.mxu0 %v6189_v2  ;;  %v401_v23 = vrot.slane %v399_v7, 4  ;;  %v4970_v25 = vcombine.low %v6248_v0, %v6251_v3  ;;  %v932_v2 = vld [vmem:[%s6199_s29 + $0x18] sm:$0xf]  ;;  %v407_v30 = vrot.slane %v405_v14, 3  ;;  %v410_v33 = vrot.slane %v408_v16, 4  ;;  %7708 = vst [vmem:[#allocation4_spill] sm:$0xff] %v6292_v38 }
  0x24   : > { %5795 = vmatpush3.bf16.msra.mxu1 %v6182_v1  ;;  %5494 = vmatprep.mubr.msk.bf16.mxu1 %vm509_vm1, %v385_v19  ;;  %v393_v28 = vor.u32 %v392_v21, %v389_v13  ;;  %v4971_v1 = vcombine.low %v6255_v8, %v6265_v17  ;;  %v4972_v39 = vcombine.low %v6276_v24, %v6283_v26  ;;  %v936_v52 = vld [vmem:[%s6199_s29 + $0x28] sm:$0xf]  ;;  %v6309_v56 = vld [vmem:[%s6199_s29 + $0x5c] sm:$0xf]  ;;  %v6315_v61 = vld [vmem:[%s6199_s29 + $0x60] sm:$0xf] }
  0x25   : > { %5528 = vmatprep.mubr.msk.bf16.mxu0 %vm509_vm1, %v376_v11  ;;  %v402_v29 = vor.u32 %v401_v23, %v398_v22  ;;  %v414_v34 = vshrl.u32 %v4970_v25, 16  ;;  %v417_v35 = vshll.u32 %v4970_v25, 16  ;;  %5692 = vmatprep.subr.bf16.mxu0 %v6260_v9  ;;  %v5019_v40 = vcombine.low %v931_v27, %v932_v2  ;;  %7709 = vst [vmem:[#allocation5_spill] sm:$0xff] %v6303_v51  ;;  %v6318_v63 = vld [vmem:[%s6199_s29 + $0x64] sm:$0xf] }
  0x26   : > { %5590 = vmatprep.subr.bf16.mxu1 %v6270_v18  ;;  %v394_v41 = vsel %vm350_vm0, %v384_v4, %v393_v28  ;;  %v5020_v46 = vcombine.low %v933_v32, %v6292_v38  ;;  %v411_v48 = vor.u32 %v410_v33, %v407_v30  ;;  %v423_v49 = vshrl.u32 %v4971_v1, 16  ;;  %v6321_v4 = vld [vmem:[%s6199_s29 + $0x68] sm:$0xf]  ;;  %v937_v13 = vld [vmem:[%s6199_s29 + $0x2c] sm:$0xf] }
  0x27   : > { %v403_v43 = vsel %vm350_vm0, %v393_v28, %v402_v29  ;;  %v416_v44 = vrot.slane %v414_v34, 3  ;;  %v419_v45 = vrot.slane %v417_v35, 4  ;;  %v426_v50 = vshll.u32 %v4971_v1, 16  ;;  %v938_v14 = vld [vmem:[%s6199_s29 + $0x30] sm:$0xf] }
  0x28   : > { %v432_v53 = vshrl.u32 %v4972_v39, 16  ;;  %v435_v54 = vshll.u32 %v4972_v39, 16  ;;  %v1051_v55 = vshrl.u32 %v5019_v40, 16  ;;  %v1054_v57 = vshll.u32 %v5019_v40, 16  ;;  %v6336_v39 = vld [vmem:[%s6199_s29 + $0x6c] sm:$0xf] }
  0x29   : > { %v1059_v58 = vshrl.u32 %v5020_v46, 16  ;;  %v1062_v59 = vshll.u32 %v5020_v46, 16  ;;  %v420_v62 = vor.u32 %v419_v45, %v416_v44  ;;  %v412_v5 = vsel %vm350_vm0, %v402_v29, %v411_v48  ;;  %v6339_v40 = vld [vmem:[%s6199_s29 + $0x70] sm:$0xf]  ;;  %v939_v46 = vld [vmem:[%s6199_s29 + $0x34] sm:$0xf] }
  0x2a   : > { %5529 = vmatmul.mubr.msk.bf16.gmra.mrb[4].mxu0 %vm509_vm1, %v385_v19  ;;  %v425_v6 = vrot.slane %v423_v49, 3  ;;  %v428_v7 = vrot.slane %v426_v50, 4  ;;  %v5021_v11 = vcombine.low %v6303_v51, %v936_v52  ;;  %v434_v16 = vrot.slane %v432_v53, 3  ;;  %v6345_v52 = vld [vmem:[%s6199_s29 + $0x74] sm:$0xf] }
  0x2b   : > { %5495 = vmatmul.mubr.msk.bf16.gmra.mrb[4].mxu1 %vm509_vm1, %v394_v41  ;;  %5532 = vmatprep.mubr.msk.bf16.mxu0 %vm509_vm1, %v394_v41  ;;  %v437_v19 = vrot.slane %v435_v54, 4  ;;  %v1053_v21 = vrot.slane %v1051_v55, 3  ;;  %v4973_v22 = vcombine.low %v6309_v56, %v6315_v61  ;;  %v1056_v23 = vrot.slane %v1054_v57, 4  ;;  %v6348_v53 = vld [vmem:[%s6199_s29 + $0x78] sm:$0xf] }
  0x2c   : > { %5498 = vmatprep.mubr.msk.bf16.mxu1 %vm509_vm1, %v403_v43  ;;  %v1061_v25 = vrot.slane %v1059_v58, 3  ;;  %v1064_v27 = vrot.slane %v1062_v59, 4  ;;  %v4974_v2 = vcombine.low %v6318_v63, %v6321_v4  ;;  %v421_v28 = vsel %vm350_vm0, %v411_v48, %v420_v62  ;;  %v940_v48 = vld [vmem:[%s6199_s29 + $0x38] sm:$0xf]  ;;  %v941_v58 = vld [vmem:[%s6199_s29 + $0x3c] sm:$0xf] }
  0x2d   : > { %v5022_v29 = vcombine.low %v937_v13, %v938_v14  ;;  %v1068_v30 = vshrl.u32 %v5021_v11, 16  ;;  %v1071_v32 = vshll.u32 %v5021_v11, 16  ;;  %v429_v33 = vor.u32 %v428_v7, %v425_v6  ;;  %v942_v59 = vld [vmem:[%s6199_s29 + $0x40] sm:$0xf]  ;;  %v947_v60 = vld [vmem:[%s6199_s29 + $0x54] sm:$0xf] }
  0x2e   : > { %v438_v34 = vor.u32 %v437_v19, %v434_v16  ;;  %v441_v35 = vshrl.u32 %v4973_v22, 16  ;;  %v444_v1 = vshll.u32 %v4973_v22, 16  ;;  %v1057_v41 = vor.u32 %v1056_v23, %v1053_v21  ;;  %v952_v10 = vld [vmem:[%s6199_s29 + $0x68] sm:$0xf] }
  0x2f   : > { %v450_v44 = vshrl.u32 %v4974_v2, 16  ;;  %v453_v45 = vshll.u32 %v4974_v2, 16  ;;  %v1077_v49 = vshrl.u32 %v5022_v29, 16  ;;  %v1080_v50 = vshll.u32 %v5022_v29, 16  ;;  %v6365_v29 = vld [vmem:[%s6199_s29 + $0x7c] sm:$0xf] }
  0x30   : > { %v1070_v54 = vrot.slane %v1068_v30, 3  ;;  %v1073_v55 = vrot.slane %v1071_v32, 4  ;;  %v4975_v57 = vcombine.low %v6336_v39, %v6339_v40  ;;  %v443_v6 = vrot.slane %v441_v35, 3  ;;  %v943_v35 = vld [vmem:[%s6199_s29 + $0x44] sm:$0xf] }
  0x31   : > { %v446_v7 = vrot.slane %v444_v1, 4  ;;  %v5023_v11 = vcombine.low %v939_v46, %v940_v48  ;;  %v6358_v13 = vsel %vm350_vm0, %v429_v33, %v438_v34  ;;  %v452_v16 = vrot.slane %v450_v44, 3  ;;  %v944_v1 = vld [vmem:[%s6199_s29 + $0x48] sm:$0xf]  ;;  %v6378_v46 = vld [vmem:[%s6199_s29 + $0x84] sm:$0xf] }
  0x32   : > { %5533 = vmatmul.mubr.msk.bf16.gmra.mrb[8].mxu0 %vm509_vm1, %v403_v43  ;;  %v1065_v43 = vor.u32 %v1064_v27, %v1061_v25  ;;  %v455_v19 = vrot.slane %v453_v45, 4  ;;  %v1079_v21 = vrot.slane %v1077_v49, 3  ;;  %v1082_v22 = vrot.slane %v1080_v50, 4  ;;  %v6375_v45 = vld [vmem:[%s6199_s29 + $0x80] sm:$0xf] }
  0x33   : > { %5499 = vmatmul.mubr.msk.bf16.gmra.mrb[8].mxu1 %vm509_vm1, %v412_v5  ;;  %5536 = vmatprep.mubr.msk.bf16.mxu0 %vm509_vm1, %v412_v5  ;;  %v6355_v5 = vsel %vm350_vm0, %v420_v62, %v429_v33  ;;  %v4976_v23 = vcombine.low %v6345_v52, %v6348_v53  ;;  %v5024_v62 = vcombine.low %v941_v58, %v942_v59  ;;  %v459_v27 = vshrl.u32 %v4975_v57, 16 }
  0x34   : > { %5502 = vmatprep.mubr.msk.bf16.mxu1 %vm509_vm1, %v421_v28  ;;  %v1066_v14 = vsel %vm350_vm0, %v1057_v41, %v1065_v43  ;;  %v1074_v25 = vor.u32 %v1073_v55, %v1070_v54  ;;  %v462_v2 = vshll.u32 %v4975_v57, 16  ;;  %v447_v30 = vor.u32 %v446_v7, %v443_v6  ;;  %v945_v54 = vld [vmem:[%s6199_s29 + $0x4c] sm:$0xf]  ;;  %v946_v55 = vld [vmem:[%s6199_s29 + $0x50] sm:$0xf] }
  0x35   : > { %v1086_v32 = vshrl.u32 %v5023_v11, 16  ;;  %v1089_v33 = vshll.u32 %v5023_v11, 16  ;;  %v1095_v41 = vshrl.u32 %v5024_v62, 16  ;;  %v1098_v44 = vshll.u32 %v5024_v62, 16  ;;  %v6384_v7 = vld [vmem:[%s6199_s29 + $0x88] sm:$0xf] }
  0x36   : > { %v1083_v48 = vor.u32 %v1082_v22, %v1079_v21  ;;  %v468_v49 = vshrl.u32 %v4976_v23, 16  ;;  %v471_v50 = vshll.u32 %v4976_v23, 16  ;;  %v1075_v57 = vsel %vm350_vm0, %v1065_v43, %v1074_v25  ;;  %v6394_v43 = vld [vmem:[%s7694_s1 + $0x10] sm:$0xff]  }
  0x37   : > { %v461_v58 = vrot.slane %v459_v27, 3  ;;  %v464_v59 = vrot.slane %v462_v2, 4  ;;  %v5025_v6 = vcombine.low %v943_v35, %v944_v1  ;;  %v6387_v11 = vsel %vm350_vm0, %v438_v34, %v447_v30  ;;  %7710 = vst [vmem:[#allocation6_spill] sm:$0xff] %v6394_v43 }
  0x38   : > { %v1097_v22 = vrot.slane %v1095_v41, 3  ;;  %v1100_v23 = vrot.slane %v1098_v44, 4  ;;  %v5026_v62 = vcombine.low %v945_v54, %v946_v55  ;;  %v1084_v34 = vsel %vm350_vm0, %v1074_v25, %v1083_v48  ;;  %v948_v41 = vld [vmem:[%s6199_s29 + $0x58] sm:$0xf] }
  0x39   : > { %v470_v27 = vrot.slane %v468_v49, 3  ;;  %v473_v2 = vrot.slane %v471_v50, 4  ;;  %v465_v35 = vor.u32 %v464_v59, %v461_v58  ;;  %v1104_v1 = vshrl.u32 %v5025_v6, 16  ;;  %v949_v50 = vld [vmem:[%s6199_s29 + $0x5c] sm:$0xf] }
  0x3a   : > { %5537 = vmatmul.mubr.msk.bf16.gmra.mrb[12].mxu0 %vm509_vm1, %v421_v28  ;;  %v456_v28 = vor.u32 %v455_v19, %v452_v16  ;;  %v1091_v16 = vrot.slane %v1089_v33, 4  ;;  %v4977_v19 = vcombine.low %v6365_v29, %v6375_v45  ;;  %v6403_v33 = vld [vmem:[%s6199_s29 + $0x8c] sm:$0xf]  ;;  %v1101_v54 = vor.u32 %v1100_v23, %v1097_v22  ;;  %v950_v58 = vld [vmem:[%s6199_s29 + $0x60] sm:$0xf] }
  0x3b   : > { %5503 = vmatmul.mubr.msk.bf16.gmra.mrb[12].mxu1 %vm509_vm1, %v6355_v5  ;;  %5558 = vmatprep.mubr.msk.bf16.mxu0 %vm509_vm1, %v1066_v14  ;;  %v1088_v14 = vrot.slane %v1086_v32, 3  ;;  %v4978_v32 = vcombine.low %v6378_v46, %v6384_v7  ;;  %v1113_v55 = vshrl.u32 %v5026_v62, 16  ;;  %v474_v59 = vor.u32 %v473_v2, %v470_v27 }
  0x3c   : > { %5506 = vmatprep.mubr.msk.bf16.mxu1 %vm509_vm1, %v6358_v13  ;;  %v6397_v21 = vsel %vm350_vm0, %v447_v30, %v456_v28  ;;  %v1107_v30 = vshll.u32 %v5025_v6, 16  ;;  %v477_v44 = vshrl.u32 %v4977_v19, 16  ;;  %v480_v49 = vshll.u32 %v4977_v19, 16 }
  0x3d   : > { %v1092_v25 = vor.u32 %v1091_v16, %v1088_v14  ;;  %v486_v6 = vshrl.u32 %v4978_v32, 16  ;;  %v489_v51 = vshll.u32 %v4978_v32, 16  ;;  %v1106_v14 = vrot.slane %v1104_v1, 3 }
  0x3e   : > { %v1109_v16 = vrot.slane %v1107_v30, 4  ;;  %v4979_v19 = vcombine.low %v6403_v33, %v6403_v33  ;;  %v479_v22 = vrot.slane %v477_v44, 3  ;;  %v482_v23 = vrot.slane %v480_v49, 4  ;;  %v951_v44 = vld [vmem:[%s6199_s29 + $0x64] sm:$0xf] }
  0x3f   : > { %v1102_v27 = vsel %vm350_vm0, %v1092_v25, %v1101_v54  ;;  %v1115_v2 = vrot.slane %v1113_v55, 3  ;;  %v5028_v38 = vcombine.low %v949_v50, %v950_v58  ;;  %v488_v1 = vrot.slane %v486_v6, 3  ;;  %v953_v49 = vld [vmem:[%s6199_s29 + $0x6c] sm:$0xf]  ;;  %v954_v55 = vld [vmem:[%s6199_s29 + $0x70] sm:$0xf] }
  0x40   : > { %v491_v30 = vrot.slane %v489_v51, 4  ;;  %v498_v12 = vshll.u32 %v4979_v19, 16  ;;  %v6436_v51 = vor.u32 %v482_v23, %v479_v22 }
  0x41   : > { %v1134_v50 = vshll.u32 %v5028_v38, 16 }
  0x42   : > { %5559 = vmatmul.mubr.msk.bf16.vlgmr.msra.gmra.mrb[0].mxu0 %vm509_vm1, %v1075_v57  ;;  %v1116_v57 = vshll.u32 %v5026_v62, 16  ;;  %v5027_v62 = vcombine.low %v947_v60, %v948_v41 }
  0x43   : > { %5507 = vmatmul.mubr.msk.bf16.gmra.mrb[16].mxu1 %vm509_vm1, %v6387_v11  ;;  %5693 = vmatpush3.bf16.msra.mxu0 %v6260_v9  ;;  %v6418_v9 = vsel %vm350_vm0, %v456_v28, %v465_v35  ;;  %v6425_v28 = vsel %vm350_vm0, %v465_v35, %v474_v59 }
  0x44   : > { %5510 = vmatprep.mubr.msk.bf16.mxu1 %vm509_vm1, %v6397_v21  ;;  %5562 = vmatprep.mubr.msk.bf16.mxu0 %vm509_vm1, %v1084_v34  ;;  %v1093_v34 = vsel %vm350_vm0, %v1083_v48, %v1092_v25  ;;  %v1118_v32 = vrot.slane %v1116_v57, 4  ;;  %v495_v48 = vshrl.u32 %v4979_v19, 16  ;;  %v1122_v60 = vshrl.u32 %v5027_v62, 16 }
  0x45   : > { %5726 = vmatprep.subr.bf16.mxu0 %v6394_v43  ;;  %v1110_v43 = vor.u32 %v1109_v16, %v1106_v14  ;;  %v1125_v41 = vshll.u32 %v5027_v62, 16  ;;  %v1131_v25 = vshrl.u32 %v5028_v38, 16  ;;  %v492_v57 = vor.u32 %v491_v30, %v488_v1 }
  0x46   : > { %v1119_v35 = vor.u32 %v1118_v32, %v1115_v2  ;;  %v497_v6 = vrot.slane %v495_v48, 3  ;;  %v500_v14 = vrot.slane %v498_v12, 4  ;;  %v1124_v16 = vrot.slane %v1122_v60, 3  ;;  %v956_v32 = vld [vmem:[%s6199_s29 + $0x78] sm:$0xf] }
  0x47   : > { %v1111_v58 = vsel %vm350_vm0, %v1101_v54, %v1110_v43  ;;  %v1127_v19 = vrot.slane %v1125_v41, 4  ;;  %v5030_v62 = vcombine.low %v953_v49, %v954_v55  ;;  %v1133_v23 = vrot.slane %v1131_v25, 3  ;;  %v955_v54 = vld [vmem:[%s6199_s29 + $0x74] sm:$0xf]  ;;  %v958_v49 = vld [vmem:[%s6199_s29 + $0x80] sm:$0xf] }
  0x48   : > { %v1120_v22 = vsel %vm350_vm0, %v1110_v43, %v1119_v35  ;;  %v1136_v38 = vrot.slane %v1134_v50, 4  ;;  %v493_v2 = vsel %vm350_vm0, %v6436_v51, %v492_v57  ;;  %v501_v12 = vor.u32 %v500_v14, %v497_v6 }
  0x49   : > { %v1149_v1 = vshrl.u32 %v5030_v62, 16  ;;  %v1152_v48 = vshll.u32 %v5030_v62, 16  ;;  %v5031_v41 = vcombine.low %v955_v54, %v956_v32  ;;  %v959_v62 = vld [vmem:[%s6199_s29 + $0x84] sm:$0xf]  ;;  %v962_v54 = vld [vmem:[%s6199_s29 + $0x90] sm:$0xf]  ;;  %v6482_v32 = vcombine.low %v6230_v37, %v6233_v42 }
  0x4a   : > { %5563 = vmatmul.mubr.msk.bf16.gmra.mrb[4].mxu0 %vm509_vm1, %v1093_v34  ;;  %v5029_v34 = vcombine.low %v951_v44, %v952_v10  ;;  %v1128_v10 = vor.u32 %v1127_v19, %v1124_v16  ;;  %v1137_v30 = vor.u32 %v1136_v38, %v1133_v23  ;;  %v957_v44 = vld [vmem:[%s6199_s29 + $0x7c] sm:$0xf]  ;;  %v502_v60 = vsel %vm350_vm0, %v492_v57, %v501_v12  ;;  %v961_v12 = vld [vmem:[%s6199_s29 + $0x8c] sm:$0xf] }
  0x4b   : > { %5511 = vmatmul.mubr.msk.bf16.gmra.mrb[20].mxu1 %vm509_vm1, %v6418_v9  ;;  %5566 = vmatprep.mubr.msk.bf16.mxu0 %vm509_vm1, %v1102_v27  ;;  %v6442_v27 = vsel %vm350_vm0, %v474_v59, %v6436_v51  ;;  %v1154_v14 = vrot.slane %v1152_v48, 4  ;;  %v5032_v16 = vcombine.low %v957_v44, %v958_v49  ;;  %v6461_v19 = vcombine.low %v6214_v15, %v6217_v20  ;;  %v3289_v49 = vld [vmem:[%s7696_s3 + $0x8] sm:$0xff] }
  0x4c   : > { %5514 = vmatprep.mubr.msk.bf16.mxu1 %vm509_vm1, %v6425_v28  ;;  %v1140_v59 = vshrl.u32 %v5029_v34, 16  ;;  %v1143_v43 = vshll.u32 %v5029_v34, 16  ;;  %v1129_v25 = vsel %vm350_vm0, %v1119_v35, %v1128_v10  ;;  %v1138_v6 = vsel %vm350_vm0, %v1128_v10, %v1137_v30 }
  0x4d   : > { %v1158_v57 = vshrl.u32 %v5031_v41, 16  ;;  %v1161_v34 = vshll.u32 %v5031_v41, 16  ;;  %v1167_v15 = vshrl.u32 %v5032_v16, 16  ;;  %v1170_v20 = vshll.u32 %v5032_v16, 16 }
  0x4e   : > { %v1142_v50 = vrot.slane %v1140_v59, 3  ;;  %v1145_v55 = vrot.slane %v1143_v43, 4  ;;  %v6473_v38 = vcombine.low %v6224_v31, %v6227_v36  ;;  %v6135_v36 = vmov 0  }
  0x4f   : > { %v1160_v10 = vrot.slane %v1158_v57, 3  ;;  %v1163_v31 = vrot.slane %v1161_v34, 4  ;;  %6001 = vset.pattern.permute.xlu0 %v6135_v36  ;;  %6002 = vset.pattern.permute.xlu1 %v6135_v36  ;;  %v6495_v37 = vcombine.low %v6236_v47, %v6248_v0  ;;  %v5034_v48 = vcombine.low %v961_v12, %v962_v54  ;;  %4887 = vst.msk [vmem:[%s6491_s19] sm:$0xf] %vm4886_vm2, %v6135_v36  ;;  %v6509_v47 = vld [vmem:[%s7694_s1 + $0x8] sm:$0xff]  }
  0x50   : > { %v1146_v35 = vor.u32 %v1145_v55, %v1142_v50  ;;  %4888 = vst.msk [vmem:[%s6491_s19 + $0x4] sm:$0xf] %vm4886_vm2, %v6135_v36  ;;  %4897 = vst.msk [vmem:[%s6491_s19 + $0x28] sm:$0xf] %vm4886_vm2, %v6135_v36  ;;  %v6513_v0 = vcombine.low %v6251_v3, %v6255_v8  ;;  %v6517_v44 = vcombine.low %v6265_v17, %v6276_v24  ;;  %v963_v8 = vld [vmem:[%s6199_s29 + $0x94] sm:$0xf] }
  0x51   : > { %4898 = vst.msk [vmem:[%s6491_s19 + $0x2c] sm:$0xf] %vm4886_vm2, %v6135_v36  ;;  %v3291_v17 = vld [vmem:[%s7696_s3 + $0x18] sm:$0xff]  ;;  %v6532_v24 = vcombine.low %v6283_v26, %v6309_v56  ;;  %v1188_v50 = vshll.u32 %v5034_v48, 16  ;;  %v6539_v55 = vcombine.low %v6315_v61, %v6318_v63  ;;  %v5035_v26 = vcombine.low %v963_v8, %v963_v8  ;;  %v3293_v56 = vld [vmem:[%s7696_s3 + $0x28] sm:$0xff] }
  0x52   : > { %5567 = vmatmul.mubr.msk.bf16.gmra.mrb[8].mxu0 %vm509_vm1, %v1111_v58  ;;  %v1151_v58 = vrot.slane %v1149_v1, 3  ;;  %v1147_v43 = vsel %vm350_vm0, %v1137_v30, %v1146_v35  ;;  %v1169_v1 = vrot.slane %v1167_v15, 3  ;;  %v1172_v30 = vrot.slane %v1170_v20, 4 }
  0x53   : > { %5515 = vmatmul.mubr.msk.bf16.gmra.mrb[24].mxu1 %vm509_vm1, %v6442_v27  ;;  %5570 = vmatprep.mubr.msk.bf16.mxu0 %vm509_vm1, %v1120_v22  ;;  %v960_v22 = vld [vmem:[%s6199_s29 + $0x88] sm:$0xf]  ;;  %v6553_v61 = vcombine.low %v6321_v4, %v6336_v39  ;;  %v6559_v34 = vcombine.low %v6339_v40, %v6345_v52  ;;  %v6563_v15 = vcombine.low %v6348_v53, %v6365_v29  ;;  %v1194_v4 = vshrl.u32 %v5035_v26, 16  ;;  %v6050_v39 = vld [vmem:[%s6199_s29 + $0x18] sm:$0xff]  }
  0x54   : > { %5518 = vmatprep.mubr.msk.bf16.mxu1 %vm509_vm1, %v493_v2  ;;  %v1155_v23 = vor.u32 %v1154_v14, %v1151_v58  ;;  %v3288_v2 = vld [vmem:[%s7696_s3] sm:$0xff]  ;;  %v5033_v59 = vcombine.low %v959_v62, %v960_v22  ;;  %v4999_v58 = vcombine.low %v6378_v46, %v6378_v46  ;;  %v1197_v52 = vshll.u32 %v5035_v26, 16  ;;  %v3295_v53 = vld [vmem:[%s7696_s3 + $0x38] sm:$0xff]  ;;  %v3302_v26 = vld [vmem:[%s7696_s3 + $0x70] sm:$0xff] }
  0x55   : > { %3322 = vperm.xlu0 %6001, %v3288_v2   ;;  %v6578_v29 = vcombine.low %v6375_v45, %v6378_v46  ;;  %v5072_v54 = vcombine.low %v6384_v7, %v6403_v33  ;;  %v3297_v45 = vld [vmem:[%s7696_s3 + $0x48] sm:$0xff]  ;;  %v1196_v46 = vrot.slane %v1194_v4, 3  ;;  %v3570_v7 = vld [vmem:[%s7697_s4 + $0xd0] sm:$0xff]  ;;  %v3572_v33 = vld [vmem:[%s7697_s4 + $0xe0] sm:$0xff] }
  0x56   : > { %v1156_v42 = vsel %vm350_vm0, %v1146_v35, %v1155_v23  ;;  %v1176_v41 = vshrl.u32 %v5033_v59, 16  ;;  %v1179_v3 = vshll.u32 %v5033_v59, 16  ;;  %v1190_v35 = vrot.slane %v1188_v50, 4 }
  0x57   : > { %v747_v62 = vshrl.u32 %v4999_v58, 16  ;;  %v750_v22 = vshll.u32 %v4999_v58, 16  ;;  %v2257_v59 = vshll.u32 %v6050_v39, 16 }
  0x58   : > { %v1181_v14 = vrot.slane %v1179_v3, 4  ;;  %v6054_v3 = vld [vmem:[%s6199_s29 + $0x28] sm:$0xff]  }
  0x59   : > { %3327 = vperm.xlu0 %6001, %v3289_v49   ;;  %v2277_v4 = vshrl.u32 %v6054_v3, 16 }
  0x5a   : > { %5571 = vmatmul.mubr.msk.bf16.gmra.mrb[12].mxu0 %vm509_vm1, %v1129_v25  ;;  %v1185_v25 = vshrl.u32 %v5034_v48, 16  ;;  %v3299_v48 = vld [vmem:[%s7696_s3 + $0x58] sm:$0xff] }
  0x5b   : > { %5519 = vmatmul.mubr.msk.bf16.gmra.mrb[28].mxu1 %vm509_vm1, %v502_v60  ;;  %5574 = vmatprep.mubr.msk.bf16.mxu0 %vm509_vm1, %v1138_v6  ;;  %v1164_v60 = vor.u32 %v1163_v31, %v1160_v10  ;;  %v6049_v6 = vld [vmem:[%s6199_s29 + $0x10] sm:$0xff]   ;;  %v752_v10 = vrot.slane %v750_v22, 4 }
  0x5c   : > { %5540 = vmatprep.mubr.msk.bf16.mxu1 %vm509_vm1, %v6355_v5  ;;  %v3290_v5 = vld [vmem:[%s7696_s3 + $0x10] sm:$0xff]  ;;  %v1187_v57 = vrot.slane %v1185_v25, 3  ;;  %v2252_v20 = vshll.u32 %v6049_v6, 16  ;;  %v2250_v12 = vshrl.u32 %v6049_v6, 16  ;;  %v2273_v6 = vshll.u32 %v6054_v3, 16 }
  0x5d   : > { %3332 = vperm.xlu1 %6002, %v3290_v5   ;;  %v1165_v63 = vsel %vm350_vm0, %v1155_v23, %v1164_v60  ;;  %v3294_v23 = vld [vmem:[%s7696_s3 + $0x30] sm:$0xff]  ;;  %v749_v5 = vrot.slane %v747_v62, 3  ;;  %v3304_v62 = vld [vmem:[%s7696_s3 + $0x80] sm:$0xff] }
  0x5e   : > { %v1191_v2 = vor.u32 %v1190_v35, %v1187_v57  ;;  %v6591_v31 = vrot.slane %v2252_v20, 1  ;;  %v2275_v57 = vrot.slane %v2273_v6, 1 }
  0x5f   : > { %v753_v49 = vor.u32 %v752_v10, %v749_v5  ;;  %v7713_v5 = vld [vmem:[#allocation6_spill] sm:$0xff] }
  0x60   : > { %v2279_v10 = vor.u32 %v2277_v4, %v2275_v57  ;;  %v6064_v4 = vld [vmem:[%s6199_s29 + $0x60] sm:$0xff]  }
  0x61   : > { %3337 = vperm.xlu1 %6002, %v3291_v17   ;;  %v2261_v17 = vshrl.u32 %v6050_v39, 16  ;;  %v754_v25 = vsel %vm350_vm0, %v6436_v51, %v753_v49  ;;  %v3305_v39 = vld [vmem:[%s7696_s3 + $0x88] sm:$0xff] }
  0x62   : > { %5575 = vmatmul.mubr.msk.bf16.gmra.mrb[16].mxu0 %vm509_vm1, %v1147_v43  ;;  %v1199_v43 = vrot.slane %v1197_v52, 4 }
  0x63   : > { %5541 = vmatmul.mubr.msk.bf16.vlgmr.msra.gmra.mrb[16].mxu1 %vm509_vm1, %v6358_v13  ;;  %5578 = vmatprep.mubr.msk.bf16.mxu0 %vm509_vm1, %v1156_v42  ;;  %v1173_v13 = vor.u32 %v1172_v30, %v1169_v1  ;;  %v3298_v42 = vld [vmem:[%s7696_s3 + $0x50] sm:$0xff]  ;;  %v6052_v30 = vld [vmem:[%s6199_s29 + $0x20] sm:$0xff]  }
  0x64   : > { %5591 = vmatpush3.bf16.msra.mxu1 %v6270_v18  ;;  %5544 = vmatprep.mubr.msk.bf16.mxu1 %vm509_vm1, %v6387_v11  ;;  %v3292_v18 = vld [vmem:[%s7696_s3 + $0x20] sm:$0xff]  ;;  %v1178_v11 = vrot.slane %v1176_v41, 3  ;;  %v1200_v1 = vor.u32 %v1199_v43, %v1196_v46  ;;  %v2259_v41 = vrot.slane %v2257_v59, 1  ;;  %v2269_v58 = vshrl.u32 %v6052_v30, 16  ;;  %v6061_v43 = vld [vmem:[%s6199_s29 + $0x48] sm:$0xff]  }
  0x65   : > { %5624 = vmatprep.subr.bf16.mxu1 %v6509_v47  ;;  %v1174_v16 = vsel %vm350_vm0, %v1164_v60, %v1173_v13  ;;  %3342 = vperm.xlu0 %6001, %v3292_v18   ;;  %v2255_v60 = vor.u32 %v6591_v31, %v2250_v12  ;;  %v6056_v18 = vld [vmem:[%s6199_s29 + $0x30] sm:$0xff]   ;;  %v6656_v12 = vld [vmem:[%s7694_s1 + $0x38] sm:$0xff]   ;;  %v6667_v46 = vld [vmem:[%s7694_s1 + $0x40] sm:$0xff]  }
  0x66   : > { %3347 = vperm.xlu1 %6002, %v3293_v56   ;;  %v1182_v40 = vor.u32 %v1181_v14, %v1178_v11  ;;  %v1201_v8 = vsel %vm350_vm0, %v1191_v2, %v1200_v1  ;;  %v2263_v56 = vor.u32 %v2261_v17, %v2259_v41  ;;  %v7711_v11 = vld [vmem:[#allocation2_spill] sm:$0xff]  ;;  %v6058_v14 = vld [vmem:[%s6199_s29 + $0x38] sm:$0xff]   ;;  %v2281_v35 = vshll.u32 %v6056_v18, 16  ;;  %v6093_v1 = vld [vmem:[%s6199_s29 + $0x2c] sm:$0xf] }
  0x67   : > { %v6619_v50 = vsel %vm2248_vm3, %v2255_v60, %v2259_v41  ;;  %v2293_v49 = vshrl.u32 %v6058_v14, 16  ;;  %v3309_v60 = vld [vmem:[%s7696_s3 + $0xa8] sm:$0xff]  ;;  %v6062_v17 = vld [vmem:[%s6199_s29 + $0x50] sm:$0xff]  }
  0x68   : > { %v1192_v36 = vsel %vm350_vm0, %v1182_v40, %v1191_v2  ;;  %v2283_v20 = vrot.slane %v2281_v35, 1  ;;  %v3306_v2 = vld [vmem:[%s7696_s3 + $0x90] sm:$0xff] }
  0x69   : > { %3352 = vperm.xlu0 %6001, %v3294_v23   ;;  %v2285_v23 = vshrl.u32 %v6056_v18, 16  ;;  %v6063_v18 = vld [vmem:[%s6199_s29 + $0x58] sm:$0xff]  }
  0x6a   : > { %5579 = vmatmul.mubr.msk.bf16.gmra.mrb[20].mxu0 %vm509_vm1, %v1165_v63  ;;  %3357 = vperm.xlu1 %6002, %v3295_v53   ;;  %v3303_v63 = vld [vmem:[%s7696_s3 + $0x78] sm:$0xff]  ;;  %v6060_v53 = vld [vmem:[%s6199_s29 + $0x40] sm:$0xff]   ;;  %v2321_v35 = vshll.u32 %v6063_v18, 16 }
  0x6b   : > { %5545 = vmatmul.mubr.msk.bf16.gmra.mrb[20].mxu1 %vm509_vm1, %v6397_v21  ;;  %5582 = vmatprep.mubr.msk.bf16.mxu0 %vm509_vm1, %v1174_v16  ;;  %v3296_v21 = vld [vmem:[%s7696_s3 + $0x40] sm:$0xff]  ;;  %v2287_v59 = vor.u32 %v2285_v23, %v2283_v20  ;;  %v2301_v3 = vshrl.u32 %v6060_v53, 16 }
  0x6c   : > { %5548 = vmatprep.mubr.msk.bf16.mxu1 %vm509_vm1, %v6418_v9  ;;  %v1183_v9 = vsel %vm350_vm0, %v1173_v13, %v1182_v40  ;;  %v2265_v13 = vshll.u32 %v6052_v30, 16  ;;  %v2289_v40 = vshll.u32 %v6058_v14, 16  ;;  %v3313_v14 = vld [vmem:[%s7696_s3 + $0xc8] sm:$0xff] }
  0x6d   : > { %3362 = vperm.xlu0 %6001, %v3296_v21   ;;  %v7712_v21 = vld [vmem:[#allocation3_spill] sm:$0xff] }
  0x6e   : > { %3367 = vperm.xlu1 %6002, %v3297_v45   ;;  %v2267_v51 = vrot.slane %v2265_v13, 1  ;;  %v3307_v45 = vld [vmem:[%s7696_s3 + $0x98] sm:$0xff]  ;;  %v3310_v13 = vld [vmem:[%s7696_s3 + $0xb0] sm:$0xff] }
  0x70   : > { %v2271_v16 = vor.u32 %v2269_v58, %v2267_v51  ;;  %v6639_v22 = vsel %vm2248_vm3, %v2263_v56, %v2267_v51  ;;  %v3312_v56 = vld [vmem:[%s7696_s3 + $0xc0] sm:$0xff] }
  0x71   : > { %3372 = vperm.xlu0 %6001, %v3298_v42   ;;  %v3308_v42 = vld [vmem:[%s7696_s3 + $0xa0] sm:$0xff] }
  0x72   : > { %5583 = vmatmul.mubr.msk.bf16.gmra.mrb[24].mxu0 %vm509_vm1, %v1183_v9  ;;  %3377 = vperm.xlu1 %6002, %v3299_v48   ;;  %v6647_v52 = vsel %vm2248_vm3, %v2271_v16, %v2275_v57  ;;  %v2291_v9 = vrot.slane %v2289_v40, 1  ;;  %v6684_v48 = vsel %vm2248_vm3, %v2279_v10, %v2283_v20  ;;  %v2317_v57 = vshrl.u32 %v6062_v17, 16  ;;  %v3315_v40 = vld [vmem:[%s7696_s3 + $0xd8] sm:$0xff]  ;;  %v3316_v10 = vld [vmem:[%s7696_s3 + $0xe0] sm:$0xff] }
  0x73   : > { %5549 = vmatmul.mubr.msk.bf16.gmra.mrb[24].mxu1 %vm509_vm1, %v6425_v28  ;;  %5586 = vmatprep.mubr.msk.bf16.mxu0 %vm509_vm1, %v1192_v36  ;;  %v3300_v28 = vld [vmem:[%s7696_s3 + $0x60] sm:$0xff]  ;;  %v2297_v36 = vshll.u32 %v6060_v53, 16  ;;  %v2323_v53 = vrot.slane %v2321_v35, 1 }
  0x74   : > { %5552 = vmatprep.mubr.msk.bf16.mxu1 %vm509_vm1, %v6442_v27  ;;  %v3301_v27 = vld [vmem:[%s7696_s3 + $0x68] sm:$0xff]  ;;  %v6691_v41 = vsel %vm2248_vm3, %v2287_v59, %v2291_v9  ;;  %v2325_v59 = vshrl.u32 %v6063_v18, 16 }
  0x75   : > { %3382 = vperm.xlu0 %6001, %v3300_v28   ;;  %v2305_v28 = vshll.u32 %v6061_v43, 16 }
  0x76   : > { %3387 = vperm.xlu1 %6002, %v3301_v27   ;;  %v2295_v27 = vor.u32 %v2293_v49, %v2291_v9  ;;  %v3317_v9 = vld [vmem:[%s7696_s3 + $0xe8] sm:$0xff]  ;;  %v3318_v49 = vld [vmem:[%s7696_s3 + $0xf0] sm:$0xff] }
  0x77   : > { %v2307_v6 = vrot.slane %v2305_v28, 1 }
  0x79   : > { %3392 = vperm.xlu0 %6001, %v3302_v26   ;;  %v2313_v26 = vshll.u32 %v6062_v17, 16  ;;  %v6067_v17 = vld [vmem:[%s6199_s29 + $0x78] sm:$0xff]  }
  0x7a   : > { %5587 = vmatmul.mubr.msk.bf16.gmra.mrb[28].mxu0 %vm509_vm1, %v1201_v8  ;;  %3397 = vperm.xlu1 %6002, %v3303_v63   ;;  %v2299_v8 = vrot.slane %v2297_v36, 1  ;;  %v2309_v63 = vshrl.u32 %v6061_v43, 16  ;;  %v2333_v36 = vshrl.u32 %v6064_v4, 16 }
  0x7b   : > { %5553 = vmatmul.mubr.msk.bf16.gmra.mrb[28].mxu1 %vm509_vm1, %v754_v25  ;;  %5694 = vmatprep.mubr.msk.bf16.mxu0 %vm509_vm1, %v6619_v50  ;;  %v3311_v25 = vld [vmem:[%s7696_s3 + $0xb8] sm:$0xff] }
  0x7c   : > { %5592 = vmatprep.mubr.msk.bf16.mxu1 %vm509_vm1, %v7711_v11  ;;  %v2303_v58 = vor.u32 %v2301_v3, %v2299_v8  ;;  %v6713_v51 = vsel %vm2248_vm3, %v2295_v27, %v2299_v8  ;;  %v2311_v23 = vor.u32 %v2309_v63, %v2307_v6  ;;  %v3319_v3 = vld [vmem:[%s7696_s3 + $0xf8] sm:$0xff]  ;;  %v3544_v27 = vld [vmem:[%s7697_s4] sm:$0xff] }
  0x7d   : > { %3402 = vperm.xlu0 %6001, %v3304_v62   ;;  %v2315_v62 = vrot.slane %v2313_v26, 1 }
  0x7e   : > { %3407 = vperm.xlu1 %6002, %v3305_v39   ;;  %v6719_v16 = vsel %vm2248_vm3, %v2303_v58, %v2307_v6  ;;  %v3314_v39 = vld [vmem:[%s7696_s3 + $0xd0] sm:$0xff]  ;;  %v3545_v6 = vld [vmem:[%s7697_s4 + $0x8] sm:$0xff] }
  0x7f   : > { %v2319_v20 = vor.u32 %v2317_v57, %v2315_v62  ;;  %v3546_v57 = vld [vmem:[%s7697_s4 + $0x10] sm:$0xff] }
  0x81   : > { %3412 = vperm.xlu0 %6001, %v3306_v2   ;;  %v6065_v2 = vld [vmem:[%s6199_s29 + $0x68] sm:$0xff]   ;;  %v6747_v43 = vsel %vm2248_vm3, %v2319_v20, %v2323_v53  ;;  %v3548_v20 = vld [vmem:[%s7697_s4 + $0x20] sm:$0xff] }
  0x82   : > { %5695 = vmatmul.mubr.msk.bf16.vlgmr.msra.gmra.mrb[32].mxu0 %vm509_vm1, %v6639_v22  ;;  %3417 = vperm.xlu1 %6002, %v3307_v45   ;;  %v6741_v45 = vsel %vm2248_vm3, %v2311_v23, %v2315_v62  ;;  %v2341_v58 = vshrl.u32 %v6065_v2, 16  ;;  %v3547_v62 = vld [vmem:[%s7697_s4 + $0x18] sm:$0xff]  ;;  %v6069_v23 = vld [vmem:[%s6199_s29 + $0x88] sm:$0xff]  }
  0x83   : > { %5593 = vmatmul.mubr.msk.bf16.vlgmr.msra.gmra.mrb[32].mxu1 %vm509_vm1, %v7712_v21  ;;  %5727 = vmatpush3.bf16.msra.mxu0 %v7713_v5  ;;  %v2329_v5 = vshll.u32 %v6064_v4, 16 }
  0x84   : > { %5625 = vmatpush3.bf16.msra.mxu1 %v6509_v47  ;;  %5596 = vmatprep.mubr.msk.bf16.mxu1 %vm509_vm1, %v6461_v19  ;;  %v6092_v47 = vld [vmem:[%s6199_s29 + $0x28] sm:$0xf] }
  0x85   : > { %5698 = vmatprep.mubr.msk.bf16.mxu0 %vm509_vm1, %v6647_v52  ;;  %5658 = vmatprep.subr.bf16.mxu1 %v6656_v12  ;;  %v6681_v30 = vcombine.low %v6092_v47, %v6093_v1  ;;  %v2331_v47 = vrot.slane %v2329_v5, 1  ;;  %v6066_v1 = vld [vmem:[%s6199_s29 + $0x70] sm:$0xff]   ;;  %v3549_v5 = vld [vmem:[%s7697_s4 + $0x28] sm:$0xff] }
  0x86   : > { %5760 = vmatprep.subr.bf16.mxu0 %v6667_v46  ;;  %3422 = vperm.xlu0 %6001, %v3308_v42   ;;  %v2337_v42 = vshll.u32 %v6065_v2, 16  ;;  %v2349_v26 = vshrl.u32 %v6066_v1, 16  ;;  %v2357_v2 = vshrl.u32 %v6067_v17, 16 }
  0x87   : > { %3427 = vperm.xlu1 %6002, %v3309_v60   ;;  %v2327_v60 = vor.u32 %v2325_v59, %v2323_v53  ;;  %v2335_v28 = vor.u32 %v2333_v36, %v2331_v47  ;;  %v6072_v36 = vld [vmem:[%s6199_s29 + $0x8] sm:$0xff]  }
  0x88   : > { %v2339_v8 = vrot.slane %v2337_v42, 1 }
  0x8a   : > { %5699 = vmatmul.mubr.msk.bf16.gmra.mrb[36].mxu0 %vm509_vm1, %v6684_v48  ;;  %3432 = vperm.xlu0 %6001, %v3310_v13   ;;  %v2345_v13 = vshll.u32 %v6066_v1, 16  ;;  %v6775_v18 = vsel %vm2248_vm3, %v2335_v28, %v2339_v8  ;;  %v2343_v35 = vor.u32 %v2341_v58, %v2339_v8  ;;  %v2607_v8 = vshll.u32 %v6072_v36, 16 }
  0x8b   : > { %5597 = vmatmul.mubr.msk.bf16.gmra.mrb[36].mxu1 %vm509_vm1, %v6681_v30  ;;  %5702 = vmatprep.mubr.msk.bf16.mxu0 %vm509_vm1, %v6691_v41 }
  0x8c   : > { %5600 = vmatprep.mubr.msk.bf16.mxu1 %vm509_vm1, %v6473_v38  ;;  %3437 = vperm.xlu1 %6002, %v3311_v25   ;;  %v6769_v25 = vsel %vm2248_vm3, %v2327_v60, %v2331_v47  ;;  %v2347_v63 = vrot.slane %v2345_v13, 1  ;;  %v3550_v47 = vld [vmem:[%s7697_s4 + $0x30] sm:$0xff]  ;;  %v3551_v60 = vld [vmem:[%s7697_s4 + $0x38] sm:$0xff] }
  0x8e   : > { %3442 = vperm.xlu0 %6001, %v3312_v56   ;;  %v2353_v56 = vshll.u32 %v6067_v17, 16  ;;  %v2351_v4 = vor.u32 %v2349_v26, %v2347_v63  ;;  %v6797_v53 = vsel %vm2248_vm3, %v2343_v35, %v2347_v63  ;;  %v3552_v17 = vld [vmem:[%s7697_s4 + $0x40] sm:$0xff]  ;;  %v2609_v63 = vrot.slane %v2607_v8, 1 }
  0x90   : > { %3447 = vperm.xlu1 %6002, %v3313_v14   ;;  %v6068_v14 = vld [vmem:[%s6199_s29 + $0x80] sm:$0xff]  }
  0x91   : > { %v2365_v59 = vshrl.u32 %v6068_v14, 16 }
  0x92   : > { %5703 = vmatmul.mubr.msk.bf16.gmra.mrb[40].mxu0 %vm509_vm1, %v6713_v51  ;;  %3452 = vperm.xlu0 %6001, %v3314_v39   ;;  %v2355_v39 = vrot.slane %v2353_v56, 1  ;;  %v2605_v56 = vshrl.u32 %v6072_v36, 16  ;;  %v3566_v36 = vld [vmem:[%s7697_s4 + $0xb0] sm:$0xff] }
  0x93   : > { %5601 = vmatmul.mubr.msk.bf16.gmra.mrb[40].mxu1 %vm509_vm1, %v6482_v32  ;;  %5706 = vmatprep.mubr.msk.bf16.mxu0 %vm509_vm1, %v6719_v16 }
  0x94   : > { %5604 = vmatprep.mubr.msk.bf16.mxu1 %vm509_vm1, %v6495_v37  ;;  %3457 = vperm.xlu1 %6002, %v3315_v40   ;;  %v2361_v40 = vshll.u32 %v6068_v14, 16  ;;  %v2359_v1 = vor.u32 %v2357_v2, %v2355_v39  ;;  %v3556_v14 = vld [vmem:[%s7697_s4 + $0x60] sm:$0xff]  ;;  %v6095_v2 = vld [vmem:[%s6199_s29 + $0xc] sm:$0xf] }
  0x96   : > { %3462 = vperm.xlu0 %6001, %v3316_v10   ;;  %v6803_v10 = vsel %vm2248_vm3, %v2351_v4, %v2355_v39  ;;  %v2363_v42 = vrot.slane %v2361_v40, 1  ;;  %v2610_v4 = vor.u32 %v2609_v63, %v2605_v56  ;;  %v3560_v39 = vld [vmem:[%s7697_s4 + $0x80] sm:$0xff]  ;;  %v3562_v40 = vld [vmem:[%s7697_s4 + $0x90] sm:$0xff] }
  0x98   : > { %3467 = vperm.xlu1 %6002, %v3317_v9   ;;  %v2369_v9 = vshll.u32 %v6069_v23, 16  ;;  %v6827_v13 = vsel %vm2248_vm3, %v2359_v1, %v2363_v42 }
  0x9a   : > { %5707 = vmatmul.mubr.msk.bf16.gmra.mrb[44].mxu0 %vm509_vm1, %v6741_v45  ;;  %3472 = vperm.xlu0 %6001, %v3318_v49   ;;  %v6070_v49 = vld [vmem:[%s6199_s29 + $0x90] ss:$0 sps:$4 sm:$0x11]   ;;  %v2371_v28 = vrot.slane %v2369_v9, 1  ;;  %v3564_v9 = vld [vmem:[%s7697_s4 + $0xa0] sm:$0xff] }
  0x9b   : > { %5605 = vmatmul.mubr.msk.bf16.gmra.mrb[44].mxu1 %vm509_vm1, %v6513_v0  ;;  %5710 = vmatprep.mubr.msk.bf16.mxu0 %vm509_vm1, %v6747_v43  ;;  %v2377_v58 = vshll.u32 %v6070_v49, 16 }
  0x9c   : > { %5608 = vmatprep.mubr.msk.bf16.mxu1 %vm509_vm1, %v6517_v44  ;;  %3477 = vperm.xlu1 %6002, %v3319_v3   ;;  %v6821_v3 = vor.u32 %v2365_v59, %v2363_v42  ;;  %v2611_v59 = vsel %vm2248_vm3, %v2610_v4, %v6591_v31  ;;  %v3568_v31 = vld [vmem:[%s7697_s4 + $0xc0] sm:$0xff] }
  0x9d   : > { %v2379_v35 = vrot.slane %v2377_v58, 1  ;;  %v6080_v4 = vld [vmem:[%s6199_s29 + $0x40] sm:$0xff]  }
  0x9e   : > { %3578 = vperm.xlu0 %6001, %v3544_v27   ;;  %v2373_v27 = vshrl.u32 %v6069_v23, 16  ;;  %v2372_v26 = vsel %vm2248_vm3, %v6821_v3, %v2371_v28 }
  0xa0   : > { %3583 = vperm.xlu1 %6002, %v3545_v6   ;;  %v3554_v6 = vld [vmem:[%s7697_s4 + $0x50] sm:$0xff] }
  0xa2   : > { %5711 = vmatmul.mubr.msk.bf16.gmra.mrb[48].mxu0 %vm509_vm1, %v6769_v25  ;;  %3588 = vperm.xlu0 %6001, %v3546_v57   ;;  %v2375_v57 = vor.u32 %v2373_v27, %v2371_v28 }
  0xa3   : > { %5609 = vmatmul.mubr.msk.bf16.gmra.mrb[48].mxu1 %vm509_vm1, %v6532_v24  ;;  %5714 = vmatprep.mubr.msk.bf16.mxu0 %vm509_vm1, %v6775_v18 }
  0xa4   : > { %5612 = vmatprep.mubr.msk.bf16.mxu1 %vm509_vm1, %v6539_v55  ;;  %3593 = vperm.xlu1 %6002, %v3547_v62   ;;  %v3558_v62 = vld [vmem:[%s7697_s4 + $0x70] sm:$0xff]  ;;  %v2380_v23 = vsel %vm2248_vm3, %v2375_v57, %v2379_v35 }
  0xa6   : > { %3598 = vperm.xlu0 %6001, %v3548_v20   ;;  %v6094_v20 = vld [vmem:[%s6199_s29 + $0x8] sm:$0xf] }
  0xa8   : > { %3603 = vperm.xlu1 %6002, %v3549_v5   ;;  %v5090_v5 = vcombine.low %v6094_v20, %v6095_v2 }
  0xaa   : > { %5715 = vmatmul.mubr.msk.bf16.gmra.mrb[52].mxu0 %vm509_vm1, %v6797_v53  ;;  %3608 = vperm.xlu0 %6001, %v3550_v47  }
  0xab   : > { %5613 = vmatmul.mubr.msk.bf16.gmra.mrb[52].mxu1 %vm509_vm1, %v6553_v61  ;;  %5718 = vmatprep.mubr.msk.bf16.mxu0 %vm509_vm1, %v6803_v10 }
  0xac   : > { %5616 = vmatprep.mubr.msk.bf16.mxu1 %vm509_vm1, %v6559_v34  ;;  %3613 = vperm.xlu1 %6002, %v3551_v60  }
  0xae   : > { %3618 = vperm.xlu0 %6001, %v3552_v17   ;;  %v6096_v17 = vld [vmem:[%s6199_s29 + $0x18] sm:$0xf] }
  0xb0   : > { %3628 = vperm.xlu1 %6002, %v3554_v6  }
  0xb2   : > { %5719 = vmatmul.mubr.msk.bf16.gmra.mrb[56].mxu0 %vm509_vm1, %v6827_v13  ;;  %3638 = vperm.xlu0 %6001, %v3556_v14   ;;  %v6079_v14 = vld [vmem:[%s6199_s29 + $0x38] sm:$0xff]  }
  0xb3   : > { %5617 = vmatmul.mubr.msk.bf16.gmra.mrb[56].mxu1 %vm509_vm1, %v6563_v15  ;;  %5722 = vmatprep.mubr.msk.bf16.mxu0 %vm509_vm1, %v2372_v26 }
  0xb4   : > { %5620 = vmatprep.mubr.msk.bf16.mxu1 %vm509_vm1, %v6578_v29  ;;  %3648 = vperm.xlu1 %6002, %v3558_v62  }
  0xb6   : > { %3658 = vperm.xlu0 %6001, %v3560_v39  }
  0xb8   : > { %3668 = vperm.xlu1 %6002, %v3562_v40  }
  0xba   : > { %5723 = vmatmul.mubr.msk.bf16.gmra.mrb[60].mxu0 %vm509_vm1, %v2380_v23  ;;  %3678 = vperm.xlu0 %6001, %v3564_v9   ;;  %v2941_v23 = vshll.u32 %v6079_v14, 16  ;;  %v6098_v9 = vld [vmem:[%s6199_s29 + $0x28] sm:$0xf] }
  0xbb   : > { %5621 = vmatmul.mubr.msk.bf16.gmra.mrb[60].mxu1 %vm509_vm1, %v5072_v54  ;;  %5728 = vmatprep.mubr.msk.bf16.mxu0 %vm509_vm1, %v2611_v59  ;;  %v3574_v54 = vld [vmem:[%s7697_s4 + $0xf0] sm:$0xff] }
  0xbc   : > { %5626 = vmatprep.mubr.msk.bf16.mxu1 %vm509_vm1, %v5090_v5  ;;  %3688 = vperm.xlu1 %6002, %v3566_v36   ;;  %v6099_v36 = vld [vmem:[%s6199_s29 + $0x2c] sm:$0xf] }
  0xbe   : > { %3698 = vperm.xlu0 %6001, %v3568_v31   ;;  %v5112_v31 = vcombine.low %v6098_v9, %v6099_v36 }
  0xc0   : > { %3708 = vperm.xlu1 %6002, %v3570_v7  }
  0xc2   : > { %5729 = vmatmul.mubr.msk.bf16.vlgmr.msra.gmra.mrb[32].mxu0 %vm509_vm1, %v6619_v50  ;;  %3718 = vperm.xlu0 %6001, %v3572_v33   ;;  %v3553_v50 = vld [vmem:[%s7697_s4 + $0x48] sm:$0xff]  ;;  %v2945_v33 = vshrl.u32 %v6079_v14, 16  ;;  %v6084_v14 = vld [vmem:[%s6199_s29 + $0x60] sm:$0xff]  }
  0xc3   : > { %5627 = vmatmul.mubr.msk.bf16.vlgmr.msra.gmra.mrb[32].mxu1 %vm509_vm1, %v7711_v11  ;;  %5761 = vmatpush3.bf16.msra.mxu0 %v6667_v46  ;;  %v3555_v11 = vld [vmem:[%s7697_s4 + $0x58] sm:$0xff] }
  0xc4   : > { %5659 = vmatpush3.bf16.msra.mxu1 %v6656_v12  ;;  %5630 = vmatprep.mubr.msk.bf16.mxu1 %vm509_vm1, %v7712_v21  ;;  %v3557_v12 = vld [vmem:[%s7697_s4 + $0x68] sm:$0xff]  ;;  %v3567_v46 = vld [vmem:[%s7697_s4 + $0xb8] sm:$0xff] }
  0xc5   : > { %5732 = vmatprep.mubr.msk.bf16.mxu0 %vm509_vm1, %v6639_v22  ;;  %3728 = vperm.xlu1 %6002, %v3574_v54   ;;  %v3559_v22 = vld [vmem:[%s7697_s4 + $0x78] sm:$0xff]  ;;  %v3565_v21 = vld [vmem:[%s7697_s4 + $0xa8] sm:$0xff]  ;;  %v2949_v54 = vshll.u32 %v6080_v4, 16 }
  0xc6   : > { %3623 = vperm.xlu0 %6001, %v3553_v50  }
  0xc9   : > { %3633 = vperm.xlu1 %6002, %v3555_v11   ;;  %v2943_v11 = vrot.slane %v2941_v23, 1  ;;  %v6105_v23 = vld [vmem:[%s6199_s29 + $0x44] sm:$0xf] }
  0xca   : > { %5733 = vmatmul.mubr.msk.bf16.gmra.mrb[36].mxu0 %vm509_vm1, %v6647_v52  ;;  %3643 = vperm.xlu0 %6001, %v3557_v12   ;;  %v3561_v52 = vld [vmem:[%s7697_s4 + $0x88] sm:$0xff] }
  0xcb   : > { %5631 = vmatmul.mubr.msk.bf16.gmra.mrb[36].mxu1 %vm509_vm1, %v6461_v19  ;;  %5736 = vmatprep.mubr.msk.bf16.mxu0 %vm509_vm1, %v6684_v48  ;;  %v3563_v19 = vld [vmem:[%s7697_s4 + $0x98] sm:$0xff]  ;;  %v6081_v12 = vld [vmem:[%s6199_s29 + $0x48] sm:$0xff]  }
  0xcc   : > { %5634 = vmatprep.mubr.msk.bf16.mxu1 %vm509_vm1, %v6681_v30  ;;  %v3569_v30 = vld [vmem:[%s7697_s4 + $0xc8] sm:$0xff]  ;;  %v3575_v48 = vld [vmem:[%s7697_s4 + $0xf8] sm:$0xff] }
  0xcd   : > { %3653 = vperm.xlu1 %6002, %v3559_v22   ;;  %v7714_v22 = vld [vmem:[#allocation4_spill] sm:$0xff] }
  0xce   : > { %3663 = vperm.xlu0 %6001, %v3561_v52   ;;  %v7715_v52 = vld [vmem:[#allocation5_spill] sm:$0xff] }
  0xd1   : > { %3673 = vperm.xlu1 %6002, %v3563_v19   ;;  %v7716_v19 = vcombine.low %v7714_v22, %v7715_v52 }
  0xd2   : > { %5737 = vmatmul.mubr.msk.bf16.gmra.mrb[40].mxu0 %vm509_vm1, %v6691_v41  ;;  %3683 = vperm.xlu0 %6001, %v3565_v21  }
  0xd3   : > { %5635 = vmatmul.mubr.msk.bf16.gmra.mrb[40].mxu1 %vm509_vm1, %v6473_v38  ;;  %5740 = vmatprep.mubr.msk.bf16.mxu0 %vm509_vm1, %v6713_v51  ;;  %v3571_v38 = vld [vmem:[%s7697_s4 + $0xd8] sm:$0xff] }
  0xd4   : > { %5638 = vmatprep.mubr.msk.bf16.mxu1 %vm509_vm1, %v6482_v32  ;;  %v3573_v32 = vld [vmem:[%s7697_s4 + $0xe8] sm:$0xff]  ;;  %v6972_v51 = vpop.permute.xlu0 %3322 }
  0xd5   : > { %3693 = vperm.xlu1 %6002, %v3567_v46   ;;  %v2947_v46 = vor.u32 %v2945_v33, %v2943_v11 }
  0xd6   : > { %3703 = vperm.xlu0 %6001, %v3569_v30   ;;  %v2951_v30 = vrot.slane %v2949_v54, 1 }
  0xd9   : > { %3713 = vperm.xlu1 %6002, %v3571_v38   ;;  %v6082_v38 = vld [vmem:[%s6199_s29 + $0x50] sm:$0xff]  }
  0xda   : > { %5741 = vmatmul.mubr.msk.bf16.gmra.mrb[44].mxu0 %vm509_vm1, %v6719_v16  ;;  %3723 = vperm.xlu0 %6001, %v3573_v32   ;;  %v2969_v9 = vshrl.u32 %v6082_v38, 16 }
  0xdb   : > { %5639 = vmatmul.mubr.msk.bf16.gmra.mrb[44].mxu1 %vm509_vm1, %v6495_v37  ;;  %5744 = vmatprep.mubr.msk.bf16.mxu0 %vm509_vm1, %v6741_v45  ;;  %v6075_v37 = vld [vmem:[%s6199_s29 + $0x18] sm:$0xff]  }
  0xdc   : > { %5642 = vmatprep.mubr.msk.bf16.mxu1 %vm509_vm1, %v6513_v0  ;;  %v6074_v0 = vld [vmem:[%s6199_s29 + $0x88] ss:$0 sps:$4 sm:$0x11]   ;;  %v2912_v41 = vshll.u32 %v6075_v37, 16  ;;  %v2910_v45 = vshrl.u32 %v6075_v37, 16 }
  0xdd   : > { %3733 = vperm.xlu1 %6002, %v3575_v48   ;;  %v2613_v16 = vshll.u32 %v6074_v0, 16  ;;  %v2957_v0 = vshll.u32 %v6081_v12, 16 }
  0xe2   : > { %5745 = vmatmul.mubr.msk.bf16.gmra.mrb[48].mxu0 %vm509_vm1, %v6747_v43  ;;  %v2914_v43 = vrot.slane %v2912_v41, 1  ;;  %v6100_v41 = vld [vmem:[%s6199_s29 + $0x30] sm:$0xf] }
  0xe3   : > { %5643 = vmatmul.mubr.msk.bf16.gmra.mrb[48].mxu1 %vm509_vm1, %v6517_v44  ;;  %5748 = vmatprep.mubr.msk.bf16.mxu0 %vm509_vm1, %v6769_v25  ;;  %v6076_v44 = vld [vmem:[%s6199_s29 + $0x20] sm:$0xff]  }
  0xe4   : > { %5646 = vmatprep.mubr.msk.bf16.mxu1 %vm509_vm1, %v6532_v24  ;;  %v6974_v24 = vpop.permute.xlu1 %3332  ;;  %v2917_v25 = vshll.u32 %v6076_v44, 16  ;;  %v2915_v42 = vor.u32 %v2914_v43, %v2910_v45  ;;  %v2921_v28 = vshrl.u32 %v6076_v44, 16 }
  0xe6   : > { %v2919_v47 = vrot.slane %v2917_v25, 1  ;;  %v2953_v25 = vshrl.u32 %v6080_v4, 16  ;;  %v6104_v4 = vld [vmem:[%s6199_s29 + $0x40] sm:$0xf] }
  0xe8   : > { %v2923_v57 = vor.u32 %v2921_v28, %v2919_v47 }
  0xea   : > { %5749 = vmatmul.mubr.msk.bf16.gmra.mrb[52].mxu0 %vm509_vm1, %v6775_v18  ;;  %v6979_v18 = vpop.permute.xlu0 %3327 }
  0xeb   : > { %5647 = vmatmul.mubr.msk.bf16.gmra.mrb[52].mxu1 %vm509_vm1, %v6539_v55  ;;  %5752 = vmatprep.mubr.msk.bf16.mxu0 %vm509_vm1, %v6797_v53  ;;  %v6077_v55 = vld [vmem:[%s6199_s29 + $0x28] sm:$0xff]   ;;  %v6985_v53 = vpop.permute.xlu1 %3337 }
  0xec   : > { %5650 = vmatprep.mubr.msk.bf16.mxu1 %vm509_vm1, %v6553_v61  ;;  %v2615_v61 = vrot.slane %v2613_v16, 1  ;;  %v2925_v49 = vshll.u32 %v6077_v55, 16  ;;  %v2929_v58 = vshrl.u32 %v6077_v55, 16  ;;  %v6101_v16 = vld [vmem:[%s6199_s29 + $0x34] sm:$0xf] }
  0xed   : > { %v5113_v45 = vcombine.low %v6100_v41, %v6101_v16  ;;  %v7091_v41 = vld [vmem:[%s6199_s29 + $0x70] sm:$0xff]  }
  0xee   : > { %v7001_v26 = vpop.permute.xlu0 %3342 }
  0xef   : > { %v7005_v63 = vpop.permute.xlu1 %3347 }
  0xf2   : > { %5753 = vmatmul.mubr.msk.bf16.gmra.mrb[56].mxu0 %vm509_vm1, %v6803_v10  ;;  %v6078_v10 = vld [vmem:[%s6199_s29 + $0x30] sm:$0xff]   ;;  %v7016_v40 = vpop.permute.xlu0 %3352 }
  0xf3   : > { %5651 = vmatmul.mubr.msk.bf16.gmra.mrb[56].mxu1 %vm509_vm1, %v6559_v34  ;;  %5756 = vmatprep.mubr.msk.bf16.mxu0 %vm509_vm1, %v6827_v13  ;;  %v2616_v34 = vsel %vm2248_vm3, %v6821_v3, %v2615_v61  ;;  %v6097_v13 = vld [vmem:[%s6199_s29 + $0x1c] sm:$0xf]  ;;  %v2933_v6 = vshll.u32 %v6078_v10, 16  ;;  %v2927_v3 = vrot.slane %v2925_v49, 1  ;;  %v7021_v5 = vpop.permute.xlu1 %3357  ;;  %v6102_v61 = vld [vmem:[%s6199_s29 + $0x38] sm:$0xf] }
  0xf4   : > { %5654 = vmatprep.mubr.msk.bf16.mxu1 %vm509_vm1, %v6563_v15  ;;  %v5110_v27 = vcombine.low %v6096_v17, %v6097_v13  ;;  %v2920_v15 = vsel %vm2248_vm3, %v2915_v42, %v2919_v47  ;;  %v6103_v42 = vld [vmem:[%s6199_s29 + $0x3c] sm:$0xf]  ;;  %v2961_v49 = vshrl.u32 %v6081_v12, 16  ;;  %v2959_v17 = vrot.slane %v2957_v0, 1 }
  0xf5   : > { %v2931_v35 = vor.u32 %v2929_v58, %v2927_v3  ;;  %v2935_v62 = vrot.slane %v2933_v6, 1  ;;  %v2928_v2 = vsel %vm2248_vm3, %v2923_v57, %v2927_v3  ;;  %v5114_v47 = vcombine.low %v6102_v61, %v6103_v42  ;;  %v6083_v13 = vld [vmem:[%s6199_s29 + $0x58] sm:$0xff]   ;;  %v6109_v61 = vld [vmem:[%s6199_s29 + $0x54] sm:$0xf] }
  0xf6   : > { %v6990_v1 = vpop.f32.mrb[0].mxu1  ;;  %v7039_v32 = vpop.permute.xlu0 %3362  ;;  %v2963_v6 = vor.u32 %v2961_v49, %v2959_v17  ;;  %v2981_v12 = vshll.u32 %v6084_v14, 16 }
  0xf7   : > { %v6992_v60 = vpop.f32.mrb[1].mxu1  ;;  %v2936_v7 = vsel %vm2248_vm3, %v2931_v35, %v2935_v62  ;;  %v7041_v48 = vpop.permute.xlu1 %3367  ;;  %v2973_v35 = vshll.u32 %v6083_v13, 16 }
  0xf8   : > { %v6996_v8 = vpop.f32.mrb[2].mxu1  ;;  %v2983_v0 = vrot.slane %v2981_v12, 1 }
  0xf9   : > { %v7003_v56 = vpop.f32.mrb[3].mxu1 }
  0xfa   : > { %5757 = vmatmul.mubr.msk.bf16.gmra.mrb[60].mxu0 %vm509_vm1, %v2616_v34  ;;  %v2965_v34 = vshll.u32 %v6082_v38, 16 }
  0xfb   : > { %5655 = vmatmul.mubr.msk.bf16.gmra.mrb[60].mxu1 %vm509_vm1, %v6578_v29  ;;  %5762 = vmatprep.mubr.msk.bf16.mxu0 %vm509_vm1, %v2920_v15  ;;  %v2937_v29 = vshrl.u32 %v6078_v10, 16  ;;  %v2952_v10 = vsel %vm2248_vm3, %v2947_v46, %v2951_v30  ;;  %v2955_v15 = vor.u32 %v2953_v25, %v2951_v30  ;;  %v7063_v58 = vpop.permute.xlu1 %3377  ;;  %v6085_v46 = vld [vmem:[%s6199_s29 + $0x68] sm:$0xff]   ;;  %v6108_v25 = vld [vmem:[%s6199_s29 + $0x50] sm:$0xf] }
  0xfc   : > { %5660 = vmatprep.mubr.msk.bf16.mxu1 %vm509_vm1, %v5110_v27  ;;  %v7059_v27 = vpop.permute.xlu0 %3372  ;;  %v2967_v3 = vrot.slane %v2965_v34, 1  ;;  %v5117_v42 = vcombine.low %v6108_v25, %v6109_v61 }
  0xfd   : > { %v2939_v21 = vor.u32 %v2937_v29, %v2935_v62  ;;  %v2960_v29 = vsel %vm2248_vm3, %v2955_v15, %v2959_v17  ;;  %v6111_v15 = vld [vmem:[%s6199_s29 + $0x5c] sm:$0xf] }
  0xfe   : > { %v7014_v39 = vpop.f32.mrb[4].mxu1  ;;  %v2968_v54 = vsel %vm2248_vm3, %v2963_v6, %v2967_v3  ;;  %v2971_v30 = vor.u32 %v2969_v9, %v2967_v3  ;;  %v2985_v3 = vshrl.u32 %v6084_v14, 16  ;;  %v6087_v9 = vld [vmem:[%s6199_s29 + $0x78] sm:$0xff]  }
  0xff   : > { %v7018_v20 = vpop.f32.mrb[5].mxu1  ;;  %v2944_v43 = vsel %vm2248_vm3, %v2939_v21, %v2943_v11  ;;  %v2977_v11 = vshrl.u32 %v6083_v13, 16  ;;  %v2975_v21 = vrot.slane %v2973_v35, 1  ;;  %v6110_v13 = vld [vmem:[%s6199_s29 + $0x58] sm:$0xf]  ;;  %v3005_v12 = vshll.u32 %v6087_v9, 16 }
 0x100   : > { %v7023_v59 = vpop.f32.mrb[6].mxu1  ;;  %v7079_v22 = vpop.permute.xlu0 %3382  ;;  %v5118_v6 = vcombine.low %v6110_v13, %v6111_v15  ;;  %v6115_v13 = vld [vmem:[%s6199_s29 + $0x6c] sm:$0xf] }
 0x101   : > { %v7028_v50 = vpop.f32.mrb[7].mxu1  ;;  %v2979_v38 = vor.u32 %v2977_v11, %v2975_v21  ;;  %v2976_v17 = vsel %vm2248_vm3, %v2971_v30, %v2975_v21 }
 0x102   : > { %5763 = vmatmul.mubr.msk.bf16.vlgmr.msra.gmra.mrb[32].mxu0 %vm509_vm1, %v2928_v2  ;;  %v5115_v2 = vcombine.low %v6104_v4, %v6105_v23 }
 0x103   : > { %5661 = vmatmul.mubr.msk.bf16.vlgmr.msra.gmra.mrb[32].mxu1 %vm509_vm1, %v7716_v19  ;;  %5766 = vmatprep.mubr.msk.bf16.mxu0 %vm509_vm1, %v2936_v7  ;;  %v6107_v7 = vld [vmem:[%s6199_s29 + $0x4c] sm:$0xf]  ;;  %v7083_v19 = vpop.permute.xlu1 %3387  ;;  %v2984_v23 = vsel %vm2248_vm3, %v2979_v38, %v2983_v0  ;;  %v6112_v38 = vld [vmem:[%s6199_s29 + $0x60] sm:$0xf] }
 0x104   : > { %5664 = vmatprep.mubr.msk.bf16.mxu1 %vm509_vm1, %v5112_v31  ;;  %v6106_v31 = vld [vmem:[%s6199_s29 + $0x48] sm:$0xf] }
 0x105   : > { %v5116_v33 = vcombine.low %v6106_v31, %v6107_v7  ;;  %v7120_v7 = vld [vmem:[%s6199_s29 + $0x80] sm:$0xff]  }
 0x106   : > { %v7043_v37 = vpop.f32.mrb[8].mxu1 }
 0x107   : > { %v7045_v44 = vpop.f32.mrb[9].mxu1 }
 0x108   : > { %v7050_v55 = vpop.f32.mrb[10].mxu1 }
 0x109   : > { %v7055_v28 = vpop.f32.mrb[11].mxu1 }
 0x10a   : > { %5767 = vmatmul.mubr.msk.bf16.gmra.mrb[36].mxu0 %vm509_vm1, %v2944_v43 }
 0x10b   : > { %5665 = vmatmul.mubr.msk.bf16.gmra.mrb[36].mxu1 %vm509_vm1, %v5113_v45  ;;  %5770 = vmatprep.mubr.msk.bf16.mxu0 %vm509_vm1, %v2952_v10  ;;  %v7098_v10 = vpop.permute.xlu0 %3392 }
 0x10c   : > { %5668 = vmatprep.mubr.msk.bf16.mxu1 %vm509_vm1, %v5114_v47  ;;  %v2989_v47 = vshll.u32 %v6085_v46, 16 }
 0x10e   : > { %v7067_v57 = vpop.f32.mrb[12].mxu1  ;;  %v2991_v14 = vrot.slane %v2989_v47, 1  ;;  %v3013_v47 = vshll.u32 %v7120_v7, 16 }
 0x10f   : > { %v7069_v62 = vpop.f32.mrb[13].mxu1 }
 0x110   : > { %v7074_v36 = vpop.f32.mrb[14].mxu1 }
 0x111   : > { %v7081_v52 = vpop.f32.mrb[15].mxu1 }
 0x112   : > { %5771 = vmatmul.mubr.msk.bf16.gmra.mrb[40].mxu0 %vm509_vm1, %v2960_v29  ;;  %v2997_v29 = vshll.u32 %v7091_v41, 16 }
 0x113   : > { %5669 = vmatmul.mubr.msk.bf16.gmra.mrb[40].mxu1 %vm509_vm1, %v5115_v2  ;;  %5774 = vmatprep.mubr.msk.bf16.mxu0 %vm509_vm1, %v2968_v54  ;;  %v2993_v2 = vshrl.u32 %v6085_v46, 16  ;;  %v7126_v54 = vpop.permute.xlu0 %3402 }
 0x114   : > { %5672 = vmatprep.mubr.msk.bf16.mxu1 %vm509_vm1, %v5116_v33 }
 0x115   : > { %v5560_v16 = vpop.f32.mrb[0].mxu0 }
 0x116   : > { %v7094_v45 = vadd.f32 %v5560_v16, %v6990_v1  ;;  %v1290_v43 = vpop.f32.mrb[1].mxu0  ;;  %v7104_v1 = vpop.permute.xlu1 %3397 }
 0x117   : > { %v5797_v49 = vadd.f32 %v1290_v43, %v6992_v60  ;;  %v5561_v34 = vpop.f32.mrb[2].mxu0 }
 0x118   : > { %v7107_v35 = vadd.f32 %v5561_v34, %v6996_v8  ;;  %v1293_v4 = vpop.f32.mrb[3].mxu0  ;;  %v2987_v8 = vor.u32 %v2985_v3, %v2983_v0  ;;  %v6113_v0 = vld [vmem:[%s6199_s29 + $0x64] sm:$0xf] }
 0x119   : > { %v5799_v60 = vadd.f32 %v1293_v4, %v7003_v56  ;;  %v7114_v31 = vmul.f32 %v5797_v49, %v6972_v51  ;;  %v2995_v56 = vor.u32 %v2993_v2, %v2991_v14  ;;  %v2999_v51 = vrot.slane %v2997_v29, 1  ;;  %v7164_v29 = vld [vmem:[%s6199_s29 + $0x90] sm:$0xff]  }
 0x11a   : > { %5775 = vmatmul.mubr.msk.bf16.gmra.mrb[44].mxu0 %vm509_vm1, %v2976_v17  ;;  %v7128_v21 = vpop.permute.xlu1 %3407  ;;  %v5119_v16 = vcombine.low %v6112_v38, %v6113_v0  ;;  %v2992_v61 = vsel %vm2248_vm3, %v2987_v8, %v2991_v14  ;;  %v6114_v17 = vld [vmem:[%s6199_s29 + $0x68] sm:$0xf]  ;;  %v3015_v2 = vrot.slane %v3013_v47, 1  ;;  %v6116_v8 = vld [vmem:[%s6199_s29 + $0x70] sm:$0xf] }
 0x11b   : > { %5673 = vmatmul.mubr.msk.bf16.gmra.mrb[44].mxu1 %vm509_vm1, %v5117_v42  ;;  %5778 = vmatprep.mubr.msk.bf16.mxu0 %vm509_vm1, %v2984_v23  ;;  %v7123_v33 = vmul.f32 %v5799_v60, %v6979_v18  ;;  %v3001_v18 = vshrl.u32 %v7091_v41, 16  ;;  %v3009_v42 = vshrl.u32 %v6087_v9, 16  ;;  %v5120_v15 = vcombine.low %v6114_v17, %v6115_v13  ;;  %v7153_v23 = vpop.permute.xlu0 %3412  ;;  %v6118_v38 = vld [vmem:[%s6199_s29 + $0x78] sm:$0xf] }
 0x11c   : > { %5676 = vmatprep.mubr.msk.bf16.mxu1 %vm509_vm1, %v5118_v6  ;;  %v3000_v41 = vsel %vm2248_vm3, %v2995_v56, %v2999_v51  ;;  %v3007_v6 = vrot.slane %v3005_v12, 1  ;;  %v6117_v56 = vld [vmem:[%s6199_s29 + $0x74] sm:$0xf]  ;;  %v6091_v17 = vld [vmem:[%s6199_s29 + $0x98] ss:$0 sps:$4 sm:$0x11]  }
 0x11d   : > { %v5564_v11 = vpop.f32.mrb[4].mxu0 }
 0x11e   : > { %v5800_v46 = vadd.f32 %v5564_v11, %v7014_v39  ;;  %v1306_v30 = vpop.f32.mrb[5].mxu0 }
 0x11f   : > { %v5801_v43 = vadd.f32 %v1306_v30, %v7018_v20  ;;  %v5565_v25 = vpop.f32.mrb[6].mxu0  ;;  %v7180_v47 = vpop.permute.xlu0 %3422 }
 0x120   : > { %v7138_v49 = vmul.f32 %v5800_v46, %v7016_v40  ;;  %v5802_v39 = vadd.f32 %v5565_v25, %v7023_v59  ;;  %v1309_v34 = vpop.f32.mrb[7].mxu0  ;;  %v3003_v40 = vor.u32 %v3001_v18, %v2999_v51  ;;  %v6089_v59 = vld [vmem:[%s6199_s29 + $0x88] sm:$0xff]   ;;  %v5121_v51 = vcombine.low %v6116_v8, %v6117_v56 }
 0x121   : > { %v5803_v20 = vadd.f32 %v1309_v34, %v7028_v50  ;;  %v7146_v3 = vmul.f32 %v5801_v43, %v7001_v26  ;;  %v3011_v50 = vor.u32 %v3009_v42, %v3007_v6  ;;  %v7157_v26 = vpop.permute.xlu1 %3417  ;;  %v3021_v12 = vshll.u32 %v6089_v59, 16 }
 0x122   : > { %v7149_v4 = vmul.f32 %v5802_v39, %v7021_v5  ;;  %5779 = vmatmul.mubr.msk.bf16.gmra.mrb[48].mxu0 %vm509_vm1, %v2992_v61  ;;  %v3008_v11 = vsel %vm2248_vm3, %v3003_v40, %v3007_v6  ;;  %v3017_v18 = vshrl.u32 %v7120_v7, 16  ;;  %v3025_v61 = vshrl.u32 %v6089_v59, 16  ;;  %v6121_v6 = vld [vmem:[%s6199_s29 + $0x84] sm:$0xf] }
 0x123   : > { %5677 = vmatmul.mubr.msk.bf16.gmra.mrb[48].mxu1 %vm509_vm1, %v5119_v16  ;;  %5782 = vmatprep.mubr.msk.bf16.mxu0 %vm509_vm1, %v3000_v41  ;;  %v7160_v5 = vmul.f32 %v5803_v20, %v7005_v63  ;;  %v6119_v63 = vld [vmem:[%s6199_s29 + $0x7c] sm:$0xf]  ;;  %v3016_v16 = vsel %vm2248_vm3, %v3011_v50, %v3015_v2  ;;  %v3029_v42 = vshll.u32 %v7164_v29, 16  ;;  %v6120_v20 = vld [vmem:[%s6199_s29 + $0x80] sm:$0xf]  ;;  %v3433_v59 = vpop.permute.xlu0 %3432 }
 0x124   : > { %5680 = vmatprep.mubr.msk.bf16.mxu1 %vm509_vm1, %v5120_v15  ;;  %v5122_v0 = vcombine.low %v6118_v38, %v6119_v63  ;;  %v3019_v7 = vor.u32 %v3017_v18, %v3015_v2  ;;  %v5123_v40 = vcombine.low %v6120_v20, %v6121_v6 }
 0x125   : > { %v5568_v60 = vpop.f32.mrb[8].mxu0  ;;  %v7183_v39 = vpop.permute.xlu1 %3427  ;;  %v3031_v13 = vrot.slane %v3029_v42, 1 }
 0x126   : > { %v5804_v9 = vadd.f32 %v5568_v60, %v7043_v37  ;;  %v1322_v14 = vpop.f32.mrb[9].mxu0  ;;  %v3033_v60 = vshrl.u32 %v7164_v29, 16 }
 0x127   : > { %v5805_v46 = vadd.f32 %v1322_v14, %v7045_v44  ;;  %v5569_v30 = vpop.f32.mrb[10].mxu0 }
 0x128   : > { %v7176_v37 = vmul.f32 %v5804_v9, %v7059_v27  ;;  %v5806_v43 = vadd.f32 %v5569_v30, %v7050_v55  ;;  %v1325_v25 = vpop.f32.mrb[11].mxu0  ;;  %v3023_v55 = vrot.slane %v3021_v12, 1  ;;  %v3037_v9 = vshll.u32 %v6091_v17, 16 }
 0x129   : > { %v5807_v44 = vadd.f32 %v1325_v25, %v7055_v28  ;;  %v7186_v34 = vmul.f32 %v5805_v46, %v7039_v32  ;;  %v3438_v14 = vpop.permute.xlu1 %3437  ;;  %v6124_v25 = vld [vmem:[%s6199_s29 + $0x90] sm:$0xf] }
 0x12a   : > { %v7189_v27 = vmul.f32 %v5806_v43, %v7063_v58  ;;  %5783 = vmatmul.mubr.msk.bf16.gmra.mrb[52].mxu0 %vm509_vm1, %v3008_v11  ;;  %v3027_v32 = vor.u32 %v3025_v61, %v3023_v55  ;;  %v6123_v11 = vld [vmem:[%s6199_s29 + $0x8c] sm:$0xf]  ;;  %v6125_v61 = vld [vmem:[%s6199_s29 + $0x94] sm:$0xf] }
 0x12b   : > { %5681 = vmatmul.mubr.msk.bf16.gmra.mrb[52].mxu1 %vm509_vm1, %v5121_v51  ;;  %5786 = vmatprep.mubr.msk.bf16.mxu0 %vm509_vm1, %v3016_v16  ;;  %v7196_v28 = vmul.f32 %v5807_v44, %v7041_v48  ;;  %v3024_v48 = vsel %vm2248_vm3, %v3019_v7, %v3023_v55  ;;  %v6122_v51 = vld [vmem:[%s6199_s29 + $0x88] sm:$0xf]  ;;  %v5125_v42 = vcombine.low %v6124_v25, %v6125_v61 }
 0x12c   : > { %5684 = vmatprep.mubr.msk.bf16.mxu1 %vm509_vm1, %v5122_v0  ;;  %v5124_v12 = vcombine.low %v6122_v51, %v6123_v11  ;;  %v3032_v46 = vsel %vm2248_vm3, %v3027_v32, %v3031_v13 }
 0x12d   : > { %v5572_v15 = vpop.f32.mrb[12].mxu0  ;;  %v3448_v63 = vpop.permute.xlu1 %3447 }
 0x12e   : > { %v5808_v58 = vadd.f32 %v5572_v15, %v7067_v57  ;;  %v1338_v41 = vpop.f32.mrb[13].mxu0 }
 0x12f   : > { %v5809_v50 = vadd.f32 %v1338_v41, %v7069_v62  ;;  %v5573_v2 = vpop.f32.mrb[14].mxu0 }
 0x130   : > { %v7206_v8 = vmul.f32 %v5808_v58, %v7098_v10  ;;  %v5810_v57 = vadd.f32 %v5573_v2, %v7074_v36  ;;  %v1341_v56 = vpop.f32.mrb[15].mxu0  ;;  %v3035_v36 = vor.u32 %v3033_v60, %v3031_v13  ;;  %v3039_v10 = vrot.slane %v3037_v9, 1 }
 0x131   : > { %v5811_v62 = vadd.f32 %v1341_v56, %v7081_v52  ;;  %v7214_v30 = vmul.f32 %v5809_v50, %v7079_v22  ;;  %v3443_v22 = vpop.permute.xlu0 %3442 }
 0x132   : > { %v7217_v29 = vmul.f32 %v5810_v57, %v7104_v1  ;;  %5787 = vmatmul.mubr.msk.bf16.gmra.mrb[56].mxu0 %vm509_vm1, %v3024_v48  ;;  %v3040_v44 = vsel %vm2248_vm3, %v3035_v36, %v3039_v10 }
 0x133   : > { %5685 = vmatmul.mubr.msk.bf16.gmra.mrb[56].mxu1 %vm509_vm1, %v5123_v40  ;;  %5790 = vmatprep.mubr.msk.bf16.mxu0 %vm509_vm1, %v3032_v46  ;;  %v7223_v38 = vmul.f32 %v5811_v62, %v7083_v19 }
 0x134   : > { %5688 = vmatprep.mubr.msk.bf16.mxu1 %vm509_vm1, %v5124_v12 }
 0x135   : > { %v5576_v52 = vpop.f32.mrb[16].mxu0  ;;  %v3453_v20 = vpop.permute.xlu0 %3452 }
 0x136   : > { %v5542_v1 = vpop.f32.mrb[16].mxu1  ;;  %v1354_v0 = vpop.f32.mrb[17].mxu0 }
 0x137   : > { %v5812_v16 = vadd.f32 %v5576_v52, %v5542_v1  ;;  %v868_v18 = vpop.f32.mrb[17].mxu1  ;;  %v5577_v43 = vpop.f32.mrb[18].mxu0 }
 0x138   : > { %v5813_v55 = vadd.f32 %v1354_v0, %v868_v18  ;;  %v5543_v7 = vpop.f32.mrb[18].mxu1  ;;  %v1357_v17 = vpop.f32.mrb[19].mxu0 }
 0x139   : > { %v7230_v19 = vmul.f32 %v5812_v16, %v7153_v23  ;;  %v5814_v32 = vadd.f32 %v5577_v43, %v5543_v7  ;;  %v871_v13 = vpop.f32.mrb[19].mxu1  ;;  %v3458_v23 = vpop.permute.xlu1 %3457 }
 0x13a   : > { %v5815_v15 = vadd.f32 %v1357_v17, %v871_v13  ;;  %5791 = vmatmul.mubr.msk.bf16.gmra.mrb[60].mxu0 %vm509_vm1, %v3040_v44  ;;  %v7234_v58 = vmul.f32 %v5813_v55, %v7126_v54  ;;  %v3463_v62 = vpop.permute.xlu0 %3462 }
 0x13b   : > { %v7237_v41 = vmul.f32 %v5814_v32, %v7157_v26  ;;  %5689 = vmatmul.mubr.msk.bf16.gmra.mrb[60].mxu1 %vm509_vm1, %v5125_v42 }
 0x13c   : > { %v7241_v6 = vmul.f32 %v5815_v15, %v7128_v21 }
 0x13d   : > { %v5580_v40 = vpop.f32.mrb[20].mxu0  ;;  %v3468_v52 = vpop.permute.xlu1 %3467 }
 0x13e   : > { %v5546_v50 = vpop.f32.mrb[20].mxu1  ;;  %v1370_v2 = vpop.f32.mrb[21].mxu0 }
 0x13f   : > { %v5816_v48 = vadd.f32 %v5580_v40, %v5546_v50  ;;  %v884_v60 = vpop.f32.mrb[21].mxu1  ;;  %v5581_v9 = vpop.f32.mrb[22].mxu0 }
 0x140   : > { %v5817_v57 = vadd.f32 %v1370_v2, %v884_v60  ;;  %v5547_v56 = vpop.f32.mrb[22].mxu1  ;;  %v1373_v54 = vpop.f32.mrb[23].mxu0 }
 0x141   : > { %v7243_v51 = vmul.f32 %v5816_v48, %v3433_v59  ;;  %v5818_v26 = vadd.f32 %v5581_v9, %v5547_v56  ;;  %v887_v11 = vpop.f32.mrb[23].mxu1  ;;  %v3478_v13 = vpop.permute.xlu1 %3477 }
 0x142   : > { %v5819_v12 = vadd.f32 %v1373_v54, %v887_v11  ;;  %v7246_v46 = vmul.f32 %v5817_v57, %v7180_v47 }
 0x143   : > { %v7248_v21 = vmul.f32 %v5818_v26, %v3438_v14 }
 0x144   : > { %7717 = vst [vmem:[#allocation2_spill] sm:$0xff] %v7246_v46  ;;  %v7251_v36 = vmul.f32 %v5819_v12, %v7183_v39  ;;  %v3473_v39 = vpop.permute.xlu0 %3472 }
 0x145   : > { %7718 = vst [vmem:[#allocation3_spill] sm:$0xff] %v7248_v21  ;;  %v5584_v10 = vpop.f32.mrb[24].mxu0  ;;  %v3584_v11 = vpop.permute.xlu1 %3583 }
 0x146   : > { %7719 = vst [vmem:[#allocation6_spill] sm:$0xff] %v7251_v36  ;;  %v5550_v1 = vpop.f32.mrb[24].mxu1  ;;  %v1386_v0 = vpop.f32.mrb[25].mxu0 }
 0x147   : > { %v5820_v16 = vadd.f32 %v5584_v10, %v5550_v1  ;;  %v900_v18 = vpop.f32.mrb[25].mxu1  ;;  %v5585_v59 = vpop.f32.mrb[26].mxu0 }
 0x148   : > { %v5821_v43 = vadd.f32 %v1386_v0, %v900_v18  ;;  %v5551_v25 = vpop.f32.mrb[26].mxu1  ;;  %v1389_v61 = vpop.f32.mrb[27].mxu0 }
 0x149   : > { %v7253_v42 = vmul.f32 %v5820_v16, %v3453_v20  ;;  %v5822_v47 = vadd.f32 %v5585_v59, %v5551_v25  ;;  %v903_v44 = vpop.f32.mrb[27].mxu1  ;;  %v3579_v12 = vpop.permute.xlu0 %3578 }
 0x14a   : > { %v5823_v14 = vadd.f32 %v1389_v61, %v903_v44  ;;  %v7255_v55 = vmul.f32 %v5821_v43, %v3443_v22  ;;  %v3594_v10 = vpop.permute.xlu1 %3593 }
 0x14b   : > { %7720 = vst [vmem:[#allocation4_spill] sm:$0xff] %v7253_v42  ;;  %v7257_v7 = vmul.f32 %v5822_v47, %v3458_v23 }
 0x14c   : > { %7721 = vst [vmem:[#allocation5_spill] sm:$0xff] %v7255_v55  ;;  %v7259_v17 = vmul.f32 %v5823_v14, %v3448_v63  ;;  %v3971_v14 = vlaneseq }
 0x14d   : > { %7722 = vst [vmem:[#allocation7_spill] sm:$0xff] %v7257_v7  ;;  %v5588_v32 = vpop.f32.mrb[28].mxu0  ;;  %v3589_v1 = vpop.permute.xlu0 %3588 }
 0x14e   : > { %7723 = vst [vmem:[#allocation8_spill] sm:$0xff] %v7259_v17  ;;  %v5554_v15 = vpop.f32.mrb[28].mxu1  ;;  %v1402_v40 = vpop.f32.mrb[29].mxu0 }
 0x14f   : > { %v5824_v50 = vadd.f32 %v5588_v32, %v5554_v15  ;;  %v916_v2 = vpop.f32.mrb[29].mxu1  ;;  %v5589_v48 = vpop.f32.mrb[30].mxu0  ;;  %v3483_v15 = vmul.f32 %v7107_v35, %v6985_v53 }
 0x150   : > { %v5825_v60 = vadd.f32 %v1402_v40, %v916_v2  ;;  %v5555_v20 = vpop.f32.mrb[30].mxu1  ;;  %v1405_v9 = vpop.f32.mrb[31].mxu0 }
 0x151   : > { %v7261_v57 = vmul.f32 %v5824_v50, %v3473_v39  ;;  %v5826_v56 = vadd.f32 %v5589_v48, %v5555_v20  ;;  %v919_v22 = vpop.f32.mrb[31].mxu1  ;;  %v7269_v0 = vpop.permute.xlu1 %3603 }
 0x152   : > { %v5827_v54 = vadd.f32 %v1405_v9, %v919_v22  ;;  %v7263_v23 = vmul.f32 %v5825_v60, %v3463_v62  ;;  %v3599_v16 = vpop.permute.xlu0 %3598  ;;  %v6136_v62 = vmov 1983009808   ;;  %v7286_v60 = vld [vmem:[%s7695_s2] ss:$0 sm:$0xff] }
 0x153   : > { %7724 = vst [vmem:[#allocation9_spill] sm:$0xff] %v7261_v57  ;;  %v7265_v26 = vmul.f32 %v5826_v56, %v3478_v13  ;;  %v3969_v61 = vunpack.c.l.s4 %v6136_v62 }
 0x154   : > { %7725 = vst [vmem:[#allocation10_spill] sm:$0xff] %v7263_v23  ;;  %v7267_v63 = vmul.f32 %v5827_v54, %v3468_v52  ;;  %v3482_v52 = vmul.f32 %v7094_v45, %v6974_v24  ;;  %v3972_v54 = vshrl.u32 %v3971_v14, 7 }
 0x155   : > { %7726 = vst [vmem:[#allocation11_spill] sm:$0xff] %v7265_v26  ;;  %v7271_v18 = vpop.permute.xlu1 %3613  ;;  %v3970_v24 = vunpack.c.0.s8 %v3969_v61 }
 0x156   : > { %7727 = vst [vmem:[#allocation12_spill] sm:$0xff] %v7267_v63  ;;  %v3609_v59 = vpop.permute.xlu0 %3608 }
 0x159   : > { %v7273_v43 = vpop.permute.xlu1 %3628 }
 0x15a   : > { %v7275_v25 = vpop.permute.xlu0 %3618 }
 0x15d   : > { %v7277_v47 = vpop.permute.xlu1 %3648 }
 0x161   : > { %v7294_v61 = vpop.permute.xlu1 %3668 }
 0x1d5   : > { %v5764_v44 = vpop.f32.mrb[32].mxu0 }
 0x1d6   : > { %v5662_v39 = vpop.f32.mrb[32].mxu1  ;;  %v3738_v32 = vmul.f32 %v5764_v44, %v3589_v1  ;;  %v3129_v13 = vpop.f32.mrb[33].mxu0 }
 0x1d7   : > { %v3514_v40 = vadd.f32 %v5662_v39, %v3482_v52  ;;  %v1964_v50 = vpop.f32.mrb[33].mxu1  ;;  %v3736_v2 = vmul.f32 %v3579_v12, %v3129_v13  ;;  %v5765_v48 = vpop.f32.mrb[34].mxu0 }
 0x1d8   : > { %v3512_v20 = vadd.f32 %v7114_v31, %v1964_v50  ;;  %v5663_v45 = vpop.f32.mrb[34].mxu1  ;;  %v3739_v9 = vmul.f32 %v5765_v48, %v3594_v10  ;;  %v3132_v56 = vpop.f32.mrb[35].mxu0  ;;  %v7296_v10 = vsub.s32 %v3970_v24, %v3972_v54 }
 0x1d9   : > { %v3770_v22 = vadd.f32 %v3738_v32, %v3514_v40  ;;  %v3515_v1 = vadd.f32 %v5663_v45, %v3483_v15  ;;  %v1967_v62 = vpop.f32.mrb[35].mxu1  ;;  %v3737_v53 = vmul.f32 %v3584_v11, %v3132_v56  ;;  %v7291_v39 = vpop.permute.xlu0 %3638  ;;  %v7704_v11 = vmov 0.0  }
 0x1da   : > { %v3768_v35 = vadd.f32 %v3736_v2, %v3512_v20  ;;  %v3513_v12 = vadd.f32 %v7123_v33, %v1967_v62 }
 0x1db   : > { %v3809_v52 = vadd.f32 %v7286_v60, %v3770_v22  ;;  %v3771_v44 = vadd.f32 %v3739_v9, %v3515_v1 }
 0x1dc   : > { %v3807_v13 = vadd.f32 %v7286_v60, %v3768_v35  ;;  %v3769_v31 = vadd.f32 %v3737_v53, %v3513_v12 }
 0x1dd   : > { %vm3841_vm4 = vcmp.ge.f32.partialorder %v3809_v52, 1.0  ;;  %v3810_v14 = vadd.f32 %v7286_v60, %v3771_v44  ;;  %v5768_v32 = vpop.f32.mrb[36].mxu0 }
 0x1de   : > { %v5239_v15 = vsel %vm3841_vm4, 1.0, %v7704_v11  ;;  %vm3839_vm5 = vcmp.ge.f32.partialorder %v3807_v13, 1.0  ;;  %v3808_v33 = vadd.f32 %v7286_v60, %v3769_v31  ;;  %v5666_v40 = vpop.f32.mrb[36].mxu1  ;;  %v3742_v50 = vmul.f32 %v5768_v32, %v3609_v59  ;;  %v3145_v2 = vpop.f32.mrb[37].mxu0 }
 0x1df   : > { %v5237_v48 = vsel %vm3839_vm5, 1.0, %v7704_v11  ;;  %vm3842_vm6 = vcmp.ge.f32.partialorder %v3810_v14, 1.0  ;;  %v3518_v20 = vadd.f32 %v5666_v40, %v7138_v49  ;;  %v1980_v45 = vpop.f32.mrb[37].mxu1  ;;  %v3740_v24 = vmul.f32 %v3599_v16, %v3145_v2  ;;  %v5769_v9 = vpop.f32.mrb[38].mxu0 }
 0x1e0   : > { %v3935_v56 = vmax.f32 %v5237_v48, %v5239_v15  ;;  %v5240_v22 = vsel %vm3842_vm6, 1.0, %v7704_v11  ;;  %vm3840_vm7 = vcmp.ge.f32.partialorder %v3808_v33, 1.0  ;;  %v3516_v54 = vadd.f32 %v7146_v3, %v1980_v45  ;;  %v5667_v1 = vpop.f32.mrb[38].mxu1  ;;  %v3148_v62 = vpop.f32.mrb[39].mxu0 }
 0x1e1   : > { %v5238_v53 = vsel %vm3840_vm7, 1.0, %v7704_v11  ;;  %v3774_v59 = vadd.f32 %v3742_v50, %v3518_v20  ;;  %v3519_v35 = vadd.f32 %v5667_v1, %v7149_v4  ;;  %v3743_v12 = vmul.f32 %v5769_v9, %v7271_v18  ;;  %v1983_v52 = vpop.f32.mrb[39].mxu1  ;;  %v7316_v15 = vpop.permute.xlu0 %3658 }
 0x1e2   : > { %v3967_v49 = vcombine.high %v3935_v56, %v3935_v56  ;;  %v3974_v16 = vrot.slane %v3935_v56, %v7296_v10  ;;  %v3936_v44 = vmax.f32 %v5238_v53, %v5240_v22  ;;  %v3772_v13 = vadd.f32 %v3740_v24, %v3516_v54  ;;  %v7319_v50 = vpop.permute.xlu1 %3688 }
 0x1e3   : > { %v3813_v31 = vadd.f32 %v7286_v60, %v3774_v59  ;;  %v3775_v14 = vadd.f32 %v3743_v12, %v3519_v35  ;;  %v7311_v3 = vadd.f32 %v7160_v5, %v1983_v52  ;;  %v7314_v32 = vmul.f32 %v7269_v0, %v3148_v62  ;;  %7728 = vst [vmem:[#allocation13_spill] sm:$0xff] %v7319_v50 }
 0x1e4   : > { %v3981_v4 = vrot.slane %v3967_v49, %v7296_v10  ;;  %v3982_v18 = vcombine.high %v3974_v16, %v3974_v16  ;;  %v5269_v33 = vrot.slane %v3974_v16, 9  ;;  %v3984_v40 = vcombine.high %v3936_v44, %v3936_v44 }
 0x1e5   : > { %v3991_v2 = vrot.slane %v3936_v44, %v7296_v10  ;;  %vm3845_vm9 = vcmp.ge.f32.partialorder %v3813_v31, 1.0  ;;  %v3811_v48 = vadd.f32 %v7286_v60, %v3772_v13  ;;  %v7324_v5 = vadd.f32 %v7286_v60, %v3775_v14  ;;  %v7326_v0 = vpop.f32.mrb[40].mxu0 }
 0x1e6   : > { %v3983_v20 = vcombine.high %v3981_v4, %v3981_v4  ;;  %v5270_v45 = vrot.slane %v3982_v18, 9  ;;  %v5271_v24 = vrot.slane %v3981_v4, 9  ;;  %v4495_v9 = vmax.f32 %v3974_v16, %v5269_v33  ;;  %v7328_v56 = vpop.f32.mrb[40].mxu1  ;;  %v7330_v22 = vpop.f32.mrb[41].mxu0 }
 0x1e7   : > { %v3998_v54 = vrot.slane %v3984_v40, %v7296_v10  ;;  %v3999_v1 = vcombine.high %v3991_v2, %v3991_v2  ;;  %v5273_v62 = vrot.slane %v3991_v2, 9  ;;  %v5243_v53 = vsel %vm3845_vm9, 1.0, %v7704_v11  ;;  %v7334_v59 = vpop.f32.mrb[41].mxu1  ;;  %v7336_v35 = vpop.f32.mrb[42].mxu0 }
 0x1e8   : > { %v5272_v12 = vrot.slane %v3983_v20, 9  ;;  %v4496_v52 = vmax.f32 %v3982_v18, %v5270_v45  ;;  %v4497_v49 = vmax.f32 %v3981_v4, %v5271_v24  ;;  %v4559_v16 = vpack.c.bf16 %v4495_v9, %v4495_v9  ;;  %v7338_v44 = vpop.f32.mrb[42].mxu1  ;;  %v7340_v13 = vpop.f32.mrb[43].mxu0 }
 0x1e9   : > { %v4000_v31 = vcombine.high %v3998_v54, %v3998_v54  ;;  %v5274_v14 = vrot.slane %v3999_v1, 9  ;;  %v5275_v33 = vrot.slane %v3998_v54, 9  ;;  %v4499_v40 = vmax.f32 %v3991_v2, %v5273_v62  ;;  %v7342_v63 = vpop.f32.mrb[43].mxu1  ;;  %v7344_v9 = vpop.permute.xlu0 %3678 }
 0x1ea   : > { %v4498_v11 = vmax.f32 %v3983_v20, %v5272_v12  ;;  %v4560_v26 = vpack.c.bf16 %v4496_v52, %v4496_v52  ;;  %v4561_v23 = vpack.c.bf16 %v4497_v49, %v4497_v49  ;;  %v4687_v57 = vunpack.c.l.b16 %v4559_v16  ;;  %7729 = vst [vmem:[#allocation14_spill] sm:$0xff] %v7344_v9  ;;  %v7346_v2 = vpop.permute.xlu1 %3708 }
 0x1eb   : > { %v5276_v18 = vrot.slane %v4000_v31, 9  ;;  %v4500_v4 = vmax.f32 %v3999_v1, %v5274_v14  ;;  %v4501_v45 = vmax.f32 %v3998_v54, %v5275_v33  ;;  %v4563_v24 = vpack.c.bf16 %v4499_v40, %v4499_v40  ;;  %7730 = vst [vmem:[#allocation15_spill] sm:$0xff] %v7346_v2 }
 0x1ec   : > { %v4562_v17 = vpack.c.bf16 %v4498_v11, %v4498_v11  ;;  %v4688_v7 = vunpack.c.l.b16 %v4560_v26  ;;  %v4689_v55 = vunpack.c.l.b16 %v4561_v23  ;;  %vm3843_vm0 = vcmp.ge.f32.partialorder %v3811_v48, 1.0 }
 0x1ed   : > { %v4502_v62 = vmax.f32 %v4000_v31, %v5276_v18  ;;  %v4564_v42 = vpack.c.bf16 %v4500_v4, %v4500_v4  ;;  %v4565_v20 = vpack.c.bf16 %v4501_v45, %v4501_v45  ;;  %v4691_v12 = vunpack.c.l.b16 %v4563_v24  ;;  %v7348_v52 = vpop.f32.mrb[44].mxu0 }
 0x1ee   : > { %v4690_v49 = vunpack.c.l.b16 %v4562_v17  ;;  %v4751_v16 = vrot.slane %v4688_v7, 7  ;;  %v4754_v1 = vrot.slane %v4689_v55, 6  ;;  %v7731_v54 = vmov 0.0   ;;  %v7351_v33 = vpop.f32.mrb[44].mxu1  ;;  %v7353_v40 = vpop.f32.mrb[45].mxu0 }
 0x1ef   : > { %v5241_v14 = vsel %vm3843_vm0, 1.0, %v7731_v54  ;;  %v4566_v26 = vpack.c.bf16 %v4502_v62, %v4502_v62  ;;  %v4692_v23 = vunpack.c.l.b16 %v4564_v42  ;;  %v4693_v11 = vunpack.c.l.b16 %v4565_v20  ;;  %v7355_v2 = vpop.f32.mrb[45].mxu1  ;;  %v7357_v31 = vpop.f32.mrb[46].mxu0 }
 0x1f0   : > { %v4760_v48 = vrot.slane %v4691_v12, 4  ;;  %v4753_v18 = vsel %vm4752_vm8, %v4751_v16, %v4687_v57  ;;  %v4757_v4 = vrot.slane %v4690_v49, 5  ;;  %v3937_v17 = vmax.f32 %v5241_v14, %v5243_v53  ;;  %v7361_v55 = vpop.f32.mrb[46].mxu1  ;;  %v7363_v7 = vpop.f32.mrb[47].mxu0 }
 0x1f1   : > { %vm3846_vm1 = vcmp.ge.f32.partialorder %v7324_v5, 1.0  ;;  %v4756_v45 = vsel %vm4755_vm10, %v4754_v1, %v4753_v18  ;;  %v4694_v24 = vunpack.c.l.b16 %v4566_v26  ;;  %v4763_v42 = vrot.slane %v4692_v23, 3  ;;  %v7366_v20 = vpop.f32.mrb[47].mxu1  ;;  %v7376_v14 = vpop.permute.xlu0 %3698 }
 0x1f2   : > { %v4766_v62 = vrot.slane %v4693_v11, 2  ;;  %v4759_v12 = vsel %vm4758_vm11, %v4757_v4, %v4756_v45  ;;  %v4001_v36 = vcombine.high %v3937_v17, %v3937_v17  ;;  %v4008_v57 = vrot.slane %v3937_v17, %v7296_v10  ;;  %7732 = vst [vmem:[#allocation16_spill] sm:$0xff] %v7376_v14  ;;  %v7380_v4 = vpop.permute.xlu1 %3728 }
 0x1f3   : > { %v5244_v53 = vsel %vm3846_vm1, 1.0, %v7731_v54  ;;  %v4762_v5 = vsel %vm4761_vm12, %v4760_v48, %v4759_v12  ;;  %v4769_v49 = vrot.slane %v4694_v24, 1  ;;  %v3773_v16 = vadd.f32 %v7314_v32, %v7311_v3  ;;  %7733 = vst [vmem:[#allocation17_spill] sm:$0xff] %v7380_v4 }
 0x1f4   : > { %v3522_v1 = vadd.f32 %v7328_v56, %v7176_v37  ;;  %v4765_v26 = vsel %vm4764_vm13, %v4763_v42, %v4762_v5  ;;  %v4015_v23 = vrot.slane %v4001_v36, %v7296_v10  ;;  %v4016_v11 = vcombine.high %v4008_v57, %v4008_v57 }
 0x1f5   : > { %v5277_v18 = vrot.slane %v4008_v57, 9  ;;  %v4768_v17 = vsel %vm4767_vm14, %v4766_v62, %v4765_v26  ;;  %v3812_v48 = vadd.f32 %v7286_v60, %v3773_v16  ;;  %v3746_v3 = vmul.f32 %v7326_v0, %v7273_v43  ;;  %v7388_v32 = vpop.f32.mrb[48].mxu0 }
 0x1f6   : > { %v3520_v37 = vadd.f32 %v7186_v34, %v7334_v59  ;;  %v4771_v56 = vsel %vm4770_vm15, %v4769_v49, %v4768_v17  ;;  %v4017_v45 = vcombine.high %v4015_v23, %v4015_v23  ;;  %v5278_v36 = vrot.slane %v4016_v11, 9  ;;  %v7391_v42 = vpop.f32.mrb[48].mxu1  ;;  %v7393_v12 = vpop.f32.mrb[49].mxu0 }
 0x1f7   : > { %v5279_v24 = vrot.slane %v4015_v23, 9  ;;  %v4870_v62 = vpack.c.b16 %v4771_v56, %v4771_v56  ;;  %v4503_v5 = vmax.f32 %v4008_v57, %v5277_v18  ;;  %vm3844_vm3 = vcmp.ge.f32.partialorder %v3812_v48, 1.0  ;;  %v7395_v43 = vpop.f32.mrb[49].mxu1  ;;  %v7397_v0 = vpop.f32.mrb[50].mxu0 }
 0x1f8   : > { %v3778_v16 = vadd.f32 %v3746_v3, %v3522_v1  ;;  %v5280_v34 = vrot.slane %v4017_v45, 9  ;;  %v4504_v59 = vmax.f32 %v4016_v11, %v5278_v36  ;;  %v5242_v49 = vsel %vm3844_vm3, 1.0, %v7731_v54  ;;  %v7400_v17 = vpop.f32.mrb[50].mxu1  ;;  %v7402_v4 = vpop.f32.mrb[51].mxu0 }
 0x1f9   : > { %v4505_v26 = vmax.f32 %v4015_v23, %v5279_v24  ;;  %4889 = vst.msk [vmem:[%s6491_s19 + $0x8] sm:$0xf] %vm4886_vm2, %v4870_v62  ;;  %v4567_v14 = vpack.c.bf16 %v4503_v5, %v4503_v5  ;;  %v3938_v56 = vmax.f32 %v5242_v49, %v5244_v53  ;;  %v3744_v1 = vmul.f32 %v7275_v25, %v7330_v22  ;;  %v7409_v18 = vpop.f32.mrb[51].mxu1  ;;  %v7414_v62 = vpop.permute.xlu0 %3718 }
 0x1fa   : > { %v3817_v57 = vadd.f32 %v7286_v60, %v3778_v16  ;;  %v4506_v48 = vmax.f32 %v4017_v45, %v5280_v34  ;;  %v4568_v11 = vpack.c.bf16 %v4504_v59, %v4504_v59  ;;  %v3523_v3 = vadd.f32 %v7338_v44, %v7189_v27  ;;  %7734 = vst [vmem:[#allocation18_spill] sm:$0xff] %v7414_v62  ;;  %v3634_v22 = vpop.permute.xlu1 %3633 }
 0x1fb   : > { %v4569_v23 = vpack.c.bf16 %v4505_v26, %v4505_v26  ;;  %v4695_v36 = vunpack.c.l.b16 %v4567_v14  ;;  %v4018_v24 = vcombine.high %v3938_v56, %v3938_v56  ;;  %v4025_v21 = vrot.slane %v3938_v56, %v7296_v10 }
 0x1fc   : > { %vm3849_vm4 = vcmp.ge.f32.partialorder %v3817_v57, 1.0  ;;  %v4570_v53 = vpack.c.bf16 %v4506_v48, %v4506_v48  ;;  %v4696_v5 = vunpack.c.l.b16 %v4568_v11  ;;  %v3776_v26 = vadd.f32 %v3744_v1, %v3520_v37 }
 0x1fd   : > { %v4697_v16 = vunpack.c.l.b16 %v4569_v23  ;;  %v5247_v25 = vsel %vm3849_vm4, 1.0, %v7731_v54  ;;  %v4032_v45 = vrot.slane %v4018_v24, %v7296_v10  ;;  %v4033_v34 = vcombine.high %v4025_v21, %v4025_v21  ;;  %v7418_v49 = vpop.f32.mrb[52].mxu0 }
 0x1fe   : > { %v5281_v59 = vrot.slane %v4025_v21, 9  ;;  %7735 = vst [vmem:[#allocation19_spill] sm:$0xff] %v7418_v49  ;;  %v4698_v27 = vunpack.c.l.b16 %v4570_v53  ;;  %v4772_v44 = vrot.slane %v4696_v5, 7  ;;  %v3747_v56 = vmul.f32 %v7336_v35, %v3634_v22  ;;  %v7421_v57 = vpop.f32.mrb[52].mxu1  ;;  %v7423_v48 = vpop.f32.mrb[53].mxu0 }
 0x1ff   : > { %v4774_v14 = vrot.slane %v4697_v16, 6  ;;  %7736 = vst [vmem:[#allocation20_spill] sm:$0xff] %v7423_v48  ;;  %v4034_v11 = vcombine.high %v4032_v45, %v4032_v45  ;;  %v5282_v23 = vrot.slane %v4033_v34, 9  ;;  %v5283_v62 = vrot.slane %v4032_v45, 9  ;;  %v7425_v46 = vpop.f32.mrb[53].mxu1  ;;  %v7427_v24 = vpop.f32.mrb[54].mxu0 }
 0x200   : > { %v4507_v9 = vmax.f32 %v4025_v21, %v5281_v59  ;;  %7737 = vst [vmem:[#allocation21_spill] sm:$0xff] %v7427_v24  ;;  %v4773_v37 = vsel %vm4752_vm8, %v4772_v44, %v4695_v36  ;;  %v4776_v1 = vrot.slane %v4698_v27, 5  ;;  %v3815_v53 = vadd.f32 %v7286_v60, %v3776_v26  ;;  %v7431_v16 = vpop.f32.mrb[54].mxu1  ;;  %v7433_v35 = vpop.f32.mrb[55].mxu0 }
 0x201   : > { %v3779_v5 = vadd.f32 %v3747_v56, %v3523_v3  ;;  %7738 = vst [vmem:[#allocation22_spill] sm:$0xff] %v7433_v35  ;;  %v4775_v22 = vsel %vm4755_vm10, %v4774_v14, %v4773_v37  ;;  %v5284_v48 = vrot.slane %v4034_v11, 9  ;;  %v4508_v49 = vmax.f32 %v4033_v34, %v5282_v23  ;;  %v7436_v21 = vpop.f32.mrb[55].mxu1 }
 0x202   : > { %v4509_v50 = vmax.f32 %v4032_v45, %v5283_v62  ;;  %v4571_v59 = vpack.c.bf16 %v4507_v9, %v4507_v9  ;;  %v4777_v24 = vsel %vm4758_vm11, %v4776_v1, %v4775_v22  ;;  %vm3847_vm5 = vcmp.ge.f32.partialorder %v3815_v53, 1.0  ;;  %v3624_v62 = vpop.permute.xlu0 %3623 }
 0x203   : > { %v3818_v36 = vadd.f32 %v7286_v60, %v3779_v5  ;;  %v4510_v27 = vmax.f32 %v4034_v11, %v5284_v48  ;;  %v4572_v26 = vpack.c.bf16 %v4508_v49, %v4508_v49  ;;  %v5245_v44 = vsel %vm3847_vm5, 1.0, %v7731_v54 }
 0x204   : > { %v4573_v3 = vpack.c.bf16 %v4509_v50, %v4509_v50  ;;  %v4699_v56 = vunpack.c.l.b16 %v4571_v59  ;;  %v3939_v35 = vmax.f32 %v5245_v44, %v5247_v25  ;;  %v3521_v34 = vadd.f32 %v7196_v28, %v7342_v63 }
 0x205   : > { %vm3850_vm6 = vcmp.ge.f32.partialorder %v3818_v36, 1.0  ;;  %v4574_v45 = vpack.c.bf16 %v4510_v27, %v4510_v27  ;;  %v4700_v14 = vunpack.c.l.b16 %v4572_v26  ;;  %v7444_v37 = vpop.f32.mrb[56].mxu0  ;;  %v3745_v49 = vmul.f32 %v3624_v62, %v7340_v13 }
 0x206   : > { %v4701_v9 = vunpack.c.l.b16 %v4573_v3  ;;  %v5248_v23 = vsel %vm3850_vm6, 1.0, %v7731_v54  ;;  %v4778_v1 = vrot.slane %v4699_v56, 4  ;;  %v4035_v48 = vcombine.high %v3939_v35, %v3939_v35  ;;  %v7448_v11 = vpop.f32.mrb[56].mxu1  ;;  %v7450_v25 = vpop.f32.mrb[57].mxu0 }
 0x207   : > { %v4042_v50 = vrot.slane %v3939_v35, %v7296_v10  ;;  %v4702_v53 = vunpack.c.l.b16 %v4574_v45  ;;  %v4780_v28 = vrot.slane %v4700_v14, 3  ;;  %v3526_v5 = vadd.f32 %v7351_v33, %v7206_v8  ;;  %v7454_v22 = vpop.f32.mrb[57].mxu1  ;;  %v7456_v59 = vpop.f32.mrb[58].mxu0 }
 0x208   : > { %v4782_v63 = vrot.slane %v4701_v9, 2  ;;  %7739 = vst [vmem:[#allocation23_spill] sm:$0xff] %v7456_v59  ;;  %v4779_v36 = vsel %vm4761_vm12, %v4778_v1, %v4777_v24  ;;  %v4049_v35 = vrot.slane %v4035_v48, %v7296_v10  ;;  %v7460_v26 = vpop.f32.mrb[58].mxu1  ;;  %v7462_v3 = vpop.f32.mrb[59].mxu0  ;;  %v3777_v62 = vadd.f32 %v3745_v49, %v3521_v34 }
 0x209   : > { %v4050_v27 = vcombine.high %v4042_v50, %v4042_v50  ;;  %v5285_v13 = vrot.slane %v4042_v50, 9  ;;  %7740 = vst [vmem:[#allocation24_spill] sm:$0xff] %v7462_v3  ;;  %v4781_v44 = vsel %vm4764_vm13, %v4780_v28, %v4779_v36  ;;  %v4784_v56 = vrot.slane %v4702_v53, 1  ;;  %v7467_v33 = vpop.f32.mrb[59].mxu1 }
 0x20a   : > { %v3750_v8 = vmul.f32 %v7348_v52, %v7277_v47  ;;  %v4783_v45 = vsel %vm4767_vm14, %v4782_v63, %v4781_v44  ;;  %v4051_v24 = vcombine.high %v4049_v35, %v4049_v35  ;;  %v5287_v9 = vrot.slane %v4049_v35, 9 }
 0x20b   : > { %v5286_v14 = vrot.slane %v4050_v27, 9  ;;  %v4785_v1 = vsel %vm4770_vm15, %v4784_v56, %v4783_v45  ;;  %v4511_v48 = vmax.f32 %v4042_v50, %v5285_v13  ;;  %v3816_v3 = vadd.f32 %v7286_v60, %v3777_v62 }
 0x20c   : > { %v3782_v59 = vadd.f32 %v3750_v8, %v3526_v5  ;;  %v4871_v28 = vpack.c.b16 %v4785_v1, %v4785_v1  ;;  %v5288_v53 = vrot.slane %v4051_v24, 9  ;;  %v4513_v49 = vmax.f32 %v4049_v35, %v5287_v9  ;;  %v3654_v1 = vpop.permute.xlu1 %3653 }
 0x20d   : > { %v4512_v34 = vmax.f32 %v4050_v27, %v5286_v14  ;;  %v4575_v36 = vpack.c.bf16 %v4511_v48, %v4511_v48  ;;  %vm3848_vm7 = vcmp.ge.f32.partialorder %v3816_v3, 1.0  ;;  %v3524_v52 = vadd.f32 %v7214_v30, %v7355_v2  ;;  %v7475_v63 = vpop.f32.mrb[60].mxu0 }
 0x20e   : > { %v3821_v47 = vadd.f32 %v7286_v60, %v3782_v59  ;;  %4890 = vst.msk [vmem:[%s6491_s19 + $0xc] sm:$0xf] %vm4886_vm2, %v4871_v28  ;;  %v4514_v44 = vmax.f32 %v4051_v24, %v5288_v53  ;;  %v4577_v13 = vpack.c.bf16 %v4513_v49, %v4513_v49  ;;  %v5246_v5 = vsel %vm3848_vm7, 1.0, %v7731_v54  ;;  %v7480_v56 = vpop.f32.mrb[60].mxu1  ;;  %v7482_v27 = vpop.f32.mrb[61].mxu0 }
 0x20f   : > { %v4576_v50 = vpack.c.bf16 %v4512_v34, %v4512_v34  ;;  %v4703_v35 = vunpack.c.l.b16 %v4575_v36  ;;  %v3940_v3 = vmax.f32 %v5246_v5, %v5248_v23  ;;  %v3748_v59 = vmul.f32 %v7291_v39, %v7353_v40  ;;  %v7486_v30 = vpop.f32.mrb[61].mxu1  ;;  %v7488_v2 = vpop.f32.mrb[62].mxu0 }
 0x210   : > { %vm3853_vm9 = vcmp.ge.f32.partialorder %v3821_v47, 1.0  ;;  %v4578_v62 = vpack.c.bf16 %v4514_v44, %v4514_v44  ;;  %v4705_v45 = vunpack.c.l.b16 %v4577_v13  ;;  %v7491_v14 = vpop.f32.mrb[62].mxu1  ;;  %v7493_v9 = vpop.f32.mrb[63].mxu0  ;;  %v3527_v39 = vadd.f32 %v7361_v55, %v7217_v29 }
 0x211   : > { %v4704_v8 = vunpack.c.l.b16 %v4576_v50  ;;  %v5251_v24 = vsel %vm3853_vm9, 1.0, %v7731_v54  ;;  %7741 = vst [vmem:[#allocation25_spill] sm:$0xff] %v7493_v9  ;;  %v4052_v48 = vcombine.high %v3940_v3, %v3940_v3  ;;  %v4059_v23 = vrot.slane %v3940_v3, %v7296_v10  ;;  %v7498_v40 = vpop.f32.mrb[63].mxu1 }
 0x212   : > { %v3780_v28 = vadd.f32 %v3748_v59, %v3524_v52  ;;  %v4706_v53 = vunpack.c.l.b16 %v4578_v62  ;;  %v4788_v49 = vrot.slane %v4705_v45, 6  ;;  %v3751_v36 = vmul.f32 %v7357_v31, %v3654_v1 }
 0x213   : > { %v4786_v34 = vrot.slane %v4704_v8, 7  ;;  %v4066_v47 = vrot.slane %v4052_v48, %v7296_v10  ;;  %v4067_v44 = vcombine.high %v4059_v23, %v4059_v23  ;;  %v5289_v50 = vrot.slane %v4059_v23, 9  ;;  %v3644_v48 = vpop.permute.xlu0 %3643 }
 0x214   : > { %v3819_v13 = vadd.f32 %v7286_v60, %v3780_v28  ;;  %v4790_v3 = vrot.slane %v4706_v53, 5  ;;  %v3783_v52 = vadd.f32 %v3751_v36, %v3527_v39  ;;  %v3525_v29 = vadd.f32 %v7223_v38, %v7366_v20 }
 0x215   : > { %v4787_v5 = vsel %vm4752_vm8, %v4786_v34, %v4703_v35  ;;  %v4068_v59 = vcombine.high %v4066_v47, %v4066_v47  ;;  %v5290_v62 = vrot.slane %v4067_v44, 9  ;;  %v5291_v8 = vrot.slane %v4066_v47, 9 }
 0x216   : > { %v4789_v55 = vsel %vm4755_vm10, %v4788_v49, %v4787_v5  ;;  %v4515_v45 = vmax.f32 %v4059_v23, %v5289_v50  ;;  %vm3851_vm0 = vcmp.ge.f32.partialorder %v3819_v13, 1.0  ;;  %v3822_v1 = vadd.f32 %v7286_v60, %v3783_v52 }
 0x217   : > { %v4791_v31 = vsel %vm4758_vm11, %v4790_v3, %v4789_v55  ;;  %v5292_v28 = vrot.slane %v4068_v59, 9  ;;  %v4516_v9 = vmax.f32 %v4067_v44, %v5290_v62  ;;  %v4517_v35 = vmax.f32 %v4066_v47, %v5291_v8 }
 0x218   : > { %v5249_v39 = vsel %vm3851_vm0, 1.0, %v7731_v54  ;;  %v4579_v53 = vpack.c.bf16 %v4515_v45, %v4515_v45  ;;  %vm3854_vm1 = vcmp.ge.f32.partialorder %v3822_v1, 1.0  ;;  %v3749_v38 = vmul.f32 %v3644_v48, %v7363_v7 }
 0x219   : > { %v3941_v34 = vmax.f32 %v5249_v39, %v5251_v24  ;;  %v4518_v20 = vmax.f32 %v4068_v59, %v5292_v28  ;;  %v4580_v49 = vpack.c.bf16 %v4516_v9, %v4516_v9  ;;  %v4581_v36 = vpack.c.bf16 %v4517_v35, %v4517_v35 }
 0x21a   : > { %v5252_v23 = vsel %vm3854_vm1, 1.0, %v7731_v54  ;;  %v4707_v50 = vunpack.c.l.b16 %v4579_v53  ;;  %v3781_v3 = vadd.f32 %v3749_v38, %v3525_v29  ;;  %v3530_v55 = vadd.f32 %v7391_v42, %v7230_v19 }
 0x21b   : > { %v4069_v13 = vcombine.high %v3941_v34, %v3941_v34  ;;  %v4076_v5 = vrot.slane %v3941_v34, %v7296_v10  ;;  %v4582_v52 = vpack.c.bf16 %v4518_v20, %v4518_v20  ;;  %v4708_v44 = vunpack.c.l.b16 %v4580_v49 }
 0x21c   : > { %v4709_v47 = vunpack.c.l.b16 %v4581_v36  ;;  %v4792_v24 = vrot.slane %v4707_v50, 4  ;;  %v3820_v1 = vadd.f32 %v7286_v60, %v3781_v3 }
 0x21d   : > { %v4083_v62 = vrot.slane %v4069_v13, %v7296_v10  ;;  %v4084_v7 = vcombine.high %v4076_v5, %v4076_v5  ;;  %v5293_v59 = vrot.slane %v4076_v5, 9  ;;  %v4710_v9 = vunpack.c.l.b16 %v4582_v52 }
 0x21e   : > { %v4794_v8 = vrot.slane %v4708_v44, 3  ;;  %v4796_v45 = vrot.slane %v4709_v47, 2  ;;  %v4793_v48 = vsel %vm4761_vm12, %v4792_v24, %v4791_v31  ;;  %vm3852_vm3 = vcmp.ge.f32.partialorder %v3820_v1, 1.0 }
 0x21f   : > { %v4085_v28 = vcombine.high %v4083_v62, %v4083_v62  ;;  %v5294_v29 = vrot.slane %v4084_v7, 9  ;;  %v5295_v35 = vrot.slane %v4083_v62, 9  ;;  %v4798_v53 = vrot.slane %v4710_v9, 1 }
 0x220   : > { %v4795_v39 = vsel %vm4764_vm13, %v4794_v8, %v4793_v48  ;;  %v4519_v34 = vmax.f32 %v4076_v5, %v5293_v59  ;;  %v5250_v50 = vsel %vm3852_vm3, 1.0, %v7731_v54  ;;  %v3754_v31 = vmul.f32 %v7388_v32, %v7294_v61 }
 0x221   : > { %v4797_v19 = vsel %vm4767_vm14, %v4796_v45, %v4795_v39  ;;  %v5296_v42 = vrot.slane %v4085_v28, 9  ;;  %v4520_v38 = vmax.f32 %v4084_v7, %v5294_v29  ;;  %v4521_v20 = vmax.f32 %v4083_v62, %v5295_v35 }
 0x222   : > { %v4799_v49 = vsel %vm4770_vm15, %v4798_v53, %v4797_v19  ;;  %v4583_v36 = vpack.c.bf16 %v4519_v34, %v4519_v34  ;;  %v3942_v47 = vmax.f32 %v5250_v50, %v5252_v23  ;;  %v3786_v24 = vadd.f32 %v3754_v31, %v3530_v55  ;;  %v3674_v53 = vpop.permute.xlu1 %3673 }
 0x223   : > { %v4872_v13 = vpack.c.b16 %v4799_v49, %v4799_v49  ;;  %v4522_v3 = vmax.f32 %v4085_v28, %v5296_v42  ;;  %v4584_v52 = vpack.c.bf16 %v4520_v38, %v4520_v38  ;;  %v4585_v44 = vpack.c.bf16 %v4521_v20, %v4521_v20 }
 0x224   : > { %v4711_v5 = vunpack.c.l.b16 %v4583_v36  ;;  %v3528_v59 = vadd.f32 %v7234_v58, %v7395_v43  ;;  %v3752_v8 = vmul.f32 %v7316_v15, %v7393_v12  ;;  %v4086_v45 = vcombine.high %v3942_v47, %v3942_v47 }
 0x225   : > { %4891 = vst.msk [vmem:[%s6491_s19 + $0x10] sm:$0xf] %vm4886_vm2, %v4872_v13  ;;  %v4586_v62 = vpack.c.bf16 %v4522_v3, %v4522_v3  ;;  %v4712_v7 = vunpack.c.l.b16 %v4584_v52  ;;  %v4713_v9 = vunpack.c.l.b16 %v4585_v44  ;;  %v4093_v61 = vrot.slane %v3942_v47, %v7296_v10  ;;  %v3664_v13 = vpop.permute.xlu0 %3663 }
 0x226   : > { %v3825_v32 = vadd.f32 %v7286_v60, %v3786_v24  ;;  %v3531_v23 = vadd.f32 %v7400_v17, %v7237_v41  ;;  %v3784_v58 = vadd.f32 %v3752_v8, %v3528_v59  ;;  %v4100_v43 = vrot.slane %v4086_v45, %v7296_v10 }
 0x227   : > { %v4714_v55 = vunpack.c.l.b16 %v4586_v62  ;;  %v4800_v1 = vrot.slane %v4712_v7, 7  ;;  %v4802_v48 = vrot.slane %v4713_v9, 6  ;;  %v4101_v28 = vcombine.high %v4093_v61, %v4093_v61 }
 0x228   : > { %v5297_v29 = vrot.slane %v4093_v61, 9  ;;  %vm3857_vm4 = vcmp.ge.f32.partialorder %v3825_v32, 1.0  ;;  %v3823_v39 = vadd.f32 %v7286_v60, %v3784_v58  ;;  %v4102_v41 = vcombine.high %v4100_v43, %v4100_v43 }
 0x229   : > { %v4801_v35 = vsel %vm4752_vm8, %v4800_v1, %v4711_v5  ;;  %v4804_v15 = vrot.slane %v4714_v55, 5  ;;  %v5255_v12 = vsel %vm3857_vm4, 1.0, %v7731_v54  ;;  %v5298_v17 = vrot.slane %v4101_v28, 9 }
 0x22a   : > { %v4803_v34 = vsel %vm4755_vm10, %v4802_v48, %v4801_v35  ;;  %v5299_v19 = vrot.slane %v4100_v43, 9  ;;  %v4523_v42 = vmax.f32 %v4093_v61, %v5297_v29  ;;  %vm3855_vm5 = vcmp.ge.f32.partialorder %v3823_v39, 1.0 }
 0x22b   : > { %v4805_v38 = vsel %vm4758_vm11, %v4804_v15, %v4803_v34  ;;  %v3755_v20 = vmul.f32 %v7397_v0, %v3674_v53  ;;  %v5300_v49 = vrot.slane %v4102_v41, 9  ;;  %v4524_v36 = vmax.f32 %v4101_v28, %v5298_v17 }
 0x22c   : > { %v4525_v50 = vmax.f32 %v4100_v43, %v5299_v19  ;;  %v5253_v31 = vsel %vm3855_vm5, 1.0, %v7731_v54  ;;  %v4587_v3 = vpack.c.bf16 %v4523_v42, %v4523_v42  ;;  %v3529_v5 = vadd.f32 %v7241_v6, %v7409_v18 }
 0x22d   : > { %v3943_v52 = vmax.f32 %v5253_v31, %v5255_v12  ;;  %v3787_v44 = vadd.f32 %v3755_v20, %v3531_v23  ;;  %v4526_v47 = vmax.f32 %v4102_v41, %v5300_v49  ;;  %v4588_v24 = vpack.c.bf16 %v4524_v36, %v4524_v36 }
 0x22e   : > { %v4589_v59 = vpack.c.bf16 %v4525_v50, %v4525_v50  ;;  %v3753_v62 = vmul.f32 %v3664_v13, %v7402_v4  ;;  %v4715_v7 = vunpack.c.l.b16 %v4587_v3  ;;  %v3534_v49 = vadd.f32 %v7421_v57, %v7243_v51  ;;  %v3694_v51 = vpop.permute.xlu1 %3693 }
 0x22f   : > { %v4103_v9 = vcombine.high %v3943_v52, %v3943_v52  ;;  %v4110_v0 = vrot.slane %v3943_v52, %v7296_v10  ;;  %v3826_v8 = vadd.f32 %v7286_v60, %v3787_v44  ;;  %v4590_v45 = vpack.c.bf16 %v4526_v47, %v4526_v47  ;;  %v7742_v52 = vld [vmem:[#allocation13_spill] sm:$0xff]  ;;  %v7743_v44 = vld [vmem:[#allocation19_spill] sm:$0xff]  ;;  %v7744_v47 = vld [vmem:[#allocation2_spill] sm:$0xff] }
 0x230   : > { %v4716_v61 = vunpack.c.l.b16 %v4588_v24  ;;  %v4717_v32 = vunpack.c.l.b16 %v4589_v59  ;;  %v3785_v55 = vadd.f32 %v3753_v62, %v3529_v5  ;;  %v4806_v1 = vrot.slane %v4715_v7, 4 }
 0x231   : > { %v4117_v23 = vrot.slane %v4103_v9, %v7296_v10  ;;  %v4118_v48 = vcombine.high %v4110_v0, %v4110_v0  ;;  %v5301_v6 = vrot.slane %v4110_v0, 9  ;;  %v4718_v18 = vunpack.c.l.b16 %v4590_v45  ;;  %v7746_v45 = vld [vmem:[#allocation14_spill] sm:$0xff] }
 0x232   : > { %v4808_v58 = vrot.slane %v4716_v61, 3  ;;  %v4810_v43 = vrot.slane %v4717_v32, 2  ;;  %vm3858_vm6 = vcmp.ge.f32.partialorder %v3826_v8, 1.0  ;;  %v4807_v4 = vsel %vm4761_vm12, %v4806_v1, %v4805_v38  ;;  %v7745_v8 = vld [vmem:[#allocation20_spill] sm:$0xff]  ;;  %v7747_v32 = vld [vmem:[#allocation3_spill] sm:$0xff] }
 0x233   : > { %v4119_v28 = vcombine.high %v4117_v23, %v4117_v23  ;;  %v5302_v29 = vrot.slane %v4118_v48, 9  ;;  %v5303_v35 = vrot.slane %v4117_v23, 9  ;;  %v4812_v12 = vrot.slane %v4718_v18, 1 }
 0x234   : > { %v4809_v15 = vsel %vm4764_vm13, %v4808_v58, %v4807_v4  ;;  %v4527_v39 = vmax.f32 %v4110_v0, %v5301_v6  ;;  %v5256_v53 = vsel %vm3858_vm6, 1.0, %v7731_v54  ;;  %v3824_v38 = vadd.f32 %v7286_v60, %v3785_v55 }
 0x235   : > { %v4811_v34 = vsel %vm4767_vm14, %v4810_v43, %v4809_v15  ;;  %v5304_v41 = vrot.slane %v4119_v28, 9  ;;  %v4528_v17 = vmax.f32 %v4118_v48, %v5302_v29  ;;  %v4529_v19 = vmax.f32 %v4117_v23, %v5303_v35  ;;  %v7749_v15 = vld [vmem:[#allocation6_spill] sm:$0xff] }
 0x236   : > { %v4813_v42 = vsel %vm4770_vm15, %v4812_v12, %v4811_v34  ;;  %v4591_v20 = vpack.c.bf16 %v4527_v39, %v4527_v39  ;;  %vm3856_vm7 = vcmp.ge.f32.partialorder %v3824_v38, 1.0  ;;  %v3758_v5 = vmul.f32 %v7743_v44, %v7742_v52 }
 0x237   : > { %v4873_v36 = vpack.c.b16 %v4813_v42, %v4813_v42  ;;  %v4530_v50 = vmax.f32 %v4119_v28, %v5304_v41  ;;  %v4592_v31 = vpack.c.bf16 %v4528_v17, %v4528_v17  ;;  %v4593_v13 = vpack.c.bf16 %v4529_v19, %v4529_v19  ;;  %v3684_v42 = vpop.permute.xlu0 %3683 }
 0x238   : > { %v4719_v3 = vunpack.c.l.b16 %v4591_v20  ;;  %v3532_v24 = vadd.f32 %v7744_v47, %v7425_v46  ;;  %v5254_v9 = vsel %vm3856_vm7, 1.0, %v7731_v54  ;;  %v3790_v0 = vadd.f32 %v3758_v5, %v3534_v49  ;;  %v7748_v46 = vld [vmem:[#allocation21_spill] sm:$0xff] }
 0x239   : > { %4892 = vst.msk [vmem:[%s6491_s19 + $0x14] sm:$0xf] %vm4886_vm2, %v4873_v36  ;;  %v4594_v59 = vpack.c.bf16 %v4530_v50, %v4530_v50  ;;  %v4720_v62 = vunpack.c.l.b16 %v4592_v31  ;;  %v4721_v7 = vunpack.c.l.b16 %v4593_v13  ;;  %v3944_v57 = vmax.f32 %v5254_v9, %v5256_v53  ;;  %v7750_v50 = vld [vmem:[#allocation22_spill] sm:$0xff] }
 0x23a   : > { %v3756_v61 = vmul.f32 %v7746_v45, %v7745_v8  ;;  %v3535_v55 = vadd.f32 %v7431_v16, %v7747_v32  ;;  %v3759_v6 = vmul.f32 %v7748_v46, %v3694_v51  ;;  %v3829_v43 = vadd.f32 %v7286_v60, %v3790_v0  ;;  %v7587_v0 = vld [vmem:[%s7695_s2] ss:$0 sm:$0xff]  ;;  %v7752_v45 = vld [vmem:[#allocation15_spill] sm:$0xff]  ;;  %v7753_v32 = vld [vmem:[#allocation5_spill] sm:$0xff] }
 0x23b   : > { %v4722_v1 = vunpack.c.l.b16 %v4594_v59  ;;  %v4814_v23 = vrot.slane %v4720_v62, 7  ;;  %v4816_v48 = vrot.slane %v4721_v7, 6  ;;  %v4120_v18 = vcombine.high %v3944_v57, %v3944_v57 }
 0x23c   : > { %v4127_v58 = vrot.slane %v3944_v57, %v7296_v10  ;;  %v3788_v4 = vadd.f32 %v3756_v61, %v3532_v24  ;;  %v3791_v35 = vadd.f32 %v3759_v6, %v3535_v55  ;;  %v3533_v12 = vadd.f32 %v7749_v15, %v7436_v21  ;;  %v7751_v24 = vld [vmem:[#allocation4_spill] sm:$0xff] }
 0x23d   : > { %v4815_v28 = vsel %vm4752_vm8, %v4814_v23, %v4719_v3  ;;  %v4818_v29 = vrot.slane %v4722_v1, 5  ;;  %v4134_v39 = vrot.slane %v4120_v18, %v7296_v10  ;;  %vm3861_vm9 = vcmp.ge.f32.partialorder %v3829_v43, 1.0 }
 0x23e   : > { %v4817_v16 = vsel %vm4755_vm10, %v4816_v48, %v4815_v28  ;;  %v4135_v53 = vcombine.high %v4127_v58, %v4127_v58  ;;  %v5305_v34 = vrot.slane %v4127_v58, 9  ;;  %v3827_v17 = vadd.f32 %v7286_v60, %v3788_v4 }
 0x23f   : > { %v4819_v41 = vsel %vm4758_vm11, %v4818_v29, %v4817_v16  ;;  %v3830_v19 = vadd.f32 %v7286_v60, %v3791_v35  ;;  %v4136_v20 = vcombine.high %v4134_v39, %v4134_v39  ;;  %v5307_v49 = vrot.slane %v4134_v39, 9 }
 0x240   : > { %v5306_v38 = vrot.slane %v4135_v53, 9  ;;  %v4531_v36 = vmax.f32 %v4127_v58, %v5305_v34  ;;  %v5259_v21 = vsel %vm3861_vm9, 1.0, %v7731_v54  ;;  %vm3859_vm0 = vcmp.ge.f32.partialorder %v3827_v17, 1.0 }
 0x241   : > { %vm3862_vm1 = vcmp.ge.f32.partialorder %v3830_v19, 1.0  ;;  %v3757_v31 = vmul.f32 %v3684_v42, %v7750_v50  ;;  %v5308_v13 = vrot.slane %v4136_v20, 9  ;;  %v4533_v52 = vmax.f32 %v4134_v39, %v5307_v49 }
 0x242   : > { %v4532_v3 = vmax.f32 %v4135_v53, %v5306_v38  ;;  %v4595_v44 = vpack.c.bf16 %v4531_v36, %v4531_v36  ;;  %v5257_v5 = vsel %vm3859_vm0, 1.0, %v7731_v54  ;;  %v5260_v47 = vsel %vm3862_vm1, 1.0, %v7731_v54 }
 0x243   : > { %v3789_v60 = vadd.f32 %v3757_v31, %v3533_v12  ;;  %v3538_v59 = vadd.f32 %v7448_v11, %v7751_v24  ;;  %v4534_v62 = vmax.f32 %v4136_v20, %v5308_v13  ;;  %v4597_v9 = vpack.c.bf16 %v4533_v52, %v4533_v52 }
 0x244   : > { %v4596_v7 = vpack.c.bf16 %v4532_v3, %v4532_v3  ;;  %v4723_v51 = vunpack.c.l.b16 %v4595_v44  ;;  %v3945_v57 = vmax.f32 %v5257_v5, %v5259_v21  ;;  %v3762_v61 = vmul.f32 %v7444_v37, %v7752_v45 }
 0x245   : > { %v3828_v8 = vadd.f32 %v7587_v0, %v3789_v60  ;;  %v7594_v55 = vadd.f32 %v7753_v32, %v7454_v22  ;;  %v4598_v11 = vpack.c.bf16 %v4534_v62, %v4534_v62  ;;  %v4725_v23 = vunpack.c.l.b16 %v4597_v9 }
 0x246   : > { %v4724_v1 = vunpack.c.l.b16 %v4596_v7  ;;  %v4820_v48 = vrot.slane %v4723_v51, 4  ;;  %v4137_v46 = vcombine.high %v3945_v57, %v3945_v57  ;;  %v4144_v6 = vrot.slane %v3945_v57, %v7296_v10 }
 0x247   : > { %vm3860_vm3 = vcmp.ge.f32.partialorder %v3828_v8, 1.0  ;;  %v3794_v18 = vadd.f32 %v3762_v61, %v3538_v59  ;;  %v4726_v58 = vunpack.c.l.b16 %v4598_v11  ;;  %v4824_v28 = vrot.slane %v4725_v23, 2 }
 0x248   : > { %v4821_v43 = vsel %vm4761_vm12, %v4820_v48, %v4819_v41  ;;  %v4822_v4 = vrot.slane %v4724_v1, 3  ;;  %v4151_v37 = vrot.slane %v4137_v46, %v7296_v10  ;;  %v4152_v29 = vcombine.high %v4144_v6, %v4144_v6 }
 0x249   : > { %v5309_v35 = vrot.slane %v4144_v6, 9  ;;  %v5258_v22 = vsel %vm3860_vm3, 1.0, %v7731_v54  ;;  %v4826_v12 = vrot.slane %v4726_v58, 1  ;;  %v3833_v39 = vadd.f32 %v7587_v0, %v3794_v18  ;;  %v7754_v58 = vld [vmem:[#allocation16_spill] sm:$0xff] }
 0x24a   : > { %v4823_v15 = vsel %vm4764_vm13, %v4822_v4, %v4821_v43  ;;  %v3946_v16 = vmax.f32 %v5258_v22, %v5260_v47  ;;  %v4153_v34 = vcombine.high %v4151_v37, %v4151_v37  ;;  %v5310_v17 = vrot.slane %v4152_v29, 9  ;;  %v3714_v22 = vpop.permute.xlu1 %3713 }
 0x24b   : > { %v4825_v53 = vsel %vm4767_vm14, %v4824_v28, %v4823_v15  ;;  %v5311_v41 = vrot.slane %v4151_v37, 9  ;;  %v4535_v42 = vmax.f32 %v4144_v6, %v5309_v35  ;;  %vm3865_vm4 = vcmp.ge.f32.partialorder %v3833_v39, 1.0 }
 0x24c   : > { %v4827_v19 = vsel %vm4770_vm15, %v4826_v12, %v4825_v53  ;;  %v4154_v20 = vcombine.high %v3946_v16, %v3946_v16  ;;  %v4161_v38 = vrot.slane %v3946_v16, %v7296_v10  ;;  %v5312_v36 = vrot.slane %v4153_v34, 9 }
 0x24d   : > { %v4874_v49 = vpack.c.b16 %v4827_v19, %v4827_v19  ;;  %v4536_v21 = vmax.f32 %v4152_v29, %v5310_v17  ;;  %v4537_v50 = vmax.f32 %v4151_v37, %v5311_v41  ;;  %v4599_v31 = vpack.c.bf16 %v4535_v42, %v4535_v42  ;;  %v7755_v29 = vld [vmem:[#allocation7_spill] sm:$0xff]  ;;  %v3704_v19 = vpop.permute.xlu0 %3703 }
 0x24e   : > { %v4168_v13 = vrot.slane %v4154_v20, %v7296_v10  ;;  %v4169_v3 = vcombine.high %v4161_v38, %v4161_v38  ;;  %v5313_v52 = vrot.slane %v4161_v38, 9  ;;  %v4538_v44 = vmax.f32 %v4153_v34, %v5312_v36  ;;  %v7756_v41 = vld [vmem:[#allocation23_spill] sm:$0xff] }
 0x24f   : > { %4893 = vst.msk [vmem:[%s6491_s19 + $0x18] sm:$0xf] %vm4886_vm2, %v4874_v49  ;;  %v4600_v5 = vpack.c.bf16 %v4536_v21, %v4536_v21  ;;  %v4601_v47 = vpack.c.bf16 %v4537_v50, %v4537_v50  ;;  %v4727_v60 = vunpack.c.l.b16 %v4599_v31  ;;  %v5263_v32 = vsel %vm3865_vm4, 1.0, %v7731_v54  ;;  %v7757_v49 = vld [vmem:[#allocation8_spill] sm:$0xff] }
 0x250   : > { %v4170_v24 = vcombine.high %v4168_v13, %v4168_v13  ;;  %v5314_v59 = vrot.slane %v4169_v3, 9  ;;  %v5315_v62 = vrot.slane %v4168_v13, 9  ;;  %v4602_v7 = vpack.c.bf16 %v4538_v44, %v4538_v44  ;;  %v7758_v31 = vld [vmem:[#allocation24_spill] sm:$0xff] }
 0x251   : > { %v4728_v9 = vunpack.c.l.b16 %v4600_v5  ;;  %v4729_v51 = vunpack.c.l.b16 %v4601_v47  ;;  %v4539_v57 = vmax.f32 %v4161_v38, %v5313_v52  ;;  %v3760_v43 = vmul.f32 %v7754_v58, %v7450_v25  ;;  %v7760_v5 = vld [vmem:[#allocation17_spill] sm:$0xff]  ;;  %v7764_v58 = vld [vmem:[#allocation12_spill] sm:$0xff] }
 0x252   : > { %v5316_v8 = vrot.slane %v4170_v24, 9  ;;  %v4540_v45 = vmax.f32 %v4169_v3, %v5314_v59  ;;  %v4541_v61 = vmax.f32 %v4168_v13, %v5315_v62  ;;  %v4730_v11 = vunpack.c.l.b16 %v4602_v7 }
 0x253   : > { %v4828_v1 = vrot.slane %v4728_v9, 7  ;;  %v4830_v23 = vrot.slane %v4729_v51, 6  ;;  %v4603_v48 = vpack.c.bf16 %v4539_v57, %v4539_v57  ;;  %v3539_v35 = vadd.f32 %v7460_v26, %v7755_v29  ;;  %v7761_v9 = vld [vmem:[#allocation10_spill] sm:$0xff] }
 0x254   : > { %v4542_v46 = vmax.f32 %v4170_v24, %v5316_v8  ;;  %v4604_v6 = vpack.c.bf16 %v4540_v45, %v4540_v45  ;;  %v4605_v18 = vpack.c.bf16 %v4541_v61, %v4541_v61  ;;  %v4832_v28 = vrot.slane %v4730_v11, 5  ;;  %v3734_v8 = vpop.permute.xlu1 %3733  ;;  %v7762_v11 = vld [vmem:[#allocation18_spill] sm:$0xff] }
 0x255   : > { %v4829_v4 = vsel %vm4752_vm8, %v4828_v1, %v4727_v60  ;;  %v4731_v37 = vunpack.c.l.b16 %v4603_v48  ;;  %v3792_v17 = vadd.f32 %v3760_v43, %v7594_v55  ;;  %v3763_v25 = vmul.f32 %v7756_v41, %v3714_v22  ;;  %v7759_v55 = vld [vmem:[#allocation9_spill] sm:$0xff] }
 0x256   : > { %v4831_v15 = vsel %vm4755_vm10, %v4830_v23, %v4829_v4  ;;  %v4606_v12 = vpack.c.bf16 %v4542_v46, %v4542_v46  ;;  %v4732_v16 = vunpack.c.l.b16 %v4604_v6  ;;  %v4733_v39 = vunpack.c.l.b16 %v4605_v18  ;;  %v7763_v23 = vld [vmem:[#allocation11_spill] sm:$0xff] }
 0x257   : > { %v4833_v53 = vsel %vm4758_vm11, %v4832_v28, %v4831_v15  ;;  %v4834_v34 = vrot.slane %v4731_v37, 4  ;;  %v3537_v26 = vadd.f32 %v7757_v49, %v7467_v33  ;;  %v3831_v21 = vadd.f32 %v7587_v0, %v3792_v17 }
 0x258   : > { %v4734_v42 = vunpack.c.l.b16 %v4606_v12  ;;  %v4836_v20 = vrot.slane %v4732_v16, 3  ;;  %v4838_v38 = vrot.slane %v4733_v39, 2  ;;  %v3795_v50 = vadd.f32 %v3763_v25, %v3539_v35 }
 0x259   : > { %v4835_v36 = vsel %vm4761_vm12, %v4834_v34, %v4833_v53  ;;  %v3761_v13 = vmul.f32 %v3704_v19, %v7758_v31  ;;  %v3542_v44 = vadd.f32 %v7480_v56, %v7759_v55  ;;  %v3766_v47 = vmul.f32 %v7475_v63, %v7760_v5 }
 0x25a   : > { %v4837_v3 = vsel %vm4764_vm13, %v4836_v20, %v4835_v36  ;;  %v4840_v52 = vrot.slane %v4734_v42, 1  ;;  %vm3863_vm5 = vcmp.ge.f32.partialorder %v3831_v21, 1.0  ;;  %v3834_v33 = vadd.f32 %v7587_v0, %v3795_v50 }
 0x25b   : > { %v4839_v60 = vsel %vm4767_vm14, %v4838_v38, %v4837_v3  ;;  %v3793_v24 = vadd.f32 %v3761_v13, %v3537_v26  ;;  %v5261_v62 = vsel %vm3863_vm5, 1.0, %v7731_v54  ;;  %v3798_v7 = vadd.f32 %v3766_v47, %v3542_v44 }
 0x25c   : > { %v4841_v59 = vsel %vm4770_vm15, %v4840_v52, %v4839_v60  ;;  %v3540_v51 = vadd.f32 %v7761_v9, %v7486_v30  ;;  %v3947_v56 = vmax.f32 %v5261_v62, %v5263_v32  ;;  %vm3866_vm6 = vcmp.ge.f32.partialorder %v3834_v33, 1.0 }
 0x25d   : > { %v4875_v57 = vpack.c.b16 %v4841_v59, %v4841_v59  ;;  %v3832_v63 = vadd.f32 %v7587_v0, %v3793_v24  ;;  %v5264_v45 = vsel %vm3866_vm6, 1.0, %v7731_v54  ;;  %v3837_v61 = vadd.f32 %v7587_v0, %v3798_v7 }
 0x25e   : > { %v3764_v1 = vmul.f32 %v7762_v11, %v7482_v27  ;;  %v3543_v48 = vadd.f32 %v7491_v14, %v7763_v23  ;;  %v4171_v46 = vcombine.high %v3947_v56, %v3947_v56  ;;  %v4178_v30 = vrot.slane %v3947_v56, %v7296_v10  ;;  %v3724_v27 = vpop.permute.xlu0 %3723 }
 0x25f   : > { %4894 = vst.msk [vmem:[%s6491_s19 + $0x1c] sm:$0xf] %vm4886_vm2, %v4875_v57  ;;  %vm3864_vm7 = vcmp.ge.f32.partialorder %v3832_v63, 1.0  ;;  %v3767_v32 = vmul.f32 %v7488_v2, %v3734_v8  ;;  %vm3869_vm9 = vcmp.ge.f32.partialorder %v3837_v61, 1.0  ;;  %v7648_v43 = vadd.f32 %v7764_v58, %v7498_v40  ;;  %v7765_v2 = vld [vmem:[#allocation25_spill] sm:$0xff] }
 0x260   : > { %v5262_v6 = vsel %vm3864_vm7, 1.0, %v7731_v54  ;;  %v3796_v18 = vadd.f32 %v3764_v1, %v3540_v51  ;;  %v4185_v4 = vrot.slane %v4171_v46, %v7296_v10  ;;  %v4186_v14 = vcombine.high %v4178_v30, %v4178_v30 }
 0x261   : > { %v5317_v28 = vrot.slane %v4178_v30, 9  ;;  %v3948_v37 = vmax.f32 %v5262_v6, %v5264_v45  ;;  %v5267_v29 = vsel %vm3869_vm9, 1.0, %v7731_v54  ;;  %v3799_v22 = vadd.f32 %v3767_v32, %v3543_v48 }
 0x262   : > { %v3835_v35 = vadd.f32 %v7587_v0, %v3796_v18  ;;  %v7654_v15 = vmul.f32 %v3724_v27, %v7765_v2  ;;  %v4187_v12 = vcombine.high %v4185_v4, %v4185_v4  ;;  %v5318_v16 = vrot.slane %v4186_v14, 9 }
 0x263   : > { %v5319_v39 = vrot.slane %v4185_v4, 9  ;;  %v4543_v53 = vmax.f32 %v4178_v30, %v5317_v28  ;;  %v4188_v40 = vcombine.high %v3948_v37, %v3948_v37  ;;  %v4195_v34 = vrot.slane %v3948_v37, %v7296_v10 }
 0x264   : > { %vm3867_vm0 = vcmp.ge.f32.partialorder %v3835_v35, 1.0  ;;  %v7658_v17 = vadd.f32 %v7587_v0, %v3799_v22  ;;  %v5320_v41 = vrot.slane %v4187_v12, 9  ;;  %v4544_v25 = vmax.f32 %v4186_v14, %v5318_v16 }
 0x265   : > { %v4545_v19 = vmax.f32 %v4185_v4, %v5319_v39  ;;  %v4607_v42 = vpack.c.bf16 %v4543_v53, %v4543_v53  ;;  %v4202_v20 = vrot.slane %v4188_v40, %v7296_v10  ;;  %v4203_v38 = vcombine.high %v4195_v34, %v4195_v34 }
 0x266   : > { %v5321_v49 = vrot.slane %v4195_v34, 9  ;;  %v5265_v26 = vsel %vm3867_vm0, 1.0, %v7731_v54  ;;  %v4546_v36 = vmax.f32 %v4187_v12, %v5320_v41  ;;  %v4608_v21 = vpack.c.bf16 %v4544_v25, %v4544_v25 }
 0x267   : > { %v4609_v50 = vpack.c.bf16 %v4545_v19, %v4545_v19  ;;  %v4735_v31 = vunpack.c.l.b16 %v4607_v42  ;;  %v4204_v13 = vcombine.high %v4202_v20, %v4202_v20  ;;  %v5322_v3 = vrot.slane %v4203_v38, 9 }
 0x268   : > { %v5323_v52 = vrot.slane %v4202_v20, 9  ;;  %v4547_v55 = vmax.f32 %v4195_v34, %v5321_v49  ;;  %v4610_v44 = vpack.c.bf16 %v4546_v36, %v4546_v36  ;;  %v4736_v5 = vunpack.c.l.b16 %v4608_v21 }
 0x269   : > { %v4737_v47 = vunpack.c.l.b16 %v4609_v50  ;;  %v3949_v60 = vmax.f32 %v5265_v26, %v5267_v29  ;;  %v5324_v33 = vrot.slane %v4204_v13, 9  ;;  %v4548_v24 = vmax.f32 %v4203_v38, %v5322_v3 }
 0x26a   : > { %v4549_v59 = vmax.f32 %v4202_v20, %v5323_v52  ;;  %v4611_v62 = vpack.c.bf16 %v4547_v55, %v4547_v55  ;;  %v4738_v7 = vunpack.c.l.b16 %v4610_v44  ;;  %v4842_v9 = vrot.slane %v4736_v5, 7 }
 0x26b   : > { %v4844_v51 = vrot.slane %v4737_v47, 6  ;;  %v4205_v57 = vcombine.high %v3949_v60, %v3949_v60  ;;  %v4550_v56 = vmax.f32 %v4204_v13, %v5324_v33  ;;  %v4612_v63 = vpack.c.bf16 %v4548_v24, %v4548_v24 }
 0x26c   : > { %v4613_v8 = vpack.c.bf16 %v4549_v59, %v4549_v59  ;;  %v4739_v45 = vunpack.c.l.b16 %v4611_v62  ;;  %v4843_v61 = vsel %vm4752_vm8, %v4842_v9, %v4735_v31  ;;  %v4846_v11 = vrot.slane %v4738_v7, 5 }
 0x26d   : > { %v4212_v1 = vrot.slane %v3949_v60, %v7296_v10  ;;  %v4219_v23 = vrot.slane %v4205_v57, %v7296_v10  ;;  %v4845_v48 = vsel %vm4755_vm10, %v4844_v51, %v4843_v61  ;;  %v4614_v46 = vpack.c.bf16 %v4550_v56, %v4550_v56 }
 0x26e   : > { %v4740_v30 = vunpack.c.l.b16 %v4612_v63  ;;  %v4741_v32 = vunpack.c.l.b16 %v4613_v8  ;;  %v4847_v6 = vsel %vm4758_vm11, %v4846_v11, %v4845_v48  ;;  %v4848_v18 = vrot.slane %v4739_v45, 4 }
 0x26f   : > { %v4220_v58 = vcombine.high %v4212_v1, %v4212_v1  ;;  %v4221_v27 = vcombine.high %v4219_v23, %v4219_v23  ;;  %v4742_v4 = vunpack.c.l.b16 %v4614_v46  ;;  %v5325_v37 = vrot.slane %v4212_v1, 9 }
 0x270   : > { %v4850_v14 = vrot.slane %v4740_v30, 3  ;;  %v4852_v28 = vrot.slane %v4741_v32, 2  ;;  %v4849_v29 = vsel %vm4761_vm12, %v4848_v18, %v4847_v6  ;;  %v5327_v22 = vrot.slane %v4219_v23, 9 }
 0x271   : > { %v5326_v35 = vrot.slane %v4220_v58, 9  ;;  %v5328_v2 = vrot.slane %v4221_v27, 9  ;;  %v4854_v16 = vrot.slane %v4742_v4, 1  ;;  %v4551_v41 = vmax.f32 %v4212_v1, %v5325_v37 }
 0x272   : > { %v4851_v12 = vsel %vm4764_vm13, %v4850_v14, %v4849_v29  ;;  %v4553_v40 = vmax.f32 %v4219_v23, %v5327_v22  ;;  %vm3870_vm1 = vcmp.ge.f32.partialorder %v7658_v17, 1.0  ;;  %v3797_v25 = vadd.f32 %v7654_v15, %v7648_v43 }
 0x273   : > { %v4853_v39 = vsel %vm4767_vm14, %v4852_v28, %v4851_v12  ;;  %v4552_v53 = vmax.f32 %v4220_v58, %v5326_v35  ;;  %v4554_v42 = vmax.f32 %v4221_v27, %v5328_v2  ;;  %v5268_v36 = vsel %vm3870_vm1, 1.0, %v7731_v54 }
 0x274   : > { %v4855_v34 = vsel %vm4770_vm15, %v4854_v16, %v4853_v39  ;;  %v4617_v38 = vpack.c.bf16 %v4553_v40, %v4553_v40  ;;  %v3836_v49 = vadd.f32 %v7587_v0, %v3797_v25  ;;  %v4615_v21 = vpack.c.bf16 %v4551_v41, %v4551_v41 }
 0x275   : > { %v4876_v19 = vpack.c.b16 %v4855_v34, %v4855_v34  ;;  %v4616_v20 = vpack.c.bf16 %v4552_v53, %v4552_v53  ;;  %v4618_v50 = vpack.c.bf16 %v4554_v42, %v4554_v42 }
 0x276   : > { %vm3868_vm3 = vcmp.ge.f32.partialorder %v3836_v49, 1.0  ;;  %v4745_v31 = vunpack.c.l.b16 %v4617_v38  ;;  %v4743_v43 = vunpack.c.l.b16 %v4615_v21 }
 0x277   : > { %4895 = vst.msk [vmem:[%s6491_s19 + $0x20] sm:$0xf] %vm4886_vm2, %v4876_v19  ;;  %v4744_v26 = vunpack.c.l.b16 %v4616_v20  ;;  %v5266_v17 = vsel %vm3868_vm3, 1.0, %v7731_v54  ;;  %v4746_v55 = vunpack.c.l.b16 %v4618_v50 }
 0x278   : > { %v3950_v3 = vmax.f32 %v5266_v17, %v5268_v36  ;;  %v4858_v44 = vrot.slane %v4745_v31, 6 }
 0x279   : > { %v4856_v13 = vrot.slane %v4744_v26, 7  ;;  %v4860_v7 = vrot.slane %v4746_v55, 5 }
 0x27a   : > { %v4222_v15 = vcombine.high %v3950_v3, %v3950_v3  ;;  %v4229_v52 = vrot.slane %v3950_v3, %v7296_v10 }
 0x27b   : > { %v4857_v0 = vsel %vm4752_vm8, %v4856_v13, %v4743_v43 }
 0x27c   : > { %v4236_v5 = vrot.slane %v4222_v15, %v7296_v10  ;;  %v4237_v47 = vcombine.high %v4229_v52, %v4229_v52  ;;  %v5329_v60 = vrot.slane %v4229_v52, 9  ;;  %v4859_v54 = vsel %vm4755_vm10, %v4858_v44, %v4857_v0 }
 0x27d   : > { %v4861_v10 = vsel %vm4758_vm11, %v4860_v7, %v4859_v54 }
 0x27e   : > { %v4238_v33 = vcombine.high %v4236_v5, %v4236_v5  ;;  %v5330_v24 = vrot.slane %v4237_v47, 9  ;;  %v5331_v59 = vrot.slane %v4236_v5, 9  ;;  %v4555_v62 = vmax.f32 %v4229_v52, %v5329_v60 }
 0x280   : > { %v5332_v9 = vrot.slane %v4238_v33, 9  ;;  %v4556_v51 = vmax.f32 %v4237_v47, %v5330_v24  ;;  %v4557_v57 = vmax.f32 %v4236_v5, %v5331_v59  ;;  %v4619_v56 = vpack.c.bf16 %v4555_v62, %v4555_v62 }
 0x282   : > { %v4558_v63 = vmax.f32 %v4238_v33, %v5332_v9  ;;  %v4620_v8 = vpack.c.bf16 %v4556_v51, %v4556_v51  ;;  %v4621_v45 = vpack.c.bf16 %v4557_v57, %v4557_v57  ;;  %v4747_v61 = vunpack.c.l.b16 %v4619_v56 }
 0x284   : > { %v4622_v11 = vpack.c.bf16 %v4558_v63, %v4558_v63  ;;  %v4748_v1 = vunpack.c.l.b16 %v4620_v8  ;;  %v4749_v23 = vunpack.c.l.b16 %v4621_v45  ;;  %v4862_v48 = vrot.slane %v4747_v61, 4 }
 0x286   : > { %v4750_v46 = vunpack.c.l.b16 %v4622_v11  ;;  %v4863_v30 = vsel %vm4761_vm12, %v4862_v48, %v4861_v10  ;;  %v4864_v32 = vrot.slane %v4748_v1, 3  ;;  %v4866_v6 = vrot.slane %v4749_v23, 2 }
 0x288   : > { %v4865_v18 = vsel %vm4764_vm13, %v4864_v32, %v4863_v30  ;;  %v4868_v58 = vrot.slane %v4750_v46, 1 }
 0x289   : > { %v4867_v27 = vsel %vm4767_vm14, %v4866_v6, %v4865_v18 }
 0x28a   : > { %v4869_v4 = vsel %vm4770_vm15, %v4868_v58, %v4867_v27 }
 0x28b   : > { %v4877_v14 = vpack.c.b16 %v4869_v4, %v4869_v4 }
 0x28d   : > { %4896 = vst.msk [vmem:[%s6491_s19 + $0x24] sm:$0xf] %vm4886_vm2, %v4877_v14 }
 0x28e PF: > { %s15_s18 = sadd.s32 1, %s6133_s18  }
 0x28f   : > { %p12_p4 = scmp.ge.s32.totalorder %s15_s18, 4  }
 0x291   :  { %14 = sbr.rel (!%p12_p4) target bundleno = 1 (0x1), region = 78 }

</bundles_post_ra>
